<compile_context>
chip_gen: v7x
topology: tpu7x:2x2x1
jax: 0.10.0
libtpu: 0.0.40
codegen_flags: <defaults>
</compile_context>

<pallas_src>
import jax
import jax.numpy as jnp
from jax import lax
from jax.experimental import pallas as pl
from jax.experimental.pallas import tpu as pltpu


# ----------------------------------------------------------------------------
# Small helpers
# ----------------------------------------------------------------------------

def _round_up(v, m):
    return (v + m - 1) // m * m


def _vmem_limit_bytes():
    try:
        cap = getattr(pltpu.get_tpu_info(), "vmem_capacity_bytes", None)
        if cap:
            return min(int(cap) * 3 // 4, 96 * 1024 * 1024)
    except Exception:
        pass
    return 48 * 1024 * 1024


_VMEM_LIMIT = _vmem_limit_bytes()


def _compiler_params(n_parallel):
    return pltpu.CompilerParams(
        dimension_semantics=("parallel",) * n_parallel,
        vmem_limit_bytes=_VMEM_LIMIT,
    )


def _row_tile(H, W, Ctot, budget=6 * 1024 * 1024):
    """Largest divisor of H whose bf16 padded scratch strip fits `budget`."""
    row_bytes = (W + 32) * Ctot * 2
    cap = max(1, budget // row_bytes - 2)
    best = 1
    for d in range(1, H + 1):
        if H % d == 0 and d <= cap:
            best = d
    return best


def _pick_hw_tile(hw):
    for t in (2048, 1024, 512, 256, 128, 64, 32, 16, 8):
        if hw % t == 0:
            return t
    return None


# ----------------------------------------------------------------------------
# Fused concat + 3x3 conv (stride 1, pad 1) + activation, row-strip tiled
# ----------------------------------------------------------------------------

_PAD = 16  # data lives at sublane offset 16 -> aligned bf16 (16-row packed) writes


def _make_conv3x3_kernel(cin_list, TH, W, nh, act, compute_dtype):
    n_in = len(cin_list)

    def kernel(*refs):
        xc = refs[0:n_in]                 # (1, TH, W, cin) centre strips
        xt = refs[n_in:2 * n_in]          # (1, 1, W, cin)  top halo rows
        xb = refs[2 * n_in:3 * n_in]      # (1, 1, W, cin)  bottom halo rows
        w_ref = refs[3 * n_in]            # (9, Ctot, Cout)
        b_ref = refs[3 * n_in + 1]        # (1, Cout)
        o_ref = refs[3 * n_in + 2]        # (1, TH, W, Cout)
        xp_ref = refs[3 * n_in + 3]       # (TH+2, W+32, Ctot) bf16 scratch
        Ctot = xp_ref.shape[2]
        Cout = o_ref.shape[3]
        h = pl.program_id(1)

        # Zero only the pad columns the shifted taps actually read (cols
        # _PAD-1 and _PAD+W); 2-wide even-offset strips keep bf16 stores on
        # packed-pair boundaries.
        zcol = jnp.zeros((TH + 2, 2, Ctot), compute_dtype)
        xp_ref[:, _PAD - 2:_PAD, :] = zcol
        xp_ref[:, _PAD + W:_PAD + W + 2, :] = zcol

        # Fused channel concat: each operand (strip + its two halo rows) is
        # written into its lane-aligned channel slice of the padded tile --
        # no HBM concat, no HBM pad.
        c0 = 0
        for k in range(n_in):
            cin = cin_list[k]
            xp_ref[1:TH + 1, _PAD:_PAD + W, c0:c0 + cin] = xc[k][0].astype(compute_dtype)
            xp_ref[0:1, _PAD:_PAD + W, c0:c0 + cin] = xt[k][0].astype(compute_dtype)
            xp_ref[TH + 1:TH + 2, _PAD:_PAD + W, c0:c0 + cin] = xb[k][0].astype(compute_dtype)
            c0 += cin

        # Image top/bottom: the (clamped) halo rows must be zero padding.
        @pl.when(h == 0)
        def _():
            xp_ref[0:1, _PAD:_PAD + W, :] = jnp.zeros((1, W, Ctot), compute_dtype)

        @pl.when(h == nh - 1)
        def _():
            xp_ref[TH + 1:TH + 2, _PAD:_PAD + W, :] = jnp.zeros((1, W, Ctot), compute_dtype)

        # 9 taps, each a (TH*W, Ctot) x (Ctot, Cout) MXU matmul, f32 accumulate.
        acc = None
        for t in range(9):                                   # static tap unroll
            dy, dx = t // 3, t % 3
            patch = xp_ref[dy:dy + TH, _PAD - 1 + dx:_PAD - 1 + dx + W, :]
            d = jnp.dot(patch.reshape(TH * W, Ctot), w_ref[t],
                        preferred_element_type=jnp.float32)
            acc = d if acc is None else acc + d
        acc = acc + b_ref[...]                               # bias in epilogue
        if act == "relu":
            acc = jnp.maximum(acc, 0.0)
        elif act == "sigmoid":
            acc = jax.nn.sigmoid(acc)
        o_ref[0] = acc.reshape(TH, W, Cout).astype(o_ref.dtype)

    return kernel


def conv3x3(xs, w, b, act="none", compute_dtype=jnp.bfloat16, out_dtype=None,
            row_tile=None):
    """Fused `concat(xs, axis=-1) -> 3x3 conv (stride 1, pad 1) -> act`.

    xs: array or list of arrays, each (N, H, W, Cin_k) (any float dtype)
    w:  (9, sum(Cin_k), Cout), tap-major (tap t = ky*3 + kx)
    b:  (Cout,)
    """
    if not isinstance(xs, (list, tuple)):
        xs = [xs]
    N, H, W, _ = xs[0].shape
    cin_list = tuple(int(x.shape[-1]) for x in xs)
    Ctot = sum(cin_list)
    Cout = int(w.shape[-1])
    assert w.shape[0] == 9 and w.shape[1] == Ctot, (w.shape, cin_list)
    if out_dtype is None:
        out_dtype = compute_dtype

    TH = row_tile if row_tile is not None else _row_tile(H, W, Ctot)
    assert H % TH == 0, (H, TH)
    nh = H // TH

    kernel = _make_conv3x3_kernel(cin_list, TH, W, nh, act, compute_dtype)

    def center_map(n, h):
        return (n, h, 0, 0)

    def top_map(n, h):                      # last row of previous strip (clamped)
        return (n, jnp.maximum(h * TH - 1, 0), 0, 0)

    def bot_map(n, h):                      # first row of next strip (clamped)
        return (n, jnp.minimum(h * TH + TH, H - 1), 0, 0)

    in_specs = (
        [pl.BlockSpec((1, TH, W, cin), center_map) for cin in cin_list]
        + [pl.BlockSpec((1, 1, W, cin), top_map) for cin in cin_list]
        + [pl.BlockSpec((1, 1, W, cin), bot_map) for cin in cin_list]
        + [pl.BlockSpec((9, Ctot, Cout), lambda n, h: (0, 0, 0)),
           pl.BlockSpec((1, Cout), lambda n, h: (0, 0))]
    )
    return pl.pallas_call(
        kernel,
        out_shape=jax.ShapeDtypeStruct((N, H, W, Cout), out_dtype),
        grid=(N, nh),
        in_specs=in_specs,
        out_specs=pl.BlockSpec((1, TH, W, Cout), lambda n, h: (n, h, 0, 0)),
        scratch_shapes=[pltpu.VMEM((TH + 2, W + 32, Ctot), compute_dtype)],
        compiler_params=_compiler_params(2),
    )(*xs, *xs, *xs, w.astype(compute_dtype), b.astype(jnp.float32).reshape(1, -1))


# ----------------------------------------------------------------------------
# Modulated deformable 3x3 conv (torchvision semantics)
# ----------------------------------------------------------------------------

def _dconv_kernel(p_ref, w_ref, b_ref, o_ref):
    """One (T, 9*Cin) x (9*Cin, Cout) MXU matmul per tile, f32 accumulate."""
    acc = jnp.dot(p_ref[0], w_ref[...], preferred_element_type=jnp.float32)
    o_ref[0] = (acc + b_ref[...]).astype(o_ref.dtype)


def deform_conv3x3(x, offset, mask, w, b, compute_dtype=jnp.bfloat16, out_dtype=None):
    """Modulated DeformConv2d(Cin, Cout, 3, 1, 1), torchvision semantics.

    x:      (N, H, W, Cin)
    offset: (N, H, W, 18)  channel order [dy_0, dx_0, dy_1, dx_1, ...] per tap
    mask:   (N, H, W, 9)   already sigmoided
    w:      (9, Cin, Cout); b: (Cout,)
    """
    N, H, W, Cin = x.shape
    Cout = int(w.shape[-1])
    HW = H * W
    if out_dtype is None:
        out_dtype = compute_dtype

    # TODO(synk): the data-dependent bilinear gather stays in XLA glue; the
    # modulation mask is folded into the bilinear corner weights (in f32) so
    # the Pallas kernel never sees a (..., 1)-lane mask tensor.
    xf = x.astype(compute_dtype).reshape(N, HW, Cin)
    off = offset.astype(jnp.float32)
    msk = mask.astype(jnp.float32)
    base_y = jnp.arange(H, dtype=jnp.float32).reshape(1, H, 1)
    base_x = jnp.arange(W, dtype=jnp.float32).reshape(1, 1, W)

    taps = []
    for k in range(9):
        ky, kx = k // 3, k % 3
        py = base_y + (ky - 1) + off[..., 2 * k]            # (N, H, W)
        px = base_x + (kx - 1) + off[..., 2 * k + 1]
        y0 = jnp.floor(py)
        x0 = jnp.floor(px)
        mk = msk[..., k]
        samp = jnp.zeros((N, H, W, Cin), jnp.float32)
        for yc, xc in ((y0, x0), (y0, x0 + 1.0), (y0 + 1.0, x0), (y0 + 1.0, x0 + 1.0)):
            wgt = (1.0 - jnp.abs(py - yc)) * (1.0 - jnp.abs(px - xc))
            inb = (yc >= 0.0) & (yc <= H - 1.0) & (xc >= 0.0) & (xc <= W - 1.0)
            wk = jnp.where(inb, wgt, 0.0) * mk              # mask folded here
            yi = jnp.clip(yc, 0.0, H - 1.0).astype(jnp.int32)
            xi = jnp.clip(xc, 0.0, W - 1.0).astype(jnp.int32)
            idx = (yi * W + xi).reshape(N, HW)
            vals = jnp.take_along_axis(xf, idx[..., None], axis=1)
            samp = samp + wk[..., None] * vals.reshape(N, H, W, Cin)
        taps.append(samp.astype(compute_dtype))
    # Tap-stacked layout -> one K = 9*Cin matmul fills the 256-deep MXU.
    p = jnp.concatenate(taps, axis=-1).reshape(N, HW, 9 * Cin)

    # Robust HW tiling: pad HW when it has no usable divisor (or only a tiny one).
    T = _pick_hw_tile(HW)
    HWp = HW
    if T is None or (HW > 4096 and T < 256):
        HWp = _round_up(HW, 512)
        if HWp != HW:
            p = jnp.pad(p, ((0, 0), (0, HWp - HW), (0, 0)))
        T = 512

    wr = w.astype(compute_dtype).reshape(9 * Cin, Cout)
    out = pl.pallas_call(
        _dconv_kernel,
        out_shape=jax.ShapeDtypeStruct((N, HWp, Cout), out_dtype),
        grid=(N, HWp // T),
        in_specs=[
            pl.BlockSpec((1, T, 9 * Cin), lambda n, h: (n, h, 0)),
            pl.BlockSpec((9 * Cin, Cout), lambda n, h: (0, 0)),
            pl.BlockSpec((1, Cout), lambda n, h: (0, 0)),
        ],
        out_specs=pl.BlockSpec((1, T, Cout), lambda n, h: (n, h, 0)),
        compiler_params=_compiler_params(2),
    )(p, wr, b.astype(jnp.float32).reshape(1, -1))
    if HWp != HW:
        out = out[:, :HW]
    return out.reshape(N, H, W, Cout)


# ----------------------------------------------------------------------------
# FlowAcc forward (mirrors the PyTorch module; every torch.cat is fused into
# the consuming conv3x3 call)
# ----------------------------------------------------------------------------

def flow_acc_forward(p, f, df, c, f_ofe, emap):
    # All activations flow as bf16 between layers; f32 only where precision
    # matters (deform offsets, final output).
    f16 = f.astype(jnp.bfloat16)
    df16 = df.astype(jnp.bfloat16)
    c16 = c.astype(jnp.bfloat16)
    ofe16 = f_ofe.astype(jnp.bfloat16)
    emap16 = emap.astype(jnp.bfloat16)

    # head (cat [f, df] fused)
    x = conv3x3([f16, df16], p["head1_w"], p["head1_b"], act="relu")
    x = conv3x3(x, p["head2_w"], p["head2_b"])

    # offset head (cat [x, c] fused); 27 logical out-channels in a 32-ch f32 map
    y = conv3x3([x, c16], p["off1_w"], p["off1_b"], act="relu")
    y = conv3x3(y, p["off2_w"], p["off2_b"], act="relu")
    y = conv3x3(y, p["off3_w"], p["off3_b"], out_dtype=jnp.float32)
    off = y[..., :18]
    m = jax.nn.sigmoid(y[..., 18:27])

    # modulated deformable conv on df, then merge1 (cat [dconv, f] fused)
    d = deform_conv3x3(df16, off, m, p["dconv_w"], p["dconv_b"])
    x = conv3x3([d, f16], p["merge1_w"], p["merge1_b"])

    # tail (cat [x, c] fused)
    x = conv3x3([x, c16], p["tail1_w"], p["tail1_b"], act="relu")
    x = conv3x3(x, p["tail2_w"], p["tail2_b"], act="relu")
    x = conv3x3(x, p["tail3_w"], p["tail3_b"])

    # to_mask(emap); 1 logical out-channel, padded to 128 lanes so it can be a
    # lane-aligned merge2_1 operand (the matching merge2_1 weight rows for the
    # padded channels are zero)
    m2 = conv3x3(emap16, p["mask1_w"], p["mask1_b"], act="relu")
    m2 = conv3x3(m2, p["mask2_w"], p["mask2_b"], act="sigmoid")

    # merge2 (cat [x, f_ofe, m2] fused)
    x = conv3x3([x, ofe16, m2], p["merge2_1_w"], p["merge2_1_b"], act="relu")
    x = conv3x3(x, p["merge2_2_w"], p["merge2_2_b"], out_dtype=jnp.float32)
    return x


def init_params(key, in_c=128):
    """Fused-conv parameters (f32), tap-major (9, Cin_total, Cout_pad).

    Cin_total is the sum of the fused-concat operand channel counts (in call
    order); Cin is zero-padded to a multiple of 128 and Cout to the stored
    lane width (multiple of 128, except off3 which only needs 32 lanes).
    Zero pad regions keep the padded layers numerically identical to the
    original narrow ones (e.g. merge2_1 rows 257..383 are zero so the
    sigmoid(0)=0.5 values in the padded to_mask channels contribute nothing).
    """
    assert in_c % 128 == 0, "lane-dense layout assumes in_c is a multiple of 128"
    specs = {
        "head1": (2 * in_c, 256), "head2": (256, 128),
        "off1": (2 * in_c, 256), "off2": (256, 128), "off3": (128, 27),
        "dconv": (in_c, in_c),
        "merge1": (2 * in_c, in_c),
        "tail1": (2 * in_c, 256), "tail2": (256, 256), "tail3": (256, 128),
        "mask1": (2 * in_c, 512), "mask2": (512, 1),
        "merge2_1": (2 * in_c + 1, 512), "merge2_2": (512, in_c),
    }
    params = {}
    keys = jax.random.split(key, len(specs))
    for kk, (name, (ci, co)) in zip(keys, specs.items()):
        kw, kb = jax.random.split(kk)
        scale = 1.0 / (9.0 * ci) ** 0.5
        w = jax.random.normal(kw, (9, ci, co), jnp.float32) * scale
        b = jax.random.normal(kb, (co,), jnp.float32) * scale
        ci_p = _round_up(ci, 128)
        co_p = 32 if name == "off3" else _round_up(co, 128)
        params[name + "_w"] = jnp.pad(w, ((0, 0), (0, ci_p - ci), (0, co_p - co)))
        params[name + "_b"] = jnp.pad(b, ((0, co_p - co),))
    # ZeroConv2d: the offset/mask head is zero-initialized in the PyTorch module.
    # TODO(synk): the original ZeroConv2d may also carry a learned exp-scale;
    # only the zero initialization is reproduced here.
    params["off3_w"] = params["off3_w"] * 0.0
    params["off3_b"] = params["off3_b"] * 0.0
    return params


# ----------------------------------------------------------------------------
# Self-test
# ----------------------------------------------------------------------------

if __name__ == "__main__":
    in_c, N, H, W = 128, 2, 16, 16
    root = jax.random.PRNGKey(0)
    k_f, k_df, k_c, k_ofe, k_emap, k_par = jax.random.split(root, 6)

    f = jax.random.normal(k_f, (N, H, W, in_c), jnp.float32)
    df = jax.random.normal(k_df, (N, H, W, in_c), jnp.float32)
    c = jax.random.normal(k_c, (N, H, W, in_c), jnp.float32)
    f_ofe = jax.random.normal(k_ofe, (N, H, W, in_c), jnp.float32)
    emap = jax.random.normal(k_emap, (N, H, W, 2 * in_c), jnp.float32)

    params = init_params(k_par, in_c)  # f32 reference params

    # Check 1: fused-concat bf16 conv3x3 (forced multi-strip so the halo path
    # is exercised) vs full-precision XLA conv.
    w0, b0 = params["head1_w"], params["head1_b"]
    x0 = jnp.concatenate([f, df], axis=-1)
    ref = lax.conv_general_dilated(
        x0, w0.reshape(3, 3, 2 * in_c, 256), (1, 1), "SAME",
        dimension_numbers=("NHWC", "HWIO", "NHWC"),
        precision=lax.Precision.HIGHEST) + b0
    ref = jnp.maximum(ref, 0.0)
    got = conv3x3([f, df], w0, b0, act="relu", out_dtype=jnp.float32, row_tile=8)
    err = float(jnp.max(jnp.abs(ref - got)))
    assert err < 0.15, f"conv3x3 kernel mismatch (max abs err {err})"

    # Check 2: deformable conv with zero offsets and unit mask == plain conv.
    wd, bd = params["dconv_w"], params["dconv_b"]
    zoff = jnp.zeros((N, H, W, 18), jnp.float32)
    ones = jnp.ones((N, H, W, 9), jnp.float32)
    refd = lax.conv_general_dilated(
        df, wd.reshape(3, 3, in_c, in_c), (1, 1), "SAME",
        dimension_numbers=("NHWC", "HWIO", "NHWC"),
        precision=lax.Precision.HIGHEST) + bd
    gotd = deform_conv3x3(df, zoff, ones, wd, bd, out_dtype=jnp.float32)
    errd = float(jnp.max(jnp.abs(refd - gotd)))
    assert errd < 0.15, f"deform_conv3x3 kernel mismatch (max abs err {errd})"

    # Full forward with bf16-stored weights (biases stay f32).
    params_lo = {k: (v.astype(jnp.bfloat16) if k.endswith("_w") else v)
                 for k, v in params.items()}
    out = jax.jit(flow_acc_forward)(params_lo, f, df, c, f_ofe, emap)
    out = jax.block_until_ready(out)
    assert out.shape == (N, H, W, in_c) and out.dtype == jnp.float32

    print("KERNEL_OK")
</pallas_src>

<mosaic_0001>
module attributes {stable_mosaic.version = 11 : i64} {
  func.func @kernel(%arg0: i32, %arg1: i32, %arg2: memref<1x8x16x128xf32, #tpu.memory_space<vmem>>, %arg3: memref<1x8x16x128xf32, #tpu.memory_space<vmem>>, %arg4: memref<1x1x16x128xf32, #tpu.memory_space<vmem>>, %arg5: memref<1x1x16x128xf32, #tpu.memory_space<vmem>>, %arg6: memref<1x1x16x128xf32, #tpu.memory_space<vmem>>, %arg7: memref<1x1x16x128xf32, #tpu.memory_space<vmem>>, %arg8: memref<9x256x256xbf16, #tpu.memory_space<vmem>>, %arg9: memref<1x256xf32, #tpu.memory_space<vmem>>, %arg10: memref<1x8x16x256xf32, #tpu.memory_space<vmem>>, %arg11: memref<10x48x256xbf16, #tpu.memory_space<vmem>>) attributes {dimension_semantics = [#tpu.dimension_semantics<parallel>, #tpu.dimension_semantics<parallel>], iteration_bounds = array<i64: 2, 2>, scalar_prefetch = 0 : i64, scratch_operands = 1 : i64, tpu.core_type = #tpu.core_type<tc>, window_params = [{transform_indices = @transform_0, window_bounds = array<i64: 1, 8, 16, 128>}, {transform_indices = @transform_1, window_bounds = array<i64: 1, 8, 16, 128>}, {transform_indices = @transform_2, window_bounds = array<i64: 1, 1, 16, 128>}, {transform_indices = @transform_3, window_bounds = array<i64: 1, 1, 16, 128>}, {transform_indices = @transform_4, window_bounds = array<i64: 1, 1, 16, 128>}, {transform_indices = @transform_5, window_bounds = array<i64: 1, 1, 16, 128>}, {pipeline_mode = #tpu.pipeline_mode<synchronous>, transform_indices = @transform_6, window_bounds = array<i64: 9, 256, 256>}, {pipeline_mode = #tpu.pipeline_mode<synchronous>, transform_indices = @transform_7, window_bounds = array<i64: 1, 256>}, {transform_indices = @transform_8, window_bounds = array<i64: 1, 8, 16, 256>}]} {
    %cst = arith.constant 0.000000e+00 : bf16
    %0 = vector.broadcast %cst : bf16 to vector<10x2x256xbf16>
    %c0 = arith.constant 0 : index
    %c14 = arith.constant 14 : index
    %c0_0 = arith.constant 0 : index
    %1 = vector.load %arg11[%c0, %c14, %c0_0] : memref<10x48x256xbf16, #tpu.memory_space<vmem>>, vector<10x2x256xbf16>
    tpu.vector_store %arg11[%c0, %c14, %c0_0], %0 {strides = array<i32>} : memref<10x48x256xbf16, #tpu.memory_space<vmem>>, vector<10x2x256xbf16>,
    %c0_1 = arith.constant 0 : index
    %c32 = arith.constant 32 : index
    %c0_2 = arith.constant 0 : index
    %2 = vector.load %arg11[%c0_1, %c32, %c0_2] : memref<10x48x256xbf16, #tpu.memory_space<vmem>>, vector<10x2x256xbf16>
    tpu.vector_store %arg11[%c0_1, %c32, %c0_2], %0 {strides = array<i32>} : memref<10x48x256xbf16, #tpu.memory_space<vmem>>, vector<10x2x256xbf16>,
    %c0_3 = arith.constant 0 : index
    %c0_4 = arith.constant 0 : index
    %c0_5 = arith.constant 0 : index
    %c0_6 = arith.constant 0 : index
    %3 = vector.load %arg2[%c0_3, %c0_4, %c0_5, %c0_6] : memref<1x8x16x128xf32, #tpu.memory_space<vmem>>, vector<1x8x16x128xf32>
    %4 = vector.shape_cast %3 : vector<1x8x16x128xf32> to vector<8x16x128xf32>
    %5 = arith.truncf %4 : vector<8x16x128xf32> to vector<8x16x128xbf16>
    %c1 = arith.constant 1 : index
    %c16 = arith.constant 16 : index
    %c0_7 = arith.constant 0 : index
    %6 = vector.load %arg11[%c1, %c16, %c0_7] : memref<10x48x256xbf16, #tpu.memory_space<vmem>>, vector<8x16x128xbf16>
    tpu.vector_store %arg11[%c1, %c16, %c0_7], %5 {strides = array<i32>} : memref<10x48x256xbf16, #tpu.memory_space<vmem>>, vector<8x16x128xbf16>,
    %c0_8 = arith.constant 0 : index
    %c0_9 = arith.constant 0 : index
    %c0_10 = arith.constant 0 : index
    %c0_11 = arith.constant 0 : index
    %7 = vector.load %arg4[%c0_8, %c0_9, %c0_10, %c0_11] : memref<1x1x16x128xf32, #tpu.memory_space<vmem>>, vector<1x1x16x128xf32>
    %8 = vector.shape_cast %7 : vector<1x1x16x128xf32> to vector<1x16x128xf32>
    %9 = arith.truncf %8 : vector<1x16x128xf32> to vector<1x16x128xbf16>
    %c0_12 = arith.constant 0 : index
    %c16_13 = arith.constant 16 : index
    %c0_14 = arith.constant 0 : index
    %10 = vector.load %arg11[%c0_12, %c16_13, %c0_14] : memref<10x48x256xbf16, #tpu.memory_space<vmem>>, vector<1x16x128xbf16>
    tpu.vector_store %arg11[%c0_12, %c16_13, %c0_14], %9 {strides = array<i32>} : memref<10x48x256xbf16, #tpu.memory_space<vmem>>, vector<1x16x128xbf16>,
    %c0_15 = arith.constant 0 : index
    %c0_16 = arith.constant 0 : index
    %c0_17 = arith.constant 0 : index
    %c0_18 = arith.constant 0 : index
    %11 = vector.load %arg6[%c0_15, %c0_16, %c0_17, %c0_18] : memref<1x1x16x128xf32, #tpu.memory_space<vmem>>, vector<1x1x16x128xf32>
    %12 = vector.shape_cast %11 : vector<1x1x16x128xf32> to vector<1x16x128xf32>
    %13 = arith.truncf %12 : vector<1x16x128xf32> to vector<1x16x128xbf16>
    %c9 = arith.constant 9 : index
    %c16_19 = arith.constant 16 : index
    %c0_20 = arith.constant 0 : index
    %14 = vector.load %arg11[%c9, %c16_19, %c0_20] : memref<10x48x256xbf16, #tpu.memory_space<vmem>>, vector<1x16x128xbf16>
    tpu.vector_store %arg11[%c9, %c16_19, %c0_20], %13 {strides = array<i32>} : memref<10x48x256xbf16, #tpu.memory_space<vmem>>, vector<1x16x128xbf16>,
    %c0_21 = arith.constant 0 : index
    %c0_22 = arith.constant 0 : index
    %c0_23 = arith.constant 0 : index
    %c0_24 = arith.constant 0 : index
    %15 = vector.load %arg3[%c0_21, %c0_22, %c0_23, %c0_24] : memref<1x8x16x128xf32, #tpu.memory_space<vmem>>, vector<1x8x16x128xf32>
    %16 = vector.shape_cast %15 : vector<1x8x16x128xf32> to vector<8x16x128xf32>
    %17 = arith.truncf %16 : vector<8x16x128xf32> to vector<8x16x128xbf16>
    %c1_25 = arith.constant 1 : index
    %c16_26 = arith.constant 16 : index
    %c128 = arith.constant 128 : index
    %18 = vector.load %arg11[%c1_25, %c16_26, %c128] : memref<10x48x256xbf16, #tpu.memory_space<vmem>>, vector<8x16x128xbf16>
    tpu.vector_store %arg11[%c1_25, %c16_26, %c128], %17 {strides = array<i32>} : memref<10x48x256xbf16, #tpu.memory_space<vmem>>, vector<8x16x128xbf16>,
    %c0_27 = arith.constant 0 : index
    %c0_28 = arith.constant 0 : index
    %c0_29 = arith.constant 0 : index
    %c0_30 = arith.constant 0 : index
    %19 = vector.load %arg5[%c0_27, %c0_28, %c0_29, %c0_30] : memref<1x1x16x128xf32, #tpu.memory_space<vmem>>, vector<1x1x16x128xf32>
    %20 = vector.shape_cast %19 : vector<1x1x16x128xf32> to vector<1x16x128xf32>
    %21 = arith.truncf %20 : vector<1x16x128xf32> to vector<1x16x128xbf16>
    %c0_31 = arith.constant 0 : index
    %c16_32 = arith.constant 16 : index
    %c128_33 = arith.constant 128 : index
    %22 = vector.load %arg11[%c0_31, %c16_32, %c128_33] : memref<10x48x256xbf16, #tpu.memory_space<vmem>>, vector<1x16x128xbf16>
    tpu.vector_store %arg11[%c0_31, %c16_32, %c128_33], %21 {strides = array<i32>} : memref<10x48x256xbf16, #tpu.memory_space<vmem>>, vector<1x16x128xbf16>,
    %c0_34 = arith.constant 0 : index
    %c0_35 = arith.constant 0 : index
    %c0_36 = arith.constant 0 : index
    %c0_37 = arith.constant 0 : index
    %23 = vector.load %arg7[%c0_34, %c0_35, %c0_36, %c0_37] : memref<1x1x16x128xf32, #tpu.memory_space<vmem>>, vector<1x1x16x128xf32>
    %24 = vector.shape_cast %23 : vector<1x1x16x128xf32> to vector<1x16x128xf32>
    %25 = arith.truncf %24 : vector<1x16x128xf32> to vector<1x16x128xbf16>
    %c9_38 = arith.constant 9 : index
    %c16_39 = arith.constant 16 : index
    %c128_40 = arith.constant 128 : index
    %26 = vector.load %arg11[%c9_38, %c16_39, %c128_40] : memref<10x48x256xbf16, #tpu.memory_space<vmem>>, vector<1x16x128xbf16>
    tpu.vector_store %arg11[%c9_38, %c16_39, %c128_40], %25 {strides = array<i32>} : memref<10x48x256xbf16, #tpu.memory_space<vmem>>, vector<1x16x128xbf16>,
    %c0_i32 = arith.constant 0 : i32
    %27 = arith.cmpi eq, %arg1, %c0_i32 : i32
    %28 = arith.extui %27 : i1 to i32
    %c0_i32_41 = arith.constant 0 : i32
    %29 = arith.cmpi ne, %28, %c0_i32_41 : i32
    scf.if %29 {
      %cst_104 = arith.constant 0.000000e+00 : bf16
      %95 = vector.broadcast %cst_104 : bf16 to vector<1x16x256xbf16>
      %c0_105 = arith.constant 0 : index
      %c16_106 = arith.constant 16 : index
      %c0_107 = arith.constant 0 : index
      %96 = vector.load %arg11[%c0_105, %c16_106, %c0_107] : memref<10x48x256xbf16, #tpu.memory_space<vmem>>, vector<1x16x256xbf16>
      tpu.vector_store %arg11[%c0_105, %c16_106, %c0_107], %95 {strides = array<i32>} : memref<10x48x256xbf16, #tpu.memory_space<vmem>>, vector<1x16x256xbf16>,
    } else {
    }
    %c1_i32 = arith.constant 1 : i32
    %30 = arith.cmpi eq, %arg1, %c1_i32 : i32
    %31 = arith.extui %30 : i1 to i32
    %c0_i32_42 = arith.constant 0 : i32
    %32 = arith.cmpi ne, %31, %c0_i32_42 : i32
    scf.if %32 {
      %cst_104 = arith.constant 0.000000e+00 : bf16
      %95 = vector.broadcast %cst_104 : bf16 to vector<1x16x256xbf16>
      %c9_105 = arith.constant 9 : index
      %c16_106 = arith.constant 16 : index
      %c0_107 = arith.constant 0 : index
      %96 = vector.load %arg11[%c9_105, %c16_106, %c0_107] : memref<10x48x256xbf16, #tpu.memory_space<vmem>>, vector<1x16x256xbf16>
      tpu.vector_store %arg11[%c9_105, %c16_106, %c0_107], %95 {strides = array<i32>} : memref<10x48x256xbf16, #tpu.memory_space<vmem>>, vector<1x16x256xbf16>,
    } else {
    }
    %c0_43 = arith.constant 0 : index
    %c15 = arith.constant 15 : index
    %c0_44 = arith.constant 0 : index
    %33 = vector.load %arg11[%c0_43, %c15, %c0_44] : memref<10x48x256xbf16, #tpu.memory_space<vmem>>, vector<8x16x256xbf16>
    %34 = vector.shape_cast %33 : vector<8x16x256xbf16> to vector<128x256xbf16>
    %c0_45 = arith.constant 0 : index
    %c0_46 = arith.constant 0 : index
    %c0_47 = arith.constant 0 : index
    %35 = vector.load %arg8[%c0_45, %c0_46, %c0_47] : memref<9x256x256xbf16, #tpu.memory_space<vmem>>, vector<1x256x256xbf16>
    %36 = vector.shape_cast %35 : vector<1x256x256xbf16> to vector<256x256xbf16>
    %cst_48 = arith.constant dense<0.000000e+00> : vector<128x256xf32>
    %37 = tpu.matmul %34, %36, %cst_48 {dimension_numbers = #tpu.dot_dimension_numbers<[1], [0], [0], [1], [0, 0, 1, 1], [], []>} : vector<128x256xbf16>, vector<256x256xbf16>, vector<128x256xf32> -> vector<128x256xf32>
    %c0_49 = arith.constant 0 : index
    %c16_50 = arith.constant 16 : index
    %c0_51 = arith.constant 0 : index
    %38 = vector.load %arg11[%c0_49, %c16_50, %c0_51] : memref<10x48x256xbf16, #tpu.memory_space<vmem>>, vector<8x16x256xbf16>
    %39 = vector.shape_cast %38 : vector<8x16x256xbf16> to vector<128x256xbf16>
    %c1_52 = arith.constant 1 : index
    %c0_53 = arith.constant 0 : index
    %c0_54 = arith.constant 0 : index
    %40 = vector.load %arg8[%c1_52, %c0_53, %c0_54] : memref<9x256x256xbf16, #tpu.memory_space<vmem>>, vector<1x256x256xbf16>
    %41 = vector.shape_cast %40 : vector<1x256x256xbf16> to vector<256x256xbf16>
    %cst_55 = arith.constant dense<0.000000e+00> : vector<128x256xf32>
    %42 = tpu.matmul %39, %41, %cst_55 {dimension_numbers = #tpu.dot_dimension_numbers<[1], [0], [0], [1], [0, 0, 1, 1], [], []>} : vector<128x256xbf16>, vector<256x256xbf16>, vector<128x256xf32> -> vector<128x256xf32>
    %43 = arith.addf %37, %42 : vector<128x256xf32>
    %c0_56 = arith.constant 0 : index
    %c17 = arith.constant 17 : index
    %c0_57 = arith.constant 0 : index
    %44 = vector.load %arg11[%c0_56, %c17, %c0_57] : memref<10x48x256xbf16, #tpu.memory_space<vmem>>, vector<8x16x256xbf16>
    %45 = vector.shape_cast %44 : vector<8x16x256xbf16> to vector<128x256xbf16>
    %c2 = arith.constant 2 : index
    %c0_58 = arith.constant 0 : index
    %c0_59 = arith.constant 0 : index
    %46 = vector.load %arg8[%c2, %c0_58, %c0_59] : memref<9x256x256xbf16, #tpu.memory_space<vmem>>, vector<1x256x256xbf16>
    %47 = vector.shape_cast %46 : vector<1x256x256xbf16> to vector<256x256xbf16>
    %cst_60 = arith.constant dense<0.000000e+00> : vector<128x256xf32>
    %48 = tpu.matmul %45, %47, %cst_60 {dimension_numbers = #tpu.dot_dimension_numbers<[1], [0], [0], [1], [0, 0, 1, 1], [], []>} : vector<128x256xbf16>, vector<256x256xbf16>, vector<128x256xf32> -> vector<128x256xf32>
    %49 = arith.addf %43, %48 : vector<128x256xf32>
    %c1_61 = arith.constant 1 : index
    %c15_62 = arith.constant 15 : index
    %c0_63 = arith.constant 0 : index
    %50 = vector.load %arg11[%c1_61, %c15_62, %c0_63] : memref<10x48x256xbf16, #tpu.memory_space<vmem>>, vector<8x16x256xbf16>
    %51 = vector.shape_cast %50 : vector<8x16x256xbf16> to vector<128x256xbf16>
    %c3 = arith.constant 3 : index
    %c0_64 = arith.constant 0 : index
    %c0_65 = arith.constant 0 : index
    %52 = vector.load %arg8[%c3, %c0_64, %c0_65] : memref<9x256x256xbf16, #tpu.memory_space<vmem>>, vector<1x256x256xbf16>
    %53 = vector.shape_cast %52 : vector<1x256x256xbf16> to vector<256x256xbf16>
    %cst_66 = arith.constant dense<0.000000e+00> : vector<128x256xf32>
    %54 = tpu.matmul %51, %53, %cst_66 {dimension_numbers = #tpu.dot_dimension_numbers<[1], [0], [0], [1], [0, 0, 1, 1], [], []>} : vector<128x256xbf16>, vector<256x256xbf16>, vector<128x256xf32> -> vector<128x256xf32>
    %55 = arith.addf %49, %54 : vector<128x256xf32>
    %c1_67 = arith.constant 1 : index
    %c16_68 = arith.constant 16 : index
    %c0_69 = arith.constant 0 : index
    %56 = vector.load %arg11[%c1_67, %c16_68, %c0_69] : memref<10x48x256xbf16, #tpu.memory_space<vmem>>, vector<8x16x256xbf16>
    %57 = vector.shape_cast %56 : vector<8x16x256xbf16> to vector<128x256xbf16>
    %c4 = arith.constant 4 : index
    %c0_70 = arith.constant 0 : index
    %c0_71 = arith.constant 0 : index
    %58 = vector.load %arg8[%c4, %c0_70, %c0_71] : memref<9x256x256xbf16, #tpu.memory_space<vmem>>, vector<1x256x256xbf16>
    %59 = vector.shape_cast %58 : vector<1x256x256xbf16> to vector<256x256xbf16>
    %cst_72 = arith.constant dense<0.000000e+00> : vector<128x256xf32>
    %60 = tpu.matmul %57, %59, %cst_72 {dimension_numbers = #tpu.dot_dimension_numbers<[1], [0], [0], [1], [0, 0, 1, 1], [], []>} : vector<128x256xbf16>, vector<256x256xbf16>, vector<128x256xf32> -> vector<128x256xf32>
    %61 = arith.addf %55, %60 : vector<128x256xf32>
    %c1_73 = arith.constant 1 : index
    %c17_74 = arith.constant 17 : index
    %c0_75 = arith.constant 0 : index
    %62 = vector.load %arg11[%c1_73, %c17_74, %c0_75] : memref<10x48x256xbf16, #tpu.memory_space<vmem>>, vector<8x16x256xbf16>
    %63 = vector.shape_cast %62 : vector<8x16x256xbf16> to vector<128x256xbf16>
    %c5 = arith.constant 5 : index
    %c0_76 = arith.constant 0 : index
    %c0_77 = arith.constant 0 : index
    %64 = vector.load %arg8[%c5, %c0_76, %c0_77] : memref<9x256x256xbf16, #tpu.memory_space<vmem>>, vector<1x256x256xbf16>
    %65 = vector.shape_cast %64 : vector<1x256x256xbf16> to vector<256x256xbf16>
    %cst_78 = arith.constant dense<0.000000e+00> : vector<128x256xf32>
    %66 = tpu.matmul %63, %65, %cst_78 {dimension_numbers = #tpu.dot_dimension_numbers<[1], [0], [0], [1], [0, 0, 1, 1], [], []>} : vector<128x256xbf16>, vector<256x256xbf16>, vector<128x256xf32> -> vector<128x256xf32>
    %67 = arith.addf %61, %66 : vector<128x256xf32>
    %c2_79 = arith.constant 2 : index
    %c15_80 = arith.constant 15 : index
    %c0_81 = arith.constant 0 : index
    %68 = vector.load %arg11[%c2_79, %c15_80, %c0_81] : memref<10x48x256xbf16, #tpu.memory_space<vmem>>, vector<8x16x256xbf16>
    %69 = vector.shape_cast %68 : vector<8x16x256xbf16> to vector<128x256xbf16>
    %c6 = arith.constant 6 : index
    %c0_82 = arith.constant 0 : index
    %c0_83 = arith.constant 0 : index
    %70 = vector.load %arg8[%c6, %c0_82, %c0_83] : memref<9x256x256xbf16, #tpu.memory_space<vmem>>, vector<1x256x256xbf16>
    %71 = vector.shape_cast %70 : vector<1x256x256xbf16> to vector<256x256xbf16>
    %cst_84 = arith.constant dense<0.000000e+00> : vector<128x256xf32>
    %72 = tpu.matmul %69, %71, %cst_84 {dimension_numbers = #tpu.dot_dimension_numbers<[1], [0], [0], [1], [0, 0, 1, 1], [], []>} : vector<128x256xbf16>, vector<256x256xbf16>, vector<128x256xf32> -> vector<128x256xf32>
    %73 = arith.addf %67, %72 : vector<128x256xf32>
    %c2_85 = arith.constant 2 : index
    %c16_86 = arith.constant 16 : index
    %c0_87 = arith.constant 0 : index
    %74 = vector.load %arg11[%c2_85, %c16_86, %c0_87] : memref<10x48x256xbf16, #tpu.memory_space<vmem>>, vector<8x16x256xbf16>
    %75 = vector.shape_cast %74 : vector<8x16x256xbf16> to vector<128x256xbf16>
    %c7 = arith.constant 7 : index
    %c0_88 = arith.constant 0 : index
    %c0_89 = arith.constant 0 : index
    %76 = vector.load %arg8[%c7, %c0_88, %c0_89] : memref<9x256x256xbf16, #tpu.memory_space<vmem>>, vector<1x256x256xbf16>
    %77 = vector.shape_cast %76 : vector<1x256x256xbf16> to vector<256x256xbf16>
    %cst_90 = arith.constant dense<0.000000e+00> : vector<128x256xf32>
    %78 = tpu.matmul %75, %77, %cst_90 {dimension_numbers = #tpu.dot_dimension_numbers<[1], [0], [0], [1], [0, 0, 1, 1], [], []>} : vector<128x256xbf16>, vector<256x256xbf16>, vector<128x256xf32> -> vector<128x256xf32>
    %79 = arith.addf %73, %78 : vector<128x256xf32>
    %c2_91 = arith.constant 2 : index
    %c17_92 = arith.constant 17 : index
    %c0_93 = arith.constant 0 : index
    %80 = vector.load %arg11[%c2_91, %c17_92, %c0_93] : memref<10x48x256xbf16, #tpu.memory_space<vmem>>, vector<8x16x256xbf16>
    %81 = vector.shape_cast %80 : vector<8x16x256xbf16> to vector<128x256xbf16>
    %c8 = arith.constant 8 : index
    %c0_94 = arith.constant 0 : index
    %c0_95 = arith.constant 0 : index
    %82 = vector.load %arg8[%c8, %c0_94, %c0_95] : memref<9x256x256xbf16, #tpu.memory_space<vmem>>, vector<1x256x256xbf16>
    %83 = vector.shape_cast %82 : vector<1x256x256xbf16> to vector<256x256xbf16>
    %cst_96 = arith.constant dense<0.000000e+00> : vector<128x256xf32>
    %84 = tpu.matmul %81, %83, %cst_96 {dimension_numbers = #tpu.dot_dimension_numbers<[1], [0], [0], [1], [0, 0, 1, 1], [], []>} : vector<128x256xbf16>, vector<256x256xbf16>, vector<128x256xf32> -> vector<128x256xf32>
    %85 = arith.addf %79, %84 : vector<128x256xf32>
    %c0_97 = arith.constant 0 : index
    %c0_98 = arith.constant 0 : index
    %86 = vector.load %arg9[%c0_97, %c0_98] : memref<1x256xf32, #tpu.memory_space<vmem>>, vector<1x256xf32>
    %87 = vector.broadcast %86 : vector<1x256xf32> to vector<128x256xf32>
    %88 = arith.addf %85, %87 : vector<128x256xf32>
    %cst_99 = arith.constant 0.000000e+00 : f32
    %89 = vector.broadcast %cst_99 : f32 to vector<128x256xf32>
    %90 = arith.maximumf %88, %89 : vector<128x256xf32>
    %91 = vector.shape_cast %90 : vector<128x256xf32> to vector<8x16x256xf32>
    %c0_100 = arith.constant 0 : index
    %c0_101 = arith.constant 0 : index
    %c0_102 = arith.constant 0 : index
    %c0_103 = arith.constant 0 : index
    %92 = vector.load %arg10[%c0_100, %c0_101, %c0_102, %c0_103] : memref<1x8x16x256xf32, #tpu.memory_space<vmem>>, vector<1x8x16x256xf32>
    %93 = vector.shape_cast %92 : vector<1x8x16x256xf32> to vector<8x16x256xf32>
    %94 = vector.shape_cast %91 : vector<8x16x256xf32> to vector<1x8x16x256xf32>
    tpu.vector_store %arg10[%c0_100, %c0_101, %c0_102, %c0_103], %94 {strides = array<i32>} : memref<1x8x16x256xf32, #tpu.memory_space<vmem>>, vector<1x8x16x256xf32>,
    return
  }
  func.func @transform_0(%arg0: i32, %arg1: i32) -> (i32, i32, i32, i32) {
    %c0_i32 = arith.constant 0 : i32
    %c0_i32_0 = arith.constant 0 : i32
    %c0_i32_1 = arith.constant 0 : i32
    return %arg0, %arg1, %c0_i32, %c0_i32_0 : i32, i32, i32, i32
  }
  func.func @transform_1(%arg0: i32, %arg1: i32) -> (i32, i32, i32, i32) {
    %c0_i32 = arith.constant 0 : i32
    %c0_i32_0 = arith.constant 0 : i32
    %c0_i32_1 = arith.constant 0 : i32
    return %arg0, %arg1, %c0_i32, %c0_i32_0 : i32, i32, i32, i32
  }
  func.func @transform_2(%arg0: i32, %arg1: i32) -> (i32, i32, i32, i32) {
    %c8_i32 = arith.constant 8 : i32
    %0 = arith.muli %arg1, %c8_i32 : i32
    %c1_i32 = arith.constant 1 : i32
    %1 = arith.subi %0, %c1_i32 : i32
    %c0_i32 = arith.constant 0 : i32
    %2 = arith.maxsi %1, %c0_i32 : i32
    %c0_i32_0 = arith.constant 0 : i32
    %c0_i32_1 = arith.constant 0 : i32
    %c0_i32_2 = arith.constant 0 : i32
    return %arg0, %2, %c0_i32_0, %c0_i32_1 : i32, i32, i32, i32
  }
  func.func @transform_3(%arg0: i32, %arg1: i32) -> (i32, i32, i32, i32) {
    %c8_i32 = arith.constant 8 : i32
    %0 = arith.muli %arg1, %c8_i32 : i32
    %c1_i32 = arith.constant 1 : i32
    %1 = arith.subi %0, %c1_i32 : i32
    %c0_i32 = arith.constant 0 : i32
    %2 = arith.maxsi %1, %c0_i32 : i32
    %c0_i32_0 = arith.constant 0 : i32
    %c0_i32_1 = arith.constant 0 : i32
    %c0_i32_2 = arith.constant 0 : i32
    return %arg0, %2, %c0_i32_0, %c0_i32_1 : i32, i32, i32, i32
  }
  func.func @transform_4(%arg0: i32, %arg1: i32) -> (i32, i32, i32, i32) {
    %c8_i32 = arith.constant 8 : i32
    %0 = arith.muli %arg1, %c8_i32 : i32
    %c8_i32_0 = arith.constant 8 : i32
    %1 = arith.addi %0, %c8_i32_0 : i32
    %c15_i32 = arith.constant 15 : i32
    %2 = arith.minsi %1, %c15_i32 : i32
    %c0_i32 = arith.constant 0 : i32
    %c0_i32_1 = arith.constant 0 : i32
    %c0_i32_2 = arith.constant 0 : i32
    return %arg0, %2, %c0_i32, %c0_i32_1 : i32, i32, i32, i32
  }
  func.func @transform_5(%arg0: i32, %arg1: i32) -> (i32, i32, i32, i32) {
    %c8_i32 = arith.constant 8 : i32
    %0 = arith.muli %arg1, %c8_i32 : i32
    %c8_i32_0 = arith.constant 8 : i32
    %1 = arith.addi %0, %c8_i32_0 : i32
    %c15_i32 = arith.constant 15 : i32
    %2 = arith.minsi %1, %c15_i32 : i32
    %c0_i32 = arith.constant 0 : i32
    %c0_i32_1 = arith.constant 0 : i32
    %c0_i32_2 = arith.constant 0 : i32
    return %arg0, %2, %c0_i32, %c0_i32_1 : i32, i32, i32, i32
  }
  func.func @transform_6(%arg0: i32, %arg1: i32) -> (i32, i32, i32) {
    %c0_i32 = arith.constant 0 : i32
    %c0_i32_0 = arith.constant 0 : i32
    %c0_i32_1 = arith.constant 0 : i32
    %c0_i32_2 = arith.constant 0 : i32
    return %c0_i32, %c0_i32_0, %c0_i32_1 : i32, i32, i32
  }
  func.func @transform_7(%arg0: i32, %arg1: i32) -> (i32, i32) {
    %c0_i32 = arith.constant 0 : i32
    %c0_i32_0 = arith.constant 0 : i32
    %c0_i32_1 = arith.constant 0 : i32
    return %c0_i32, %c0_i32_0 : i32, i32
  }
  func.func @transform_8(%arg0: i32, %arg1: i32) -> (i32, i32, i32, i32) {
    %c0_i32 = arith.constant 0 : i32
    %c0_i32_0 = arith.constant 0 : i32
    %c0_i32_1 = arith.constant 0 : i32
    return %arg0, %arg1, %c0_i32, %c0_i32_0 : i32, i32, i32, i32
  }
}

</mosaic_0001>

<bundles_post_ra>
// kernel: tpu_custom_call.1
= control target key start
LH: loop header
LB: loop body
LE: loop exit
PB: predicated region body
PF: predicated region fallthrough
CT: control target
= control target key end

     0   :  { %s8769_s0 = inlined_call_operand.hbm [shape: f32[2,16,16,128], index: 0, kind: input, shape index: {}]   ;;  %s8770_s1 = inlined_call_operand.hbm [shape: f32[2,16,16,128], index: 1, kind: input, shape index: {}]   ;;  %s8771_s2 = inlined_call_operand.hbm [shape: f32[2,16,16,128], index: 2, kind: input, shape index: {}]   ;;  %s8772_s3 = inlined_call_operand.hbm [shape: f32[2,16,16,128], index: 3, kind: input, shape index: {}]   ;;  %s8773_s4 = inlined_call_operand.hbm [shape: f32[2,16,16,128], index: 4, kind: input, shape index: {}]   ;;  %s8774_s5 = inlined_call_operand.hbm [shape: f32[2,16,16,128], index: 5, kind: input, shape index: {}]   ;;  %s8775_s6 = inlined_call_operand.hbm [shape: bf16[9,256,256], index: 6, kind: input, shape index: {}]   ;;  %s8776_s7 = inlined_call_operand.hbm [shape: f32[1,256], index: 7, kind: input, shape index: {}]   ;;  %s8777_s8 = inlined_call_operand.hbm [shape: f32[2,16,16,256], index: 8, kind: output, shape index: {}]  }
   0x1   :  { %8838 = sst [smem:[#allocation48_spill]] %s8769_s0 }
   0x2   :  { %8839 = sst [smem:[#allocation49_spill]] %s8770_s1 }
   0x3   :  { %8840 = sst [smem:[#allocation50_spill]] %s8772_s3 }
   0x4   :  { %8841 = sst [smem:[#allocation51_spill]] %s8773_s4 }
   0x5   :  { %8842 = sst [smem:[#allocation52_spill]] %s8774_s5 }
   0x6   :  { %8843 = sst [smem:[#allocation53_spill]] %s8775_s6 }
   0x7   :  { %8844 = sst [smem:[#allocation54_spill]] %s8777_s8 }
   0x8   :  { %13 = vsyncpa [#allocation4], 0 }
   0x9   :  { %15 = vsyncpa [#allocation4 + $0x1], 0 }
   0xa   :  { %16 = vsyncpa [#allocation7], 0 }
   0xb   :  { %18 = vsyncpa [#allocation7 + $0x1], 0 }
   0xc   :  { %19 = vsyncpa [#allocation10], 0 }
   0xd   :  { %21 = vsyncpa [#allocation10 + $0x1], 0 }
   0xe   :  { %22 = vsyncpa [#allocation13], 0 }
   0xf   :  { %24 = vsyncpa [#allocation13 + $0x1], 0 }
  0x10   :  { %25 = vsyncpa [#allocation16], 0 }
  0x11   :  { %26 = vsyncpa [#allocation5], 0 }
  0x12   :  { %28 = vsyncpa [#allocation5 + $0x1], 0  ;;  %s7302_s27 = smov 0   ;;  %s7304_s28 = smov 0  }
  0x13   :  { %s7306_s29 = smov 0   ;;  %s7308_s30 = smov 0  }
  0x14   :  { %s7310_s9 = smov 0   ;;  %s7312_s10 = smov 0  }
  0x15   :  { %s7314_s11 = smov 0   ;;  %s7316_s12 = smov 0  }
  0x16   :  { %s7318_s13 = smov 0   ;;  %s7320_s14 = smov 0  }
  0x17   :  { %s7322_s15 = smov 0   ;;  %s7324_s16 = smov 0  }
  0x18   :  { %s7326_s17 = smov 0   ;;  %s7328_s18 = smov 0  }
  0x19 LB: > { %8845 = sst [smem:[#allocation27_spill]] %s7187_s27  ;;  %s7373_s19 = sadd.s32 4294967295, %s7239_s18   ;;  %s7239_s18 = sphi %s7328_s18, %s34_s18   ;;  %s7235_s17 = sphi %s7326_s17, %s8965_s17   ;;  %s7231_s16 = sphi %s7324_s16, %s8964_s16   ;;  %s7227_s15 = sphi %s7322_s15, %s8973_s15   ;;  %s7223_s14 = sphi %s7320_s14, %s8962_s14   ;;  %s7219_s13 = sphi %s7318_s13, %s8972_s13   ;;  %s7215_s12 = sphi %s7316_s12, %s8971_s12   ;;  %s7211_s11 = sphi %s7314_s11, %s8970_s11   ;;  %s7207_s10 = sphi %s7312_s10, %s8969_s10   ;;  %s7203_s9 = sphi %s7310_s9, %s8968_s9   ;;  %s7199_s30 = sphi %s7308_s30, %s8959_s30   ;;  %s7195_s29 = sphi %s7306_s29, %s8967_s29   ;;  %s7191_s28 = sphi %s7304_s28, %s8958_s28   ;;  %s7187_s27 = sphi %s7302_s27, %s8957_s27  }
  0x1a   : > { %8846 = sst [smem:[#allocation28_spill]] %s7191_s28  ;;  %p5579_p0 = scmp.ge.s32.totalorder %s7239_s18, 1 }
  0x1b   : > { %8847 = sst [smem:[#allocation29_spill]] %s7195_s29  ;;  %p8779_p1 = scmp.eq.s32.totalorder %s7373_s19, 0 }
  0x1c   : > { %8848 = sst [smem:[#allocation30_spill]] %s7203_s9  ;;  %p321_p3 = scmp.lt.s32.totalorder %s7239_s18, 5 }
  0x1d   : > { %8849 = sst [smem:[#allocation31_spill]] %s7211_s11  ;;  %s7241_s21 = smov [#allocation14]  }
  0x1e   : > { %8850 = sst [smem:[#allocation32_spill]] %s7215_s12  ;;  %p7379_p4 = pnand %p5579_p0, %p321_p3 }
  0x1f   : > { %8851 = sst [smem:[#allocation33_spill]] %s7223_s14  ;;  %s333_s22 = sshll.u32 %s7241_s21, 4  ;;  %s334_s22 = int_to_ptr.vmem [resolvable:$true] %s333_s22 }
  0x20   : > { %8852 = sst [smem:[#allocation34_spill]] %s7227_s15  ;;  %p6235_p5 = pneg %p7379_p4 }
  0x21   : > { %8853 = sst [smem:[#allocation35_spill]] %s7231_s16  ;;  %s8859_s6 = sld [smem:[#allocation53_spill]] }
  0x22   : > { %8854 = sst [smem:[#allocation36_spill]] %s7235_s17  ;;  %p7387_p6 = pnand %p6235_p5, %p8779_p1 }
  0x23   : > { %8855 = sst [smem:[#allocation37_spill]] %s7373_s19 }
  0x24   : > { %s8856_s20 = scalar_select %p7379_p4, 1, 0 }
  0x25   : > { %p8799_p8 = pneg %p7387_p6 }
  0x26   : > { %8857 = sst [smem:[#allocation38_spill]] %s8856_s20 }
  0x27   : > { %s6829_s26 = scalar_lea.hbm %s8859_s6, 36864 }
  0x28   : > { %p6830_p7 = scmp.ne.s32.totalorder %s8859_s6, %s6829_s26  ;;  %p6836_p11 = scmp.lt.u32.totalorder %s6829_s26, %s8859_s6 }
  0x2a   : > { %p6832_p9 = pnand %p8799_p8, %p6830_p7 }
  0x2c   : > { %p6833_p10 = pneg %p6832_p9 }
  0x2e   : > { %p6838_p12 = pnand %p6836_p11, %p6833_p10 }
  0x30   : > { %6841 = shalt.err (!%p6838_p12)
}
  0x31   : > { %s6842_s24 = scalar_lea.vmem %s334_s22, 36864  ;;  %p6850_p5 = scmp.lt.s32.totalorder %s334_s22, %s334_s22 }
  0x32   : > { %p6843_p13 = scmp.ne.s32.totalorder %s334_s22, %s6842_s24  ;;  %p6851_p1 = scmp.lt.s32.totalorder %s6842_s24, %s6842_s24 }
  0x34   : > { %p6845_p0 = pnand %p6843_p13, %p8799_p8  ;;  %p6852_p2 = por %p6851_p1, %p6850_p5 }
  0x36   : > { %p6846_p3 = pneg %p6845_p0 }
  0x38   : > { %p6853_p4 = pnand %p6852_p2, %p6846_p3 }
  0x3a   : > { %6856 = shalt.err (!%p6853_p4)
}
  0x3b   : > { %s8782_s8 = smov 128   ;;  %s8784_s14 = smov 8  }
  0x3c   : > { %6238 = dma.hbm_to_vmem [thread:$0]  (!%p7387_p6), %s8859_s6, 36864, %s334_s22, [#allocation13], %s8782_s8, %s8782_s8, %s8784_s14  }
  0x3d   : > { %s5566_s26 = sadd.s32 4294967294, %s7239_s18   ;;  %s43_s21 = sadd.s32 1, %s7231_s16 }
  0x3e   : > { %p44_p1 = scmp.ge.s32.totalorder %s43_s21, 2  ;;  %s46_s24 = sadd.s32 1, %s7235_s17 }
  0x3f   : > { %p62_p2 = scmp.ne.s32.totalorder %s7219_s13, %s7215_s12  ;;  %p8801_p4 = scmp.eq.s32.totalorder %s7239_s18, 0 }
  0x40   : > { %s8975_s21 = smov (%p44_p1, %s43_s21), 0  ;;  %s8977_s24 = smov (!%p44_p1, %s46_s24), %s7235_s17 }
  0x41   : > { %8860 = sst [smem:[#allocation39_spill]] %s8975_s21  ;;  %p68_p7 = scmp.ne.s32.totalorder %s7215_s12, %s7211_s11 }
  0x42   : > { %p8861_p9 = scmp.eq.s32.totalorder %s7373_s19, 3  ;;  %p64_p11 = por %p8801_p4, %p62_p2 }
  0x43   : > { %p314_p12 = scmp.eq.s32.totalorder %s5566_s26, 3  ;;  %p8864_p13 = scmp.eq.s32.totalorder %s7373_s19, 0 }
  0x44   : > { %p7434_p10 = por %p8861_p9, %p62_p2  ;;  %p8800_p3 = scmp.lt.s32.totalorder %s7239_s18, 4 }
  0x45   : > { %p7442_p0 = por %p8864_p13, %p68_p7  ;;  %p7447_p5 = por %p314_p12, %p68_p7 }
  0x46   : > { %s8862_s22 = scalar_select %p7434_p10, 1, 0 }
  0x47   : > { %s8865_s25 = scalar_select %p7442_p0, 1, 0 }
  0x48   : > { %8863 = sst [smem:[#allocation40_spill]] %s8862_s22  ;;  %s8788_s15 = sand.u32 1, %s7219_s13  }
  0x49   : > { %8866 = sst [smem:[#allocation41_spill]] %s8865_s25  ;;  %s7454_s8 = sshll.u32 %s8788_s15, 7 }
  0x4a   : > { %s8867_s20 = scalar_select %p7447_p5, 1, 0 }
  0x4b   : > { %s5922_s14 = sshll.u32 %s7231_s16, 4  ;;  %s7458_s6 = sshll.u32 %s7235_s17, 5 }
  0x4c   : > { %8868 = sst [smem:[#allocation42_spill]] %s8867_s20  ;;  %p7462_p1 = pnand %p8800_p3, %p64_p11 }
  0x4d   : > { %s7467_s11 = sadd.s32 %s5922_s14, %s7458_s6  ;;  %s7470_s20 = sand.u32 1, %s7239_s18  }
  0x4e   : > { %s8869_s26 = scalar_select %p7462_p1, 1, 0 }
  0x4f   : > { %s8796_s15 = sshll.u32 %s7467_s11, 7  ;;  %s8871_s1 = sld [smem:[#allocation49_spill]] }
  0x50   : > { %8870 = sst [smem:[#allocation43_spill]] %s8869_s26  ;;  %s386_s5 = scalar_lea.vmem [#allocation6], %s7454_s8 }
  0x51   : > { %s396_s4 = sshll.u32 %s386_s5, 4  ;;  %s8804_s14 = scalar_lea.sflag [#allocation7], %s7470_s20  ;;  %s7481_s4 = int_to_ptr.vmem [resolvable:$true] %s396_s4 }
  0x52   : > { %p8816_p7 = pneg %p7462_p1 }
  0x55   : > { %s7478_s12 = scalar_lea.hbm %s8871_s1, %s8796_s15  ;;  %s6862_s15 = scalar_lea.hbm %s8871_s1, 8192 }
  0x56   : > { %s6857_s27 = scalar_lea.hbm %s7478_s12, 2048  ;;  %p6863_p12 = scmp.lt.u32.totalorder %s7478_s12, %s8871_s1 }
  0x57   : > { %p6858_p2 = scmp.ne.s32.totalorder %s7478_s12, %s6857_s27  ;;  %p6864_p13 = scmp.lt.u32.totalorder %s6862_s15, %s6857_s27 }
  0x58   : > { %p6866_p3 = scmp.lt.u32.totalorder %s6857_s27, %s7478_s12 }
  0x59   : > { %p6860_p9 = pnand %p8816_p7, %p6858_p2  ;;  %p6865_p8 = por %p6864_p13, %p6863_p12 }
  0x5b   : > { %p6861_p11 = pneg %p6860_p9  ;;  %p6867_p4 = por %p6866_p3, %p6865_p8 }
  0x5d   : > { %p6868_p5 = pnand %p6867_p4, %p6861_p11 }
  0x5f   : > { %6871 = shalt.err (!%p6868_p5)
}
  0x60   : > { %s6872_s5 = scalar_lea.vmem %s7481_s4, 2048  ;;  %s7244_s22 = smov [#allocation6]  }
  0x61   : > { %p6873_p2 = scmp.ne.s32.totalorder %s7481_s4, %s6872_s5  ;;  %s6877_s25 = sshll.u32 %s7244_s22, 4  ;;  %s6878_s25 = int_to_ptr.vmem [resolvable:$false] %s6877_s25 }
  0x62   : > { %s6879_s28 = scalar_lea.vmem %s6878_s25, 4096  ;;  %p6880_p0 = scmp.lt.s32.totalorder %s7481_s4, %s6878_s25 }
  0x63   : > { %p6875_p9 = pnand %p6873_p2, %p8816_p7  ;;  %p6881_p12 = scmp.lt.s32.totalorder %s6879_s28, %s6872_s5 }
  0x65   : > { %p6876_p10 = pneg %p6875_p9  ;;  %p6882_p13 = por %p6881_p12, %p6880_p0 }
  0x67   : > { %p6883_p8 = pnand %p6882_p13, %p6876_p10 }
  0x69   : > { %6886 = shalt.err (!%p6883_p8)
}
  0x6a   : > { %s8872_s27 = smov 8   ;;  %s8873_s29 = smov 128  }
  0x6b   : > { %6248 = dma.hbm_to_vmem [thread:$0]  (!%p7462_p1), %s7478_s12, 2048, %s7481_s4, %s8804_s14, %s8873_s29, %s8873_s29, %s8872_s27  }
  0x6c   : > { %p48_p4 = scmp.ge.s32.totalorder %s8977_s24, 2  ;;  %s5567_s15 = sshll.u32 %s7231_s16, 3 }
  0x6d   : > { %s5569_s5 = sshll.u32 %s8975_s21, 3  ;;  %s5568_s22 = sadd.s32 4294967295, %s5567_s15 }
  0x6e   : > { %s8979_s24 = smov (%p48_p4, %s8977_s24), 0  ;;  %s5570_s25 = sadd.s32 4294967295, %s5569_s5 }
  0x6f   : > { %8874 = sst [smem:[#allocation44_spill]] %s8979_s24  ;;  %s7522_s28 = ssub.s32 %s7235_s17, %s8979_s24 }
  0x70   : > { %8875 = sst [smem:[#allocation45_spill]] %s7522_s28  ;;  %p108_p10 = scmp.gt.s32.totalorder %s5568_s22, 0 }
  0x71   : > { %s8876_s4 = ssub.s32 %s7231_s16, %s8975_s21  ;;  %p112_p0 = scmp.gt.s32.totalorder %s5570_s25, 0 }
  0x72   : > { %s52_s12 = sor.u32 %s8876_s4, %s7522_s28  ;;  %s119_s14 = sadd.s32 1, %s7207_s10 }
  0x73   : > { %p53_p3 = scmp.eq.s32.totalorder %s52_s12, 0  ;;  %s8981_s22 = smov (!%p108_p10, %s5568_s22), 0 }
  0x74   : > { %s8877_s1 = sadd.s32 1, %s7219_s13  ;;  %s8983_s25 = smov (!%p112_p0, %s5570_s25), 0 }
  0x75   : > { %s7532_s0 = scalar_select %p53_p3, %s7219_s13, %s8877_s1  }
  0x76   : > { %p126_p5 = scmp.ne.s32.totalorder %s7207_s10, %s7203_s9  ;;  %p132_p11 = scmp.ne.s32.totalorder %s7203_s9, %s7199_s30 }
  0x77   : > { %8878 = sst [smem:[#allocation46_spill]] %s7532_s0  ;;  %s115_s24 = ssub.s32 %s8981_s22, %s8983_s25 }
  0x78   : > { %s7538_s17 = sadd.s32 8, %s5567_s15  ;;  %s116_s26 = sor.u32 %s115_s24, %s7522_s28 }
  0x79   : > { %p8879_p2 = scmp.eq.s32.totalorder %s7239_s18, 0  ;;  %p117_p12 = scmp.eq.s32.totalorder %s116_s26, 0 }
  0x7a   : > { %p8881_p13 = scmp.eq.s32.totalorder %s7373_s19, 0  ;;  %s7554_s30 = sadd.s32 8, %s5569_s5 }
  0x7b   : > { %p7543_p9 = por %p126_p5, %p8879_p2  ;;  %s408_s24 = sand.u32 1, %s7207_s10  }
  0x7c   : > { %p7549_p8 = por %p132_p11, %p8881_p13  ;;  %s5593_s25 = sshll.u32 %s408_s24, 4 }
  0x7d   : > { %s7557_s15 = scalar_select %p117_p12, %s7207_s10, %s119_s14  }
  0x7e   : > { %s8882_s1 = scalar_select %p7549_p8, 1, 0 }
  0x7f   : > { %s5596_s12 = sshll.u32 %s8981_s22, 1  ;;  %s410_s0 = scalar_lea.vmem [#allocation8], %s5593_s25 }
  0x80   : > { %s420_s21 = sadd.s32 %s5596_s12, %s7458_s6  ;;  %s423_s26 = sshll.u32 %s410_s0, 4  ;;  %s7567_s26 = int_to_ptr.vmem [resolvable:$true] %s423_s26 }
  0x81   : > { %s5598_s16 = sshll.u32 %s420_s21, 7  ;;  %p8883_p0 = scmp.lt.s32.totalorder %s7239_s18, 4 }
  0x82   : > { %s7565_s28 = scalar_lea.hbm %s8771_s2, %s5598_s16  ;;  %s8885_s3 = sld [smem:[#allocation50_spill]] }
  0x83   : > { %p7573_p3 = pnand %p8883_p0, %p7543_p9  ;;  %s437_s0 = scalar_lea.vmem [#allocation9], %s5593_s25 }
  0x84   : > { %s450_s9 = sshll.u32 %s437_s0, 4  ;;  %s434_s19 = scalar_lea.sflag [#allocation10], %s7470_s20  ;;  %s7582_s9 = int_to_ptr.vmem [resolvable:$true] %s450_s9 }
  0x85   : > { %s8884_s14 = scalar_select %p7573_p3, 1, 0 }
  0x86   : > { %p8820_p11 = pneg %p7573_p3 }
  0x88   : > { %s7580_s21 = scalar_lea.hbm %s8885_s3, %s5598_s16  ;;  %s6892_s12 = scalar_lea.hbm %s8885_s3, 8192 }
  0x89   : > { %s6887_s22 = scalar_lea.hbm %s7580_s21, 256  ;;  %p6893_p12 = scmp.lt.u32.totalorder %s7580_s21, %s8885_s3 }
  0x8a   : > { %p6888_p5 = scmp.ne.s32.totalorder %s7580_s21, %s6887_s22  ;;  %p6894_p13 = scmp.lt.u32.totalorder %s6892_s12, %s6887_s22 }
  0x8b   : > { %p6896_p10 = scmp.lt.u32.totalorder %s6887_s22, %s7580_s21 }
  0x8c   : > { %p6890_p2 = pnand %p8820_p11, %p6888_p5  ;;  %p6895_p0 = por %p6894_p13, %p6893_p12 }
  0x8e   : > { %p6891_p9 = pneg %p6890_p2  ;;  %p6897_p4 = por %p6896_p10, %p6895_p0 }
  0x90   : > { %p6898_p7 = pnand %p6897_p4, %p6891_p9 }
  0x92   : > { %6901 = shalt.err (!%p6898_p7)
}
  0x93   : > { %s6902_s25 = scalar_lea.vmem %s7582_s9, 256  ;;  %s7245_s0 = smov [#allocation9]  }
  0x94   : > { %p6903_p5 = scmp.ne.s32.totalorder %s7582_s9, %s6902_s25  ;;  %s6907_s4 = sshll.u32 %s7245_s0, 4  ;;  %s6908_s4 = int_to_ptr.vmem [resolvable:$false] %s6907_s4 }
  0x95   : > { %s6909_s16 = scalar_lea.vmem %s6908_s4, 512  ;;  %p6910_p1 = scmp.lt.s32.totalorder %s7582_s9, %s6908_s4 }
  0x96   : > { %p6905_p2 = pnand %p6903_p5, %p8820_p11  ;;  %p6911_p12 = scmp.lt.s32.totalorder %s6909_s16, %s6902_s25 }
  0x98   : > { %p6906_p8 = pneg %p6905_p2  ;;  %p6912_p13 = por %p6911_p12, %p6910_p1 }
  0x9a   : > { %p6913_p10 = pnand %p6912_p13, %p6906_p8 }
  0x9c   : > { %6916 = shalt.err (!%p6913_p10)
}
  0x9d   : > { %6254 = dma.hbm_to_vmem [thread:$0]  (!%p7573_p3), %s7580_s21, 256, %s7582_s9, %s434_s19, %s8873_s29, %s8873_s29, %s8872_s27  }
  0x9e   : > { %s7246_s22 = smov [#allocation15]   ;;  %s6917_s25 = scalar_lea.hbm %s8776_s7, 32 }
  0x9f   : > { %s347_s12 = sshll.u32 %s7246_s22, 4  ;;  %p6918_p1 = scmp.ne.s32.totalorder %s8776_s7, %s6917_s25  ;;  %s348_s12 = int_to_ptr.vmem [resolvable:$true] %s347_s12 }
  0xa0   : > { %p8886_p7 = pneg %p7387_p6  ;;  %p6924_p9 = scmp.lt.u32.totalorder %s6917_s25, %s8776_s7 }
  0xa2   : > { %p6920_p8 = pnand %p6918_p1, %p8886_p7 }
  0xa4   : > { %p6921_p4 = pneg %p6920_p8 }
  0xa6   : > { %p6926_p0 = pnand %p6924_p9, %p6921_p4 }
  0xa8   : > { %6929 = shalt.err (!%p6926_p0)
}
  0xa9   : > { %s6930_s21 = scalar_lea.vmem %s348_s12, 32  ;;  %p8887_p2 = pmov %p8886_p7 }
  0xaa   : > { %p6931_p5 = scmp.ne.s32.totalorder %s348_s12, %s6930_s21  ;;  %p6938_p10 = scmp.lt.s32.totalorder %s348_s12, %s348_s12 }
  0xab   : > { %p6939_p11 = scmp.lt.s32.totalorder %s6930_s21, %s6930_s21 }
  0xac   : > { %p6933_p12 = pnand %p6931_p5, %p8887_p2 }
  0xad   : > { %p6940_p3 = por %p6939_p11, %p6938_p10 }
  0xae   : > { %p6934_p13 = pneg %p6933_p12 }
  0xb0   : > { %p6941_p1 = pnand %p6940_p3, %p6934_p13 }
  0xb2   : > { %6944 = shalt.err (!%p6941_p1)
}
  0xb3   : > { %s8888_s3 = sld [smem:[#allocation43_spill]]  ;;  %s8889_s5 = sshll.u32 %s7467_s11, 7 }
  0xb4   : > { %6241 = dma.hbm_to_vmem [thread:$0]  (!%p7387_p6), %s8776_s7, 32, %s348_s12, [#allocation16]  }
  0xb5   : > { %s8890_s0 = sld [smem:[#allocation48_spill]]  ;;  %s362_s16 = scalar_lea.vmem [#allocation3], %s7454_s8 }
  0xb6   : > { %s372_s23 = sshll.u32 %s362_s16, 4  ;;  %s8891_s21 = sand.u32 1, %s7219_s13   ;;  %s7643_s23 = int_to_ptr.vmem [resolvable:$true] %s372_s23 }
  0xb7   : > { %s7647_s9 = scalar_lea.sflag [#allocation4], %s8891_s21 }
  0xb9   : > { %p8892_p6 = scmp.ne.s32.totalorder %s8888_s3, 0 }
  0xbb   : > { %s7640_s4 = scalar_lea.hbm %s8890_s0, %s8889_s5  ;;  %p8893_p11 = pneg %p8892_p6 }
  0xbc   : > { %s6945_s22 = scalar_lea.hbm %s7640_s4, 2048  ;;  %s6950_s5 = scalar_lea.hbm %s8890_s0, 8192 }
  0xbd   : > { %p6946_p3 = scmp.ne.s32.totalorder %s7640_s4, %s6945_s22  ;;  %p6951_p4 = scmp.lt.u32.totalorder %s7640_s4, %s8890_s0 }
  0xbe   : > { %p6952_p9 = scmp.lt.u32.totalorder %s6950_s5, %s6945_s22  ;;  %p6954_p5 = scmp.lt.u32.totalorder %s6945_s22, %s7640_s4 }
  0xbf   : > { %p6948_p7 = pnand %p6946_p3, %p8893_p11 }
  0xc0   : > { %p6953_p0 = por %p6952_p9, %p6951_p4 }
  0xc1   : > { %p6949_p8 = pneg %p6948_p7 }
  0xc2   : > { %p6955_p2 = por %p6954_p5, %p6953_p0 }
  0xc4   : > { %p6956_p12 = pnand %p6955_p2, %p6949_p8 }
  0xc6   : > { %6959 = shalt.err (!%p6956_p12)
}
  0xc7   : > { %s6960_s8 = scalar_lea.vmem %s7643_s23, 2048  ;;  %p8894_p10 = pmov %p8893_p11 }
  0xc8   : > { %p6961_p13 = scmp.ne.s32.totalorder %s7643_s23, %s6960_s8  ;;  %s7247_s16 = smov [#allocation3]  }
  0xc9   : > { %s6965_s21 = sshll.u32 %s7247_s16, 4  ;;  %s6966_s21 = int_to_ptr.vmem [resolvable:$false] %s6965_s21 }
  0xca   : > { %p6963_p1 = pnand %p6961_p13, %p8894_p10  ;;  %s6967_s11 = scalar_lea.vmem %s6966_s21, 4096 }
  0xcb   : > { %p6968_p11 = scmp.lt.s32.totalorder %s7643_s23, %s6966_s21  ;;  %p6969_p7 = scmp.lt.s32.totalorder %s6967_s11, %s6960_s8 }
  0xcc   : > { %p6964_p3 = pneg %p6963_p1 }
  0xcd   : > { %p6970_p4 = por %p6969_p7, %p6968_p11 }
  0xcf   : > { %p6971_p9 = pnand %p6970_p4, %p6964_p3 }
  0xd1   : > { %6974 = shalt.err (!%p6971_p9)
}
  0xd2   : > { %6245 = dma.hbm_to_vmem [thread:$0]  (!%p8892_p6), %s7640_s4, 2048, %s7643_s23, %s7647_s9, %s8873_s29, %s8873_s29, %s8872_s27  }
  0xd3   : > { %s6975_s22 = scalar_lea.hbm %s7565_s28, 256  ;;  %p8895_p0 = scmp.ne.s32.totalorder %s8884_s14, 0 }
  0xd4   : > { %p6976_p8 = scmp.ne.s32.totalorder %s7565_s28, %s6975_s22  ;;  %s6980_s5 = scalar_lea.hbm %s8771_s2, 8192 }
  0xd5   : > { %p8896_p5 = pneg %p8895_p0  ;;  %p6981_p13 = scmp.lt.u32.totalorder %s7565_s28, %s8771_s2 }
  0xd6   : > { %p6982_p10 = scmp.lt.u32.totalorder %s6980_s5, %s6975_s22  ;;  %p6984_p3 = scmp.lt.u32.totalorder %s6975_s22, %s7565_s28 }
  0xd7   : > { %p6978_p2 = pnand %p6976_p8, %p8896_p5 }
  0xd8   : > { %p6983_p1 = por %p6982_p10, %p6981_p13 }
  0xd9   : > { %p6979_p12 = pneg %p6978_p2 }
  0xda   : > { %p6985_p11 = por %p6984_p3, %p6983_p1 }
  0xdc   : > { %p6986_p7 = pnand %p6985_p11, %p6979_p12 }
  0xde   : > { %6989 = shalt.err (!%p6986_p7)
}
  0xdf   : > { %s6990_s4 = scalar_lea.vmem %s7567_s26, 256  ;;  %p8897_p4 = pmov %p8896_p5 }
  0xe0   : > { %p6991_p6 = scmp.ne.s32.totalorder %s7567_s26, %s6990_s4  ;;  %s7248_s23 = smov [#allocation8]  }
  0xe1   : > { %s6995_s9 = sshll.u32 %s7248_s23, 4  ;;  %s6996_s9 = int_to_ptr.vmem [resolvable:$false] %s6995_s9 }
  0xe2   : > { %p6993_p9 = pnand %p6991_p6, %p8897_p4  ;;  %s6997_s8 = scalar_lea.vmem %s6996_s9, 512 }
  0xe3   : > { %p6998_p5 = scmp.lt.s32.totalorder %s7567_s26, %s6996_s9  ;;  %p6999_p2 = scmp.lt.s32.totalorder %s6997_s8, %s6990_s4 }
  0xe4   : > { %p6994_p8 = pneg %p6993_p9 }
  0xe5   : > { %p7000_p13 = por %p6999_p2, %p6998_p5 }
  0xe7   : > { %p7001_p10 = pnand %p7000_p13, %p6994_p8 }
  0xe9   : > { %7004 = shalt.err (!%p7001_p10)
}
  0xea   : > { %s8898_s16 = scalar_lea.sflag [#allocation7], %s7470_s20  ;;  %s8899_s21 = sld [smem:[#allocation29_spill]] }
  0xeb   : > { %s8900_s11 = sld [smem:[#allocation28_spill]]  ;;  %s8901_s22 = sld [smem:[#allocation27_spill]] }
  0xec   : > { %s8902_s12 = sld [smem:[#allocation45_spill]]  ;;  %s8903_s14 = sld [smem:[#allocation37_spill]] }
  0xed   : > { %6251 = dma.hbm_to_vmem [thread:$0]  (!%p8895_p0), %s7565_s28, 256, %s7567_s26, %s8898_s16, %s8873_s29, %s8873_s29, %s8872_s27  }
  0xee   : > { %p8904_p12 = scmp.lt.s32.totalorder %s7538_s17, 15  ;;  %p8905_p1 = scmp.lt.s32.totalorder %s7554_s30, 15 }
  0xef   : > { %p8906_p7 = scmp.eq.s32.totalorder %s7239_s18, 0  ;;  %p8910_p0 = scmp.lt.s32.totalorder %s7239_s18, 4 }
  0xf0   : > { %s191_s3 = sadd.s32 1, %s8899_s21  ;;  %s8985_s17 = smov (!%p8904_p12, %s7538_s17), 15 }
  0xf1   : > { %s8987_s30 = smov (!%p8905_p1, %s7554_s30), 15  ;;  %p198_p3 = scmp.ne.s32.totalorder %s8899_s21, %s8900_s11 }
  0xf2   : > { %p204_p11 = scmp.ne.s32.totalorder %s8900_s11, %s8901_s22  ;;  %s187_s5 = ssub.s32 %s8985_s17, %s8987_s30 }
  0xf3   : > { %s462_s24 = sand.u32 1, %s8899_s21   ;;  %s188_s25 = sor.u32 %s187_s5, %s8902_s12 }
  0xf4   : > { %p200_p6 = por %p198_p3, %p8906_p7  ;;  %p189_p4 = scmp.eq.s32.totalorder %s188_s25, 0 }
  0xf5   : > { %p8907_p9 = scmp.eq.s32.totalorder %s8903_s14, 0  ;;  %s5605_s28 = sshll.u32 %s462_s24, 4 }
  0xf6   : > { %s5607_s26 = sshll.u32 %s8985_s17, 1  ;;  %s8989_s21 = smov (!%p189_p4, %s8899_s21), %s191_s3 }
  0xf7   : > { %p7721_p8 = por %p204_p11, %p8907_p9  ;;  %s474_s23 = sadd.s32 %s5607_s26, %s7458_s6 }
  0xf8   : > { %s5609_s9 = sshll.u32 %s474_s23, 7  ;;  %s464_s8 = scalar_lea.vmem [#allocation11], %s5605_s28 }
  0xf9   : > { %s477_s16 = sshll.u32 %s464_s8, 4  ;;  %s8909_s22 = sld [smem:[#allocation51_spill]]  ;;  %s7734_s16 = int_to_ptr.vmem [resolvable:$true] %s477_s16 }
  0xfa   : > { %p7738_p5 = pnand %p8910_p0, %p200_p6  ;;  %s8912_s3 = sld [smem:[#allocation52_spill]] }
  0xfb   : > { %s491_s24 = scalar_lea.vmem [#allocation12], %s5605_s28 }
  0xfc   : > { %s7747_s25 = sshll.u32 %s491_s24, 4  ;;  %p7007_p13 = pneg %p7738_p5  ;;  %s7780_s25 = int_to_ptr.vmem [resolvable:$true] %s7747_s25 }
  0xff   : > { %s7732_s12 = scalar_lea.hbm %s8909_s22, %s5609_s9  ;;  %s7010_s11 = scalar_lea.hbm %s8909_s22, 8192 }
 0x100   : > { %s7745_s5 = scalar_lea.hbm %s8912_s3, %s5609_s9  ;;  %s7005_s26 = scalar_lea.hbm %s7732_s12, 256 }
 0x101   : > { %p7006_p2 = scmp.ne.s32.totalorder %s7732_s12, %s7005_s26  ;;  %p7011_p1 = scmp.lt.u32.totalorder %s7732_s12, %s8909_s22 }
 0x102   : > { %p7012_p3 = scmp.lt.u32.totalorder %s7010_s11, %s7005_s26  ;;  %p7014_p7 = scmp.lt.u32.totalorder %s7005_s26, %s7732_s12 }
 0x103   : > { %p7008_p10 = pnand %p7007_p13, %p7006_p2 }
 0x104   : > { %p7013_p11 = por %p7012_p3, %p7011_p1 }
 0x105   : > { %p7009_p12 = pneg %p7008_p10 }
 0x106   : > { %p7015_p6 = por %p7014_p7, %p7013_p11 }
 0x108   : > { %p7016_p4 = pnand %p7015_p6, %p7009_p12 }
 0x10a   : > { %7019 = shalt.err (!%p7016_p4)
}
 0x10b   : > { %s7020_s28 = scalar_lea.vmem %s7734_s16, 256  ;;  %s7249_s9 = smov [#allocation11]  }
 0x10c   : > { %p7021_p9 = scmp.ne.s32.totalorder %s7734_s16, %s7020_s28  ;;  %s7025_s14 = sshll.u32 %s7249_s9, 4  ;;  %s7026_s14 = int_to_ptr.vmem [resolvable:$false] %s7025_s14 }
 0x10d   : > { %s7027_s24 = scalar_lea.vmem %s7026_s14, 512  ;;  %p7028_p10 = scmp.lt.s32.totalorder %s7734_s16, %s7026_s14 }
 0x10e   : > { %p7023_p0 = pnand %p7021_p9, %p7007_p13  ;;  %p7029_p1 = scmp.lt.s32.totalorder %s7027_s24, %s7020_s28 }
 0x110   : > { %p7024_p2 = pneg %p7023_p0  ;;  %p7030_p3 = por %p7029_p1, %p7028_p10 }
 0x112   : > { %p7031_p11 = pnand %p7030_p3, %p7024_p2 }
 0x114   : > { %7034 = shalt.err (!%p7031_p11)
}
 0x115   : > { %6257 = dma.hbm_to_vmem [thread:$0]  (!%p7738_p5), %s7732_s12, 256, %s7734_s16, %s434_s19, %s8873_s29, %s8873_s29, %s8872_s27  }
 0x116   : > { %s488_s26 = scalar_lea.sflag [#allocation13], %s7470_s20  ;;  %s7035_s23 = scalar_lea.hbm %s7745_s5, 256 }
 0x117   : > { %p7036_p12 = scmp.ne.s32.totalorder %s7745_s5, %s7035_s23  ;;  %s7040_s30 = scalar_lea.hbm %s8912_s3, 8192 }
 0x118   : > { %p7041_p4 = scmp.lt.u32.totalorder %s7745_s5, %s8912_s3  ;;  %p7042_p9 = scmp.lt.u32.totalorder %s7040_s30, %s7035_s23 }
 0x119   : > { %p7038_p7 = pnand %p7036_p12, %p7007_p13  ;;  %p7044_p2 = scmp.lt.u32.totalorder %s7035_s23, %s7745_s5 }
 0x11a   : > { %p7043_p0 = por %p7042_p9, %p7041_p4 }
 0x11b   : > { %p7039_p6 = pneg %p7038_p7 }
 0x11c   : > { %p7045_p10 = por %p7044_p2, %p7043_p0 }
 0x11e   : > { %p7046_p1 = pnand %p7045_p10, %p7039_p6 }
 0x120   : > { %7049 = shalt.err (!%p7046_p1)
}
 0x121   : > { %s7050_s19 = scalar_lea.vmem %s7780_s25, 256  ;;  %s7250_s16 = smov [#allocation12]  }
 0x122   : > { %p7051_p3 = scmp.ne.s32.totalorder %s7780_s25, %s7050_s19  ;;  %s7055_s12 = sshll.u32 %s7250_s16, 4  ;;  %s7056_s12 = int_to_ptr.vmem [resolvable:$false] %s7055_s12 }
 0x123   : > { %s7057_s9 = scalar_lea.vmem %s7056_s12, 512  ;;  %p7058_p7 = scmp.lt.s32.totalorder %s7780_s25, %s7056_s12 }
 0x124   : > { %p7053_p11 = pnand %p7051_p3, %p7007_p13  ;;  %p7059_p4 = scmp.lt.s32.totalorder %s7057_s9, %s7050_s19 }
 0x126   : > { %p7054_p12 = pneg %p7053_p11  ;;  %p7060_p9 = por %p7059_p4, %p7058_p7 }
 0x128   : > { %p7061_p0 = pnand %p7060_p9, %p7054_p12 }
 0x12a   : > { %7064 = shalt.err (!%p7061_p0)
}
 0x12b   : > { %6260 = dma.hbm_to_vmem [thread:$0]  (!%p7738_p5), %s7745_s5, 256, %s7780_s25, %s488_s26, %s8873_s29, %s8873_s29, %s8872_s27  }
 0x12c   : > { %s8913_s14 = sld [smem:[#allocation38_spill]] }
 0x132   : > { %p8914_p13 = scmp.ne.s32.totalorder %s8913_s14, 0 }
 0x134   : > { %516 = sbr.rel (%p8914_p13) target bundleno = 994 (0x3e2), region = 52 }
 0x13b   : > { %s8915_s24 = sld [smem:[#allocation32_spill]]  ;;  %s8916_s23 = sld [smem:[#allocation41_spill]] }
 0x141   : > { %s7814_s8 = sand.u32 1, %s8915_s24   ;;  %p8917_p6 = scmp.ne.s32.totalorder %s8916_s23, 0 }
 0x142   : > { %s5616_s11 = sshll.u32 %s7814_s8, 7  ;;  %s519_s30 = scalar_lea.sflag [#allocation4], %s7814_s8 }
 0x143   : > { %s7818_s17 = scalar_lea.vmem [#allocation3], %s5616_s11 }
 0x144   : > { %7150 = dma.done.wait (%p8917_p6), %s519_s30, 2048  }
 0x145   : > { %7152 = vsyncadd (%p8917_p6), %s519_s30, 4294965248  ;;  %s8918_s20 = sld [smem:[#allocation37_spill]]  ;;  %s7825_s5 = scalar_lea.vmem [#allocation6], %s5616_s11 }
 0x14b   : > { %s527_s27 = sand.u32 1, %s8918_s20  }
 0x14c   : > { %s528_s29 = scalar_lea.sflag [#allocation7], %s527_s27 }
 0x14d   : > { %7154 = dma.done.wait (%p8917_p6), %s528_s29, 2048  }
 0x14e   : > { %7156 = vsyncadd (%p8917_p6), %s528_s29, 4294965248  ;;  %s8919_s25 = sld [smem:[#allocation30_spill]]  ;;  %p8920_p5 = scmp.ne.s32.totalorder %s8882_s1, 0 }
 0x154   : > { %s538_s26 = sand.u32 1, %s8919_s25  }
 0x155   : > { %s7832_s6 = sshll.u32 %s538_s26, 4 }
 0x156   : > { %s540_s28 = scalar_lea.vmem [#allocation8], %s7832_s6 }
 0x157   : > { %7158 = dma.done.wait (%p8920_p5), %s528_s29, 256  }
 0x158   : > { %7160 = vsyncadd (%p8920_p5), %s528_s29, 4294967040  ;;  %s546_s19 = scalar_lea.sflag [#allocation10], %s527_s27  ;;  %s549_s16 = scalar_lea.vmem [#allocation9], %s7832_s6 }
 0x159   : > { %7162 = dma.done.wait (%p8920_p5), %s546_s19, 256  }
 0x15a   : > { %7164 = vsyncadd (%p8920_p5), %s546_s19, 4294967040  ;;  %s8921_s12 = sld [smem:[#allocation28_spill]] }
 0x160   : > { %s556_s9 = sand.u32 1, %s8921_s12  }
 0x161   : > { %s7845_s14 = sshll.u32 %s556_s9, 4 }
 0x162   : > { %s558_s24 = scalar_lea.vmem [#allocation11], %s7845_s14 }
 0x163   : > { %7166 = dma.done.wait (%p7721_p8), %s546_s19, 256  }
 0x164   : > { %7168 = vsyncadd (%p7721_p8), %s546_s19, 4294967040  ;;  %s564_s23 = scalar_lea.sflag [#allocation13], %s527_s27  ;;  %s567_s11 = scalar_lea.vmem [#allocation12], %s7845_s14 }
 0x165   : > { %7170 = dma.done.wait (%p7721_p8), %s564_s23, 256  }
 0x166   : > { %7172 = vsyncadd (%p7721_p8), %s564_s23, 4294967040  ;;  %p8922_p2 = scmp.eq.s32.totalorder %s8918_s20, 0 }
 0x168   : > { %7174 = dma.done.wait (%p8922_p2), [#allocation13], 36864   ;;  %p8923_p10 = pmov %p8922_p2 }
 0x169   : > { %p8924_p1 = pmov %p8922_p2 }
 0x16a   : > { %7176 = vsyncadd (%p8923_p10), [#allocation13], 4294930432 }
 0x16b   : > { %7178 = dma.done.wait (%p8924_p1), [#allocation16], 32   ;;  %p8925_p3 = pmov %p8924_p1 }
 0x16c   : > { %s5624_s1 = sshll.u32 %s7814_s8, 8  ;;  %v7251_v0 = vmov 0   ;;  %v693_v1 = vld [vmem:[%s7818_s17] sm:$0xff]  ;;  %v694_v2 = vld [vmem:[%s7818_s17 + $0x8] sm:$0xff]  ;;  %v695_v3 = vld [vmem:[%s7818_s17 + $0x10] sm:$0xff]  ;;  %s8926_s30 = sld [smem:[#allocation33_spill]] }
 0x16d   : > { %7180 = vsyncadd (%p8925_p3), [#allocation16], 4294967264  ;;  %653 = vst [vmem:[#allocation2] sm:$0x80] %v7251_v0  ;;  %v709_v4 = vpack.c.bf16 %v694_v2, %v693_v1  ;;  %v696_v5 = vld [vmem:[%s7818_s17 + $0x18] sm:$0xff]  ;;  %v697_v6 = vld [vmem:[%s7818_s17 + $0x20] sm:$0xff] }
 0x16e   : > { %654 = vst [vmem:[#allocation2 + $0x8] sm:$0x80] %v7251_v0  ;;  %655 = vst [vmem:[#allocation2 + $0x30] sm:$0x80] %v7251_v0  ;;  %v698_v7 = vld [vmem:[%s7818_s17 + $0x28] sm:$0xff]  ;;  %v710_v8 = vpack.c.bf16 %v696_v5, %v695_v3  ;;  %v699_v10 = vld [vmem:[%s7818_s17 + $0x30] sm:$0xff] }
 0x16f   : > { %656 = vst [vmem:[#allocation2 + $0x38] sm:$0x80] %v7251_v0  ;;  %657 = vst [vmem:[#allocation2 + $0x60] sm:$0x80] %v7251_v0  ;;  %v711_v9 = vpack.c.bf16 %v698_v7, %v697_v6  ;;  %v700_v11 = vld [vmem:[%s7818_s17 + $0x38] sm:$0xff]  ;;  %v701_v12 = vld [vmem:[%s7818_s17 + $0x40] sm:$0xff] }
 0x170   : > { %658 = vst [vmem:[#allocation2 + $0x68] sm:$0x80] %v7251_v0  ;;  %659 = vst [vmem:[#allocation2 + $0x90] sm:$0x80] %v7251_v0  ;;  %v712_v13 = vpack.c.bf16 %v700_v11, %v699_v10  ;;  %v702_v14 = vld [vmem:[%s7818_s17 + $0x48] sm:$0xff]  ;;  %v703_v15 = vld [vmem:[%s7818_s17 + $0x50] sm:$0xff] }
 0x171   : > { %660 = vst [vmem:[#allocation2 + $0x98] sm:$0x80] %v7251_v0  ;;  %661 = vst [vmem:[#allocation2 + $0xc0] sm:$0x80] %v7251_v0  ;;  %v704_v16 = vld [vmem:[%s7818_s17 + $0x58] sm:$0xff]  ;;  %v713_v17 = vpack.c.bf16 %v702_v14, %v701_v12  ;;  %v705_v19 = vld [vmem:[%s7818_s17 + $0x60] sm:$0xff] }
 0x172   : > { %662 = vst [vmem:[#allocation2 + $0xc8] sm:$0x80] %v7251_v0  ;;  %663 = vst [vmem:[#allocation2 + $0xf0] sm:$0x80] %v7251_v0  ;;  %v714_v18 = vpack.c.bf16 %v704_v16, %v703_v15  ;;  %v706_v20 = vld [vmem:[%s7818_s17 + $0x68] sm:$0xff]  ;;  %v707_v21 = vld [vmem:[%s7818_s17 + $0x70] sm:$0xff] }
 0x173   : > { %664 = vst [vmem:[#allocation2 + $0xf8] sm:$0x80] %v7251_v0  ;;  %665 = vst [vmem:[#allocation2 + $0x120] sm:$0x80] %v7251_v0  ;;  %v715_v22 = vpack.c.bf16 %v706_v20, %v705_v19  ;;  %v708_v23 = vld [vmem:[%s7818_s17 + $0x78] sm:$0xff]  ;;  %v726_v24 = vld [vmem:[%s540_s28] sm:$0xff] }
 0x174   : > { %666 = vst [vmem:[#allocation2 + $0x128] sm:$0x80] %v7251_v0  ;;  %667 = vst [vmem:[#allocation2 + $0x150] sm:$0x80] %v7251_v0  ;;  %v727_v25 = vld [vmem:[%s540_s28 + $0x8] sm:$0xff]  ;;  %v716_v26 = vpack.c.bf16 %v708_v23, %v707_v21  ;;  %v730_v28 = vld [vmem:[%s558_s24] sm:$0xff] }
 0x175   : > { %668 = vst [vmem:[#allocation2 + $0x158] sm:$0x80] %v7251_v0  ;;  %669 = vst [vmem:[#allocation2 + $0x180] sm:$0x80] %v7251_v0  ;;  %v728_v27 = vpack.c.bf16 %v727_v25, %v726_v24  ;;  %v731_v29 = vld [vmem:[%s558_s24 + $0x8] sm:$0xff]  ;;  %v735_v30 = vld [vmem:[%s7825_s5] sm:$0xff] }
 0x176   : > { %670 = vst [vmem:[#allocation2 + $0x188] sm:$0x80] %v7251_v0  ;;  %671 = vst [vmem:[#allocation2 + $0x1b0] sm:$0x80] %v7251_v0  ;;  %v732_v31 = vpack.c.bf16 %v731_v29, %v730_v28  ;;  %v736_v32 = vld [vmem:[%s7825_s5 + $0x8] sm:$0xff]  ;;  %v737_v33 = vld [vmem:[%s7825_s5 + $0x10] sm:$0xff] }
 0x177   : > { %672 = vst [vmem:[#allocation2 + $0x1b8] sm:$0x80] %v7251_v0  ;;  %673 = vst [vmem:[#allocation2 + $0x20] sm:$0x1] %v7251_v0  ;;  %v738_v34 = vld [vmem:[%s7825_s5 + $0x18] sm:$0xff]  ;;  %v751_v35 = vpack.c.bf16 %v736_v32, %v735_v30  ;;  %v739_v37 = vld [vmem:[%s7825_s5 + $0x20] sm:$0xff] }
 0x178   : > { %674 = vst [vmem:[#allocation2 + $0x28] sm:$0x1] %v7251_v0  ;;  %675 = vst [vmem:[#allocation2 + $0x50] sm:$0x1] %v7251_v0  ;;  %v752_v36 = vpack.c.bf16 %v738_v34, %v737_v33  ;;  %v740_v38 = vld [vmem:[%s7825_s5 + $0x28] sm:$0xff]  ;;  %v741_v39 = vld [vmem:[%s7825_s5 + $0x30] sm:$0xff] }
 0x179   : > { %676 = vst [vmem:[#allocation2 + $0x58] sm:$0x1] %v7251_v0  ;;  %677 = vst [vmem:[#allocation2 + $0x80] sm:$0x1] %v7251_v0  ;;  %v753_v40 = vpack.c.bf16 %v740_v38, %v739_v37  ;;  %v742_v41 = vld [vmem:[%s7825_s5 + $0x38] sm:$0xff]  ;;  %v743_v42 = vld [vmem:[%s7825_s5 + $0x40] sm:$0xff] }
 0x17a   : > { %678 = vst [vmem:[#allocation2 + $0x88] sm:$0x1] %v7251_v0  ;;  %679 = vst [vmem:[#allocation2 + $0xb0] sm:$0x1] %v7251_v0  ;;  %v744_v43 = vld [vmem:[%s7825_s5 + $0x48] sm:$0xff]  ;;  %v754_v44 = vpack.c.bf16 %v742_v41, %v741_v39  ;;  %v745_v46 = vld [vmem:[%s7825_s5 + $0x50] sm:$0xff] }
 0x17b   : > { %680 = vst [vmem:[#allocation2 + $0xb8] sm:$0x1] %v7251_v0  ;;  %681 = vst [vmem:[#allocation2 + $0xe0] sm:$0x1] %v7251_v0  ;;  %v755_v45 = vpack.c.bf16 %v744_v43, %v743_v42  ;;  %v746_v47 = vld [vmem:[%s7825_s5 + $0x58] sm:$0xff]  ;;  %v747_v48 = vld [vmem:[%s7825_s5 + $0x60] sm:$0xff] }
 0x17c   : > { %682 = vst [vmem:[#allocation2 + $0xe8] sm:$0x1] %v7251_v0  ;;  %683 = vst [vmem:[#allocation2 + $0x110] sm:$0x1] %v7251_v0  ;;  %v756_v49 = vpack.c.bf16 %v746_v47, %v745_v46  ;;  %v748_v50 = vld [vmem:[%s7825_s5 + $0x68] sm:$0xff]  ;;  %v749_v51 = vld [vmem:[%s7825_s5 + $0x70] sm:$0xff] }
 0x17d   : > { %684 = vst [vmem:[#allocation2 + $0x118] sm:$0x1] %v7251_v0  ;;  %685 = vst [vmem:[#allocation2 + $0x140] sm:$0x1] %v7251_v0  ;;  %v750_v52 = vld [vmem:[%s7825_s5 + $0x78] sm:$0xff]  ;;  %v757_v53 = vpack.c.bf16 %v748_v50, %v747_v48  ;;  %v767_v55 = vld [vmem:[%s549_s16] sm:$0xff] }
 0x17e   : > { %686 = vst [vmem:[#allocation2 + $0x148] sm:$0x1] %v7251_v0  ;;  %687 = vst [vmem:[#allocation2 + $0x170] sm:$0x1] %v7251_v0  ;;  %v758_v54 = vpack.c.bf16 %v750_v52, %v749_v51  ;;  %v768_v56 = vld [vmem:[%s549_s16 + $0x8] sm:$0xff]  ;;  %v771_v57 = vld [vmem:[%s567_s11] sm:$0xff] }
 0x17f   : > { %688 = vst [vmem:[#allocation2 + $0x178] sm:$0x1] %v7251_v0  ;;  %689 = vst [vmem:[#allocation2 + $0x1a0] sm:$0x1] %v7251_v0  ;;  %v769_v58 = vpack.c.bf16 %v768_v56, %v767_v55  ;;  %v772_v59 = vld [vmem:[%s567_s11 + $0x8] sm:$0xff]  ;;  %s7916_s4 = scalar_lea.vmem [#allocation17], %s5624_s1 }
 0x180   : > { %690 = vst [vmem:[#allocation2 + $0x1a8] sm:$0x1] %v7251_v0  ;;  %691 = vst [vmem:[#allocation2 + $0x1d0] sm:$0x1] %v7251_v0  ;;  %v773_v60 = vpack.c.bf16 %v772_v59, %v771_v57  ;;  %p5625_p8 = scmp.ne.s32.totalorder %s8926_s30, 0 }
 0x181   : > { %692 = vst [vmem:[#allocation2 + $0x1d8] sm:$0x1] %v7251_v0  ;;  %718 = vst [vmem:[#allocation2 + $0x40] sm:$0xff] %v709_v4  ;;  %v7252_v61 = vmov (!%p5625_p8), 0  }
 0x182   : > { %719 = vst [vmem:[#allocation2 + $0x70] sm:$0xff] %v710_v8  ;;  %720 = vst [vmem:[#allocation2 + $0xa0] sm:$0xff] %v711_v9 }
 0x183   : > { %721 = vst [vmem:[#allocation2 + $0xd0] sm:$0xff] %v712_v13  ;;  %722 = vst [vmem:[#allocation2 + $0x100] sm:$0xff] %v713_v17 }
 0x184   : > { %723 = vst [vmem:[#allocation2 + $0x130] sm:$0xff] %v714_v18  ;;  %724 = vst [vmem:[#allocation2 + $0x160] sm:$0xff] %v715_v22 }
 0x185   : > { %725 = vst [vmem:[#allocation2 + $0x190] sm:$0xff] %v716_v26  ;;  %729 = vst [vmem:[#allocation2 + $0x10] sm:$0xff] %v728_v27  ;;  %778 = sbr.rel (%p5625_p8) target bundleno = 397 (0x18d), region = 88 }
 0x186   : > { %734 = vst [vmem:[#allocation2 + $0x1c0] sm:$0xff] %v732_v31  ;;  %759 = vst [vmem:[#allocation2 + $0x48] sm:$0xff] %v751_v35 }
 0x187   : > { %760 = vst [vmem:[#allocation2 + $0x78] sm:$0xff] %v752_v36  ;;  %761 = vst [vmem:[#allocation2 + $0xa8] sm:$0xff] %v753_v40 }
 0x188   : > { %762 = vst [vmem:[#allocation2 + $0xd8] sm:$0xff] %v754_v44  ;;  %763 = vst [vmem:[#allocation2 + $0x108] sm:$0xff] %v755_v45 }
 0x189   : > { %764 = vst [vmem:[#allocation2 + $0x138] sm:$0xff] %v756_v49  ;;  %765 = vst [vmem:[#allocation2 + $0x168] sm:$0xff] %v757_v53 }
 0x18a   : > { %766 = vst [vmem:[#allocation2 + $0x198] sm:$0xff] %v758_v54  ;;  %770 = vst [vmem:[#allocation2 + $0x18] sm:$0xff] %v769_v58 }
 0x18b   : > { %774 = vst [vmem:[#allocation2 + $0x1c8] sm:$0xff] %v773_v60  ;;  %779 = vst [vmem:[#allocation2 + $0x10] sm:$0xff] (!%p5625_p8), %v7252_v61 }
 0x18c   : > { %780 = vst [vmem:[#allocation2 + $0x18] sm:$0xff] %v7252_v61 }
 0x18d PF: > { %s8927_s17 = sld [smem:[#allocation33_spill]] }
 0x193   : > { %p5626_p11 = scmp.ne.s32.totalorder %s8927_s17, 1 }
 0x194   : > { %v7253_v62 = vmov (!%p5626_p11), 0  }
 0x195   : > { %784 = sbr.rel (%p5626_p11) target bundleno = 412 (0x19c), region = 92  ;;  %785 = vst [vmem:[#allocation2 + $0x1c0] sm:$0xff] (!%p5626_p11), %v7253_v62  ;;  %786 = vst [vmem:[#allocation2 + $0x1c8] sm:$0xff] (!%p5626_p11), %v7253_v62 }
 0x19c PF: > { %v6392_v63 = vld [vmem:[#allocation14 + $0x104] ss:$8 sps:$4 sm:$0xff]   ;;  %v6396_v1 = vld [vmem:[#allocation14 + $0x100] ss:$8 sps:$4 sm:$0xff]   ;;  %v6398_v3 = vld [vmem:[#allocation14 + $0x114] ss:$8 sps:$4 sm:$0xff]  }
 0x19d   : > { %v6394_v0 = vld [vmem:[#allocation14 + $0x404] ss:$8 sps:$4 sm:$0xff]   ;;  %1253 = vmatprep.subr.bf16.mxu1 %v6392_v63  ;;  %v6397_v2 = vld [vmem:[#allocation14 + $0x400] ss:$8 sps:$4 sm:$0xff]   ;;  %v6400_v4 = vld [vmem:[#allocation14 + $0x414] ss:$8 sps:$4 sm:$0xff]  }
 0x19e   : > { %2989 = vmatprep.subr.bf16.mxu0 %v6394_v0  ;;  %1254 = vmatpush1.bf16.msra.mxu1 %v6396_v1  ;;  %v6402_v5 = vld [vmem:[#allocation14 + $0x110] ss:$8 sps:$4 sm:$0xff]   ;;  %v6404_v7 = vld [vmem:[#allocation14 + $0x124] ss:$8 sps:$4 sm:$0xff]   ;;  %v6408_v9 = vld [vmem:[#allocation14 + $0x120] ss:$8 sps:$4 sm:$0xff]  }
 0x19f   : > { %2990 = vmatpush1.bf16.msra.mxu0 %v6397_v2  ;;  %1255 = vmatprep.subr.bf16.mxu1 %v6398_v3  ;;  %v6403_v6 = vld [vmem:[#allocation14 + $0x410] ss:$8 sps:$4 sm:$0xff]   ;;  %v6406_v8 = vld [vmem:[#allocation14 + $0x424] ss:$8 sps:$4 sm:$0xff]   ;;  %v6409_v10 = vld [vmem:[#allocation14 + $0x420] ss:$8 sps:$4 sm:$0xff]  }
 0x1a0   : > { %2991 = vmatprep.subr.bf16.mxu0 %v6400_v4  ;;  %v6410_v11 = vld [vmem:[#allocation14 + $0x134] ss:$8 sps:$4 sm:$0xff]   ;;  %v6414_v13 = vld [vmem:[#allocation14 + $0x130] ss:$8 sps:$4 sm:$0xff]   ;;  %v6416_v15 = vld [vmem:[#allocation14 + $0x144] ss:$8 sps:$4 sm:$0xff]  }
 0x1a1   : > { %v6412_v12 = vld [vmem:[#allocation14 + $0x434] ss:$8 sps:$4 sm:$0xff]   ;;  %v6415_v14 = vld [vmem:[#allocation14 + $0x430] ss:$8 sps:$4 sm:$0xff]   ;;  %v6418_v16 = vld [vmem:[#allocation14 + $0x444] ss:$8 sps:$4 sm:$0xff]  }
 0x1a2   : > { %1256 = vmatpush1.bf16.msra.mxu1 %v6402_v5  ;;  %v6420_v17 = vld [vmem:[#allocation14 + $0x140] ss:$8 sps:$4 sm:$0xff]   ;;  %v6422_v19 = vld [vmem:[#allocation14 + $0x154] ss:$8 sps:$4 sm:$0xff]   ;;  %v6426_v21 = vld [vmem:[#allocation14 + $0x150] ss:$8 sps:$4 sm:$0xff]  }
 0x1a3   : > { %2992 = vmatpush1.bf16.msra.mxu0 %v6403_v6  ;;  %1257 = vmatprep.subr.bf16.mxu1 %v6404_v7  ;;  %v6421_v18 = vld [vmem:[#allocation14 + $0x440] ss:$8 sps:$4 sm:$0xff]   ;;  %v6424_v20 = vld [vmem:[#allocation14 + $0x454] ss:$8 sps:$4 sm:$0xff]   ;;  %v6427_v22 = vld [vmem:[#allocation14 + $0x450] ss:$8 sps:$4 sm:$0xff]  }
 0x1a4   : > { %2993 = vmatprep.subr.bf16.mxu0 %v6406_v8  ;;  %v6428_v23 = vld [vmem:[#allocation14 + $0x164] ss:$8 sps:$4 sm:$0xff]   ;;  %v6432_v25 = vld [vmem:[#allocation14 + $0x160] ss:$8 sps:$4 sm:$0xff]   ;;  %v6434_v27 = vld [vmem:[#allocation14 + $0x174] ss:$8 sps:$4 sm:$0xff]  }
 0x1a5   : > { %v6430_v24 = vld [vmem:[#allocation14 + $0x464] ss:$8 sps:$4 sm:$0xff]   ;;  %v6433_v26 = vld [vmem:[#allocation14 + $0x460] ss:$8 sps:$4 sm:$0xff]   ;;  %v6436_v28 = vld [vmem:[#allocation14 + $0x474] ss:$8 sps:$4 sm:$0xff]  }
 0x1a6   : > { %1258 = vmatpush1.bf16.msra.mxu1 %v6408_v9  ;;  %v6438_v29 = vld [vmem:[#allocation14 + $0x170] ss:$8 sps:$4 sm:$0xff]   ;;  %v6440_v31 = vld [vmem:[#allocation14 + $0x184] ss:$8 sps:$4 sm:$0xff]   ;;  %v6444_v33 = vld [vmem:[#allocation14 + $0x180] ss:$8 sps:$4 sm:$0xff]  }
 0x1a7   : > { %2994 = vmatpush1.bf16.msra.mxu0 %v6409_v10  ;;  %1259 = vmatprep.subr.bf16.mxu1 %v6410_v11  ;;  %v6439_v30 = vld [vmem:[#allocation14 + $0x470] ss:$8 sps:$4 sm:$0xff]   ;;  %v6442_v32 = vld [vmem:[#allocation14 + $0x484] ss:$8 sps:$4 sm:$0xff]   ;;  %v6445_v34 = vld [vmem:[#allocation14 + $0x480] ss:$8 sps:$4 sm:$0xff]  }
 0x1a8   : > { %2995 = vmatprep.subr.bf16.mxu0 %v6412_v12  ;;  %v6446_v35 = vld [vmem:[#allocation14 + $0x194] ss:$8 sps:$4 sm:$0xff]   ;;  %v6450_v37 = vld [vmem:[#allocation14 + $0x190] ss:$8 sps:$4 sm:$0xff]   ;;  %v6452_v39 = vld [vmem:[#allocation14 + $0x1a4] ss:$8 sps:$4 sm:$0xff]  }
 0x1a9   : > { %v6448_v36 = vld [vmem:[#allocation14 + $0x494] ss:$8 sps:$4 sm:$0xff]   ;;  %v6451_v38 = vld [vmem:[#allocation14 + $0x490] ss:$8 sps:$4 sm:$0xff]   ;;  %v6454_v40 = vld [vmem:[#allocation14 + $0x4a4] ss:$8 sps:$4 sm:$0xff]  }
 0x1aa   : > { %1260 = vmatpush1.bf16.msra.mxu1 %v6414_v13  ;;  %v6456_v41 = vld [vmem:[#allocation14 + $0x1a0] ss:$8 sps:$4 sm:$0xff]   ;;  %v6458_v43 = vld [vmem:[#allocation14 + $0x1b4] ss:$8 sps:$4 sm:$0xff]   ;;  %v6462_v47 = vld [vmem:[#allocation14 + $0x1b0] ss:$8 sps:$4 sm:$0xff]  }
 0x1ab   : > { %2996 = vmatpush1.bf16.msra.mxu0 %v6415_v14  ;;  %1261 = vmatprep.subr.bf16.mxu1 %v6416_v15  ;;  %v6457_v42 = vld [vmem:[#allocation14 + $0x4a0] ss:$8 sps:$4 sm:$0xff]   ;;  %v6460_v44 = vld [vmem:[#allocation14 + $0x4b4] ss:$8 sps:$4 sm:$0xff]   ;;  %v6463_v48 = vld [vmem:[#allocation14 + $0x4b0] ss:$8 sps:$4 sm:$0xff]  }
 0x1ac   : > { %2997 = vmatprep.subr.bf16.mxu0 %v6418_v16  ;;  %v7920_v45 = vld [vmem:[#allocation2 + $0x18] sm:$0xff]  ;;  %v7923_v46 = vld [vmem:[#allocation2 + $0x48] sm:$0xff]  ;;  %v7926_v3 = vld [vmem:[#allocation2 + $0x10] sm:$0xff]  ;;  %vm819_vm0 = vsmask.f32 256  ;;  %s8947_s20 = sld [smem:[#allocation33_spill]] }
 0x1ad   : > { %1285 = vmatprep.mubr.bf16.mxu1 %v7920_v45  ;;  %v6464_v49 = vld [vmem:[#allocation14 + $0x1c4] ss:$8 sps:$4 sm:$0xff]   ;;  %3021 = vmatprep.mubr.bf16.mxu0 %v7923_v46  ;;  %v6468_v51 = vld [vmem:[#allocation14 + $0x1c0] ss:$8 sps:$4 sm:$0xff]   ;;  %v6470_v53 = vld [vmem:[#allocation14 + $0x1d4] ss:$8 sps:$4 sm:$0xff]  }
 0x1ae   : > { %1262 = vmatpush1.bf16.msra.mxu1 %v6420_v17  ;;  %v6466_v50 = vld [vmem:[#allocation14 + $0x4c4] ss:$8 sps:$4 sm:$0xff]   ;;  %v6469_v52 = vld [vmem:[#allocation14 + $0x4c0] ss:$8 sps:$4 sm:$0xff]   ;;  %v6472_v54 = vld [vmem:[#allocation14 + $0x4d4] ss:$8 sps:$4 sm:$0xff]  }
 0x1af   : > { %2998 = vmatpush1.bf16.msra.mxu0 %v6421_v18  ;;  %1263 = vmatprep.subr.bf16.mxu1 %v6422_v19  ;;  %v6474_v55 = vld [vmem:[#allocation14 + $0x1d0] ss:$8 sps:$4 sm:$0xff]   ;;  %v6476_v57 = vld [vmem:[#allocation14 + $0x1e4] ss:$8 sps:$4 sm:$0xff]   ;;  %v6480_v59 = vld [vmem:[#allocation14 + $0x1e0] ss:$8 sps:$4 sm:$0xff]  }
 0x1b0   : > { %2999 = vmatprep.subr.bf16.mxu0 %v6424_v20  ;;  %v6475_v56 = vld [vmem:[#allocation14 + $0x4d0] ss:$8 sps:$4 sm:$0xff]   ;;  %v6478_v58 = vld [vmem:[#allocation14 + $0x4e4] ss:$8 sps:$4 sm:$0xff]   ;;  %v6481_v60 = vld [vmem:[#allocation14 + $0x4e0] ss:$8 sps:$4 sm:$0xff]  }
 0x1b1   : > { %v6482_v61 = vld [vmem:[#allocation14 + $0x1f4] ss:$8 sps:$4 sm:$0xff]   ;;  %v6486_v63 = vld [vmem:[#allocation14 + $0x1f0] ss:$8 sps:$4 sm:$0xff]   ;;  %v6490_v1 = vld [vmem:[#allocation14 + $0x4] ss:$8 sps:$4 sm:$0xff]  }
 0x1b2   : > { %1264 = vmatpush1.bf16.msra.mxu1 %v6426_v21  ;;  %v6484_v62 = vld [vmem:[#allocation14 + $0x4f4] ss:$8 sps:$4 sm:$0xff]   ;;  %v6487_v0 = vld [vmem:[#allocation14 + $0x4f0] ss:$8 sps:$4 sm:$0xff]   ;;  %v6493_v2 = vld [vmem:[#allocation14 + $0x504] ss:$8 sps:$4 sm:$0xff]  }
 0x1b3   : > { %3000 = vmatpush1.bf16.msra.mxu0 %v6427_v22  ;;  %1265 = vmatprep.subr.bf16.mxu1 %v6428_v23  ;;  %v7928_v4 = vld [vmem:[#allocation2 + $0x40] sm:$0xff]  ;;  %v6496_v7 = vld [vmem:[#allocation14 + $0x14] ss:$8 sps:$4 sm:$0xff]   ;;  %v6494_v9 = vld [vmem:[#allocation14 + $0x10] ss:$8 sps:$4 sm:$0xff]   ;;  %s8948_s27 = sld [smem:[#allocation34_spill]] }
 0x1b4   : > { %3001 = vmatprep.subr.bf16.mxu0 %v6430_v24  ;;  %v6488_v5 = vld [vmem:[#allocation14] ss:$8 sps:$4 sm:$0xff]   ;;  %v6499_v8 = vld [vmem:[#allocation14 + $0x514] ss:$8 sps:$4 sm:$0xff]   ;;  %v6497_v11 = vld [vmem:[#allocation14 + $0x510] ss:$8 sps:$4 sm:$0xff]  }
 0x1b5   : > { %v6491_v6 = vld [vmem:[#allocation14 + $0x500] ss:$8 sps:$4 sm:$0xff]   ;;  %v7932_v10 = vld [vmem:[#allocation2 + $0x78] sm:$0xff]  ;;  %v6502_v12 = vld [vmem:[#allocation14 + $0x24] ss:$8 sps:$4 sm:$0xff]   ;;  %s5924_s29 = sshll.u32 %s8947_s20, 5 }
 0x1b6   : > { %1266 = vmatpush1.bf16.msra.mxu1 %v6432_v25  ;;  %v6505_v13 = vld [vmem:[#allocation14 + $0x524] ss:$8 sps:$4 sm:$0xff]   ;;  %v6500_v14 = vld [vmem:[#allocation14 + $0x20] ss:$8 sps:$4 sm:$0xff]   ;;  %v7936_v15 = vld [vmem:[#allocation2 + $0x70] sm:$0xff]  ;;  %s5332_s6 = sshll.u32 %s7916_s4, 4  ;;  %s8685_s6 = int_to_ptr.vmem [resolvable:$true] %s5332_s6 }
 0x1b7   : > { %3002 = vmatpush1.bf16.msra.mxu0 %v6433_v26  ;;  %1267 = vmatprep.subr.bf16.mxu1 %v6434_v27  ;;  %v6503_v16 = vld [vmem:[#allocation14 + $0x520] ss:$8 sps:$4 sm:$0xff]   ;;  %v6508_v17 = vld [vmem:[#allocation14 + $0x34] ss:$8 sps:$4 sm:$0xff]   ;;  %v6506_v19 = vld [vmem:[#allocation14 + $0x30] ss:$8 sps:$4 sm:$0xff]  }
 0x1b8   : > { %3003 = vmatprep.subr.bf16.mxu0 %v6436_v28  ;;  %v6511_v18 = vld [vmem:[#allocation14 + $0x534] ss:$8 sps:$4 sm:$0xff]   ;;  %v7940_v20 = vld [vmem:[#allocation2 + $0xa8] sm:$0xff]  ;;  %v6509_v21 = vld [vmem:[#allocation14 + $0x530] ss:$8 sps:$4 sm:$0xff]   ;;  %s8949_s28 = sld [smem:[#allocation40_spill]] }
 0x1b9   : > { %v6514_v22 = vld [vmem:[#allocation14 + $0x44] ss:$8 sps:$4 sm:$0xff]   ;;  %v6512_v24 = vld [vmem:[#allocation14 + $0x40] ss:$8 sps:$4 sm:$0xff]   ;;  %v6520_v27 = vld [vmem:[#allocation14 + $0x54] ss:$8 sps:$4 sm:$0xff]  }
 0x1ba   : > { %1268 = vmatpush1.bf16.msra.mxu1 %v6438_v29  ;;  %v6517_v23 = vld [vmem:[#allocation14 + $0x544] ss:$8 sps:$4 sm:$0xff]   ;;  %v6515_v26 = vld [vmem:[#allocation14 + $0x540] ss:$8 sps:$4 sm:$0xff]   ;;  %v6523_v28 = vld [vmem:[#allocation14 + $0x554] ss:$8 sps:$4 sm:$0xff]  }
 0x1bb   : > { %3004 = vmatpush1.bf16.msra.mxu0 %v6439_v30  ;;  %1269 = vmatprep.subr.bf16.mxu1 %v6440_v31  ;;  %v7944_v25 = vld [vmem:[#allocation2 + $0xa0] sm:$0xff]  ;;  %v7948_v29 = vld [vmem:[#allocation2 + $0xd8] sm:$0xff]  ;;  %vm1671_vm1 = vsmask.f32 7424  ;;  %s5918_s5 = sshll.u32 %s8948_s27, 6  ;;  %s8950_s12 = sld [smem:[#allocation54_spill]] }
 0x1bc   : > { %3005 = vmatprep.subr.bf16.mxu0 %v6442_v32  ;;  %v6518_v30 = vld [vmem:[#allocation14 + $0x50] ss:$8 sps:$4 sm:$0xff]   ;;  %v6526_v32 = vld [vmem:[#allocation14 + $0x64] ss:$8 sps:$4 sm:$0xff]   ;;  %s8658_s25 = sadd.s32 %s5924_s29, %s5918_s5  ;;  %s5316_s14 = scalar_lea.sflag [#allocation5], %s7814_s8 }
 0x1bd   : > { %v6521_v31 = vld [vmem:[#allocation14 + $0x550] ss:$8 sps:$4 sm:$0xff]   ;;  %s5919_s26 = sshll.u32 %s8658_s25, 7  ;;  %s7065_s23 = scalar_lea.vmem %s8685_s6, 4096 }
 0x1be   : > { %1270 = vmatpush1.bf16.msra.mxu1 %v6444_v33  ;;  %v6529_v33 = vld [vmem:[#allocation14 + $0x564] ss:$8 sps:$4 sm:$0xff]   ;;  %p7066_p12 = scmp.ne.s32.totalorder %s8685_s6, %s7065_s23  ;;  %p8952_p7 = scmp.ne.s32.totalorder %s8949_s28, 0 }
 0x1bf   : > { %3006 = vmatpush1.bf16.msra.mxu0 %v6445_v34  ;;  %1271 = vmatprep.subr.bf16.mxu1 %v6446_v35  ;;  %v6524_v34 = vld [vmem:[#allocation14 + $0x60] ss:$8 sps:$4 sm:$0xff]   ;;  %v7952_v35 = vld [vmem:[#allocation2 + $0xd0] sm:$0xff]  ;;  %s7254_s11 = smov [#allocation17]  }
 0x1c0   : > { %3007 = vmatprep.subr.bf16.mxu0 %v6448_v36  ;;  %v6527_v36 = vld [vmem:[#allocation14 + $0x560] ss:$8 sps:$4 sm:$0xff]   ;;  %p7067_p4 = pnand %p7066_p12, %p8952_p7  ;;  %s7069_s1 = sshll.u32 %s7254_s11, 4  ;;  %s7070_s1 = int_to_ptr.vmem [resolvable:$false] %s7069_s1 }
 0x1c1   : > { %s8951_s24 = smov %s8950_s12  ;;  %s8683_s9 = scalar_lea.hbm %s8950_s12, %s5919_s26 }
 0x1c2   : > { %1272 = vmatpush1.bf16.msra.mxu1 %v6450_v37  ;;  %v6532_v37 = vld [vmem:[#allocation14 + $0x74] ss:$8 sps:$4 sm:$0xff]   ;;  %p7068_p9 = pneg %p7067_p4  ;;  %s7071_s30 = scalar_lea.vmem %s7070_s1, 8192 }
 0x1c3   : > { %3008 = vmatpush1.bf16.msra.mxu0 %v6451_v38  ;;  %1273 = vmatprep.subr.bf16.mxu1 %v6452_v39  ;;  %v6535_v38 = vld [vmem:[#allocation14 + $0x574] ss:$8 sps:$4 sm:$0xff]   ;;  %p7072_p0 = scmp.lt.s32.totalorder %s8685_s6, %s7070_s1  ;;  %p7073_p13 = scmp.lt.s32.totalorder %s7071_s30, %s7065_s23 }
 0x1c4   : > { %3009 = vmatprep.subr.bf16.mxu0 %v6454_v40  ;;  %v7954_v39 = vld [vmem:[#allocation2 + $0x198] sm:$0xff] }
 0x1c5   : > { %v6530_v40 = vld [vmem:[#allocation14 + $0x70] ss:$8 sps:$4 sm:$0xff]   ;;  %p7074_p6 = por %p7073_p13, %p7072_p0 }
 0x1c6   : > { %1274 = vmatpush1.bf16.msra.mxu1 %v6456_v41  ;;  %v7956_v41 = vld [vmem:[#allocation2 + $0x108] sm:$0xff] }
 0x1c7   : > { %3010 = vmatpush1.bf16.msra.mxu0 %v6457_v42  ;;  %1275 = vmatprep.subr.bf16.mxu1 %v6458_v43  ;;  %v2435_v42 = vshrl.u32 %v7954_v39, 16  ;;  %v7961_v43 = vld [vmem:[#allocation2 + $0x190] sm:$0xff]  ;;  %p7075_p5 = pnand %p7074_p6, %p7068_p9 }
 0x1c8   : > { %3011 = vmatprep.subr.bf16.mxu0 %v6460_v44  ;;  %v6533_v44 = vld [vmem:[#allocation14 + $0x570] ss:$8 sps:$4 sm:$0xff]  }
 0x1ca   : > { %1276 = vmatpush1.bf16.msra.mxu1 %v6462_v47  ;;  %v2437_v47 = vrot.slane %v2435_v42, 7 }
 0x1cb   : > { %3012 = vmatpush1.bf16.msra.mxu0 %v6463_v48  ;;  %1277 = vmatprep.subr.bf16.mxu1 %v6464_v49  ;;  %v2438_v48 = vshll.u32 %v7954_v39, 16  ;;  %v2423_v49 = vshrl.u32 %v7961_v43, 16 }
 0x1cc   : > { %3013 = vmatprep.subr.bf16.mxu0 %v6466_v50  ;;  %v6538_v50 = vld [vmem:[#allocation14 + $0x84] ss:$8 sps:$4 sm:$0xff]  }
 0x1ce   : > { %1278 = vmatpush1.bf16.msra.mxu1 %v6468_v51  ;;  %v6541_v51 = vld [vmem:[#allocation14 + $0x584] ss:$8 sps:$4 sm:$0xff]  }
 0x1cf   : > { %3014 = vmatpush1.bf16.msra.mxu0 %v6469_v52  ;;  %1279 = vmatprep.subr.bf16.mxu1 %v6470_v53  ;;  %v7971_v52 = vor.u32 %v2438_v48, %v2437_v47  ;;  %v2425_v53 = vrot.slane %v2423_v49, 7 }
 0x1d0   : > { %3015 = vmatprep.subr.bf16.mxu0 %v6472_v54  ;;  %v2426_v54 = vshll.u32 %v7961_v43, 16 }
 0x1d2   : > { %1280 = vmatpush1.bf16.msra.mxu1 %v6474_v55  ;;  %v6536_v55 = vld [vmem:[#allocation14 + $0x80] ss:$8 sps:$4 sm:$0xff]  }
 0x1d3   : > { %3016 = vmatpush1.bf16.msra.mxu0 %v6475_v56  ;;  %1281 = vmatprep.subr.bf16.mxu1 %v6476_v57  ;;  %v7976_v56 = vld [vmem:[#allocation2 + $0x100] sm:$0xff] }
 0x1d4   : > { %3017 = vmatprep.subr.bf16.mxu0 %v6478_v58  ;;  %v6539_v57 = vld [vmem:[#allocation14 + $0x580] ss:$8 sps:$4 sm:$0xff]   ;;  %v6544_v58 = vld [vmem:[#allocation14 + $0x94] ss:$8 sps:$4 sm:$0xff]  }
 0x1d6   : > { %1282 = vmatpush1.bf16.msra.mxu1 %v6480_v59  ;;  %v7980_v59 = vor.u32 %v2426_v54, %v2425_v53  ;;  %v6566_v53 = vld [vmem:[#allocation14 + $0xd0] ss:$8 sps:$4 sm:$0xff]  }
 0x1d7   : > { %3018 = vmatpush1.bf16.msra.mxu0 %v6481_v60  ;;  %1283 = vmatprep.subr.bf16.mxu1 %v6482_v61  ;;  %v6547_v60 = vld [vmem:[#allocation14 + $0x594] ss:$8 sps:$4 sm:$0xff]   ;;  %v6542_v61 = vld [vmem:[#allocation14 + $0x90] ss:$8 sps:$4 sm:$0xff]  }
 0x1d8   : > { %3019 = vmatprep.subr.bf16.mxu0 %v6484_v62  ;;  %v7984_v62 = vld [vmem:[#allocation2 + $0x138] sm:$0xff] }
 0x1da   : > { %1284 = vmatpush1.bf16.msra.mxu1 %v6486_v63  ;;  %v6545_v63 = vld [vmem:[#allocation14 + $0x590] ss:$8 sps:$4 sm:$0xff]  }
 0x1db   : > { %3020 = vmatpush1.bf16.msra.mxu0 %v6487_v0  ;;  %1526 = vmatprep.subr.bf16.mxu1 %v6490_v1  ;;  %v6550_v0 = vld [vmem:[#allocation14 + $0xa4] ss:$8 sps:$4 sm:$0xff]  }
 0x1dc   : > { %3567 = vmatprep.subr.bf16.mxu0 %v6493_v2  ;;  %v6553_v1 = vld [vmem:[#allocation14 + $0x5a4] ss:$8 sps:$4 sm:$0xff]   ;;  %v6548_v2 = vld [vmem:[#allocation14 + $0xa0] ss:$8 sps:$4 sm:$0xff]  }
 0x1dd   : > { %1286 = vmatmul.mubr.bf16.vlgmr.msra.gmra.mrb[0].mxu1 %v7926_v3 }
 0x1de   : > { %3022 = vmatmul.mubr.bf16.vlgmr.msra.gmra.mrb[0].mxu0 %v7928_v4  ;;  %1527 = vmatpush1.bf16.msra.mxu1 %v6488_v5  ;;  %v7988_v5 = vld [vmem:[#allocation2 + $0x130] sm:$0xff] }
 0x1df   : > { %3568 = vmatpush1.bf16.msra.mxu0 %v6491_v6  ;;  %1528 = vmatprep.subr.bf16.mxu1 %v6496_v7  ;;  %v6551_v6 = vld [vmem:[#allocation14 + $0x5a0] ss:$8 sps:$4 sm:$0xff]   ;;  %v6556_v7 = vld [vmem:[#allocation14 + $0xb4] ss:$8 sps:$4 sm:$0xff]  }
 0x1e0   : > { %3569 = vmatprep.subr.bf16.mxu0 %v6499_v8  ;;  %1295 = vmatprep.mubr.bf16.mxu1 %v7923_v46  ;;  %v6559_v8 = vld [vmem:[#allocation14 + $0x5b4] ss:$8 sps:$4 sm:$0xff]  }
 0x1e1   : > { %3031 = vmatprep.mubr.bf16.mxu0 %v7932_v10 }
 0x1e2   : > { %1529 = vmatpush1.bf16.msra.mxu1 %v6494_v9  ;;  %v837_v9 = vshrl.u32 %v7920_v45, 16 }
 0x1e3   : > { %3570 = vmatpush1.bf16.msra.mxu0 %v6497_v11  ;;  %1530 = vmatprep.subr.bf16.mxu1 %v6502_v12  ;;  %v6554_v11 = vld [vmem:[#allocation14 + $0xb0] ss:$8 sps:$4 sm:$0xff]   ;;  %v7993_v12 = vld [vmem:[#allocation2 + $0x168] sm:$0xff] }
 0x1e4   : > { %3571 = vmatprep.subr.bf16.mxu0 %v6505_v13  ;;  %v840_v13 = vshll.u32 %v7920_v45, 16  ;;  %v6560_v45 = vld [vmem:[#allocation14 + $0xc0] ss:$8 sps:$4 sm:$0xff]  }
 0x1e5   : > { %1296 = vmatmul.mubr.bf16.gmra.mrb[4].mxu1 %v7928_v4 }
 0x1e6   : > { %3032 = vmatmul.mubr.bf16.gmra.mrb[4].mxu0 %v7936_v15  ;;  %1531 = vmatpush1.bf16.msra.mxu1 %v6500_v14  ;;  %v2267_v14 = vshrl.u32 %v7923_v46, 16 }
 0x1e7   : > { %3572 = vmatpush1.bf16.msra.mxu0 %v6503_v16  ;;  %1532 = vmatprep.subr.bf16.mxu1 %v6508_v17  ;;  %v6557_v16 = vld [vmem:[#allocation14 + $0x5b0] ss:$8 sps:$4 sm:$0xff]   ;;  %v2270_v17 = vshll.u32 %v7923_v46, 16 }
 0x1e8   : > { %3573 = vmatprep.subr.bf16.mxu0 %v6511_v18  ;;  %1305 = vmatprep.mubr.bf16.mxu1 %v7932_v10  ;;  %v825_v18 = vshrl.u32 %v7926_v3, 16 }
 0x1e9   : > { %3041 = vmatprep.mubr.bf16.mxu0 %v7940_v20 }
 0x1ea   : > { %1533 = vmatpush1.bf16.msra.mxu1 %v6506_v19  ;;  %v6562_v19 = vld [vmem:[#allocation14 + $0xc4] ss:$8 sps:$4 sm:$0xff]  }
 0x1eb   : > { %3574 = vmatpush1.bf16.msra.mxu0 %v6509_v21  ;;  %1534 = vmatprep.subr.bf16.mxu1 %v6514_v22  ;;  %v6565_v21 = vld [vmem:[#allocation14 + $0x5c4] ss:$8 sps:$4 sm:$0xff]   ;;  %v828_v22 = vshll.u32 %v7926_v3, 16 }
 0x1ec   : > { %3575 = vmatprep.subr.bf16.mxu0 %v6517_v23  ;;  %v2258_v23 = vshll.u32 %v7928_v4, 16 }
 0x1ed   : > { %1306 = vmatmul.mubr.bf16.gmra.mrb[8].mxu1 %v7936_v15 }
 0x1ee   : > { %3042 = vmatmul.mubr.bf16.gmra.mrb[8].mxu0 %v7944_v25  ;;  %1535 = vmatpush1.bf16.msra.mxu1 %v6512_v24  ;;  %v8003_v24 = vld [vmem:[#allocation2 + $0x160] sm:$0xff] }
 0x1ef   : > { %3576 = vmatpush1.bf16.msra.mxu0 %v6515_v26  ;;  %1536 = vmatprep.subr.bf16.mxu1 %v6520_v27  ;;  %v839_v26 = vrot.slane %v837_v9, 7  ;;  %v2255_v27 = vshrl.u32 %v7928_v4, 16 }
 0x1f0   : > { %3577 = vmatprep.subr.bf16.mxu0 %v6523_v28  ;;  %1315 = vmatprep.mubr.bf16.mxu1 %v7940_v20  ;;  %v6563_v28 = vld [vmem:[#allocation14 + $0x5c0] ss:$8 sps:$4 sm:$0xff]  }
 0x1f1   : > { %3051 = vmatprep.mubr.bf16.mxu0 %v7948_v29 }
 0x1f2   : > { %1537 = vmatpush1.bf16.msra.mxu1 %v6518_v30  ;;  %v8006_v30 = vrot.slane %v2267_v14, 7 }
 0x1f3   : > { %3578 = vmatpush1.bf16.msra.mxu0 %v6521_v31  ;;  %1538 = vmatprep.subr.bf16.mxu1 %v6526_v32  ;;  %v788_v31 = vld [vmem:[#allocation2 + $0x8] sm:$0x80]  ;;  %v3137_v32 = vld [vmem:[#allocation2 + $0x58] sm:$0x1] }
 0x1f4   : > { %3579 = vmatprep.subr.bf16.mxu0 %v6529_v33  ;;  %v827_v33 = vrot.slane %v825_v18, 7  ;;  %v833_v47 = vshrl.u32 %v788_v31, 16  ;;  %v3141_v18 = vld [vmem:[#allocation2 + $0x88] sm:$0x1]  ;;  %v8044_v3 = vor.u32 %v2270_v17, %v8006_v30  ;;  %v796_v30 = vld [vmem:[#allocation2 + $0x68] sm:$0x80] }
 0x1f5   : > { %1316 = vmatmul.mubr.bf16.gmra.mrb[12].mxu1 %v7944_v25 }
 0x1f6   : > { %3052 = vmatmul.mubr.bf16.gmra.mrb[12].mxu0 %v7952_v35  ;;  %1539 = vmatpush1.bf16.msra.mxu1 %v6524_v34  ;;  %v6568_v34 = vld [vmem:[#allocation14 + $0xd4] ss:$8 sps:$4 sm:$0xff]  }
 0x1f7   : > { %3580 = vmatpush1.bf16.msra.mxu0 %v6527_v36  ;;  %1540 = vmatprep.subr.bf16.mxu1 %v6532_v37  ;;  %v6571_v36 = vld [vmem:[#allocation14 + $0x5d4] ss:$8 sps:$4 sm:$0xff]   ;;  %v8010_v37 = vrot.slane %v2255_v27, 7 }
 0x1f8   : > { %3581 = vmatprep.subr.bf16.mxu0 %v6535_v38  ;;  %1325 = vmatprep.mubr.bf16.mxu1 %v7948_v29  ;;  %v2291_v38 = vshrl.u32 %v7932_v10, 16 }
 0x1f9   : > { %3061 = vmatprep.mubr.bf16.mxu0 %v7956_v41 }
 0x1fa   : > { %1541 = vmatpush1.bf16.msra.mxu1 %v6530_v40  ;;  %v3183_v40 = vrot.slane %v2270_v17, 1 }
 0x1fb   : > { %3582 = vmatpush1.bf16.msra.mxu0 %v6533_v44  ;;  %1542 = vmatprep.subr.bf16.mxu1 %v6538_v50  ;;  %v3171_v44 = vrot.slane %v2258_v23, 1  ;;  %v3186_v50 = vshll.u32 %v3137_v32, 16 }
 0x1fc   : > { %3583 = vmatprep.subr.bf16.mxu0 %v6541_v51  ;;  %v787_v51 = vld [vmem:[#allocation2] sm:$0x80]  ;;  %v3184_v9 = vor.u32 %v3183_v40, %v2267_v14  ;;  %v6581_v14 = vld [vmem:[#allocation14 + $0x5f0] ss:$8 sps:$4 sm:$0xff]  }
 0x1fd   : > { %1326 = vmatmul.mubr.bf16.gmra.mrb[16].mxu1 %v7952_v35 }
 0x1fe   : > { %3062 = vmatmul.mubr.bf16.gmra.mrb[16].mxu0 %v7976_v56  ;;  %1543 = vmatpush1.bf16.msra.mxu1 %v6536_v55  ;;  %v6569_v55 = vld [vmem:[#allocation14 + $0x5d0] ss:$8 sps:$4 sm:$0xff]  }
 0x1ff   : > { %3584 = vmatpush1.bf16.msra.mxu0 %v6539_v57  ;;  %1544 = vmatprep.subr.bf16.mxu1 %v6544_v58  ;;  %v6574_v57 = vld [vmem:[#allocation14 + $0xe4] ss:$8 sps:$4 sm:$0xff]   ;;  %v2294_v58 = vshll.u32 %v7932_v10, 16 }
 0x200   : > { %3585 = vmatprep.subr.bf16.mxu0 %v6547_v60  ;;  %1335 = vmatprep.mubr.bf16.mxu1 %v7956_v41  ;;  %v6577_v60 = vld [vmem:[#allocation14 + $0x5e4] ss:$8 sps:$4 sm:$0xff]  }
 0x201   : > { %3071 = vmatprep.mubr.bf16.mxu0 %v7984_v62  ;;  %v3207_v31 = vrot.slane %v2294_v58, 1 }
 0x202   : > { %1545 = vmatpush1.bf16.msra.mxu1 %v6542_v61  ;;  %v3136_v61 = vld [vmem:[#allocation2 + $0x50] sm:$0x1] }
 0x203   : > { %3586 = vmatpush1.bf16.msra.mxu0 %v6545_v63  ;;  %1546 = vmatprep.subr.bf16.mxu1 %v6550_v0  ;;  %v842_v63 = vor.u32 %v840_v13, %v839_v26  ;;  %v8022_v0 = vrot.slane %v2291_v38, 7  ;;  %v792_v13 = vld [vmem:[#allocation2 + $0x38] sm:$0x80]  ;;  %v6578_v26 = vld [vmem:[#allocation14 + $0xf0] ss:$8 sps:$4 sm:$0xff]  }
 0x204   : > { %3587 = vmatprep.subr.bf16.mxu0 %v6553_v1  ;;  %v6572_v1 = vld [vmem:[#allocation14 + $0xe0] ss:$8 sps:$4 sm:$0xff]   ;;  %v857_v40 = vshrl.u32 %v792_v13, 16 }
 0x205   : > { %1336 = vmatmul.mubr.bf16.gmra.mrb[20].mxu1 %v7976_v56  ;;  %v8072_v4 = vor.u32 %v2294_v58, %v8022_v0 }
 0x206   : > { %3072 = vmatmul.mubr.bf16.gmra.mrb[20].mxu0 %v7988_v5  ;;  %1547 = vmatpush1.bf16.msra.mxu1 %v6548_v2  ;;  %v821_v2 = vshrl.u32 %v787_v51, 16  ;;  %v3172_v51 = vor.u32 %v3171_v44, %v2255_v27  ;;  %v6584_v27 = vld [vmem:[#allocation14 + $0x200] ss:$8 sps:$4 sm:$0xff]   ;;  %v6592_v44 = vld [vmem:[#allocation14 + $0x214] ss:$8 sps:$4 sm:$0xff]  }
 0x207   : > { %3588 = vmatpush1.bf16.msra.mxu0 %v6551_v6  ;;  %1548 = vmatprep.subr.bf16.mxu1 %v6556_v7  ;;  %v2279_v6 = vshrl.u32 %v7936_v15, 16  ;;  %v6575_v7 = vld [vmem:[#allocation14 + $0x5e0] ss:$8 sps:$4 sm:$0xff]  }
 0x208   : > { %3589 = vmatprep.subr.bf16.mxu0 %v6559_v8  ;;  %1345 = vmatprep.mubr.bf16.mxu1 %v7984_v62  ;;  %v835_v8 = vrot.slane %v833_v47, 7  ;;  %v3210_v47 = vshll.u32 %v3141_v18, 16  ;;  %v6595_v18 = vld [vmem:[#allocation14 + $0x614] ss:$8 sps:$4 sm:$0xff]  }
 0x209   : > { %3081 = vmatprep.mubr.bf16.mxu0 %v7993_v12 }
 0x20a   : > { %1549 = vmatpush1.bf16.msra.mxu1 %v6554_v11  ;;  %v3188_v11 = vrot.slane %v3186_v50, 1  ;;  %v843_v32 = vsel %vm819_vm0, %v835_v8, %v842_v63  ;;  %v830_v50 = vor.u32 %v828_v22, %v827_v33  ;;  %v2318_v22 = vshll.u32 %v7940_v20, 16  ;;  %v6587_v33 = vld [vmem:[#allocation14 + $0x600] ss:$8 sps:$4 sm:$0xff]  }
 0x20b   : > { %3590 = vmatpush1.bf16.msra.mxu0 %v6557_v16  ;;  %1550 = vmatprep.subr.bf16.mxu1 %v6562_v19  ;;  %v3174_v16 = vshll.u32 %v3136_v61, 16  ;;  %v2282_v19 = vshll.u32 %v7936_v15, 16  ;;  %v3140_v61 = vld [vmem:[#allocation2 + $0x80] sm:$0x1] }
 0x20c   : > { %3591 = vmatprep.subr.bf16.mxu0 %v6565_v21  ;;  %v6580_v21 = vld [vmem:[#allocation14 + $0xf4] ss:$8 sps:$4 sm:$0xff]   ;;  %v3198_v17 = vshll.u32 %v3140_v61, 16  ;;  %v6599_v61 = vld [vmem:[#allocation14 + $0x620] ss:$8 sps:$4 sm:$0xff]  }
 0x20d   : > { %1346 = vmatmul.mubr.bf16.gmra.mrb[24].mxu1 %v7988_v5  ;;  %v3195_v63 = vrot.slane %v2282_v19, 1 }
 0x20e   : > { %3082 = vmatmul.mubr.bf16.gmra.mrb[24].mxu0 %v8003_v24  ;;  %1551 = vmatpush1.bf16.msra.mxu1 %v6560_v45  ;;  %v6583_v45 = vld [vmem:[#allocation14 + $0x5f4] ss:$8 sps:$4 sm:$0xff]  }
 0x20f   : > { %3592 = vmatpush1.bf16.msra.mxu0 %v6563_v28  ;;  %1552 = vmatprep.subr.bf16.mxu1 %v6568_v34  ;;  %v823_v28 = vrot.slane %v821_v2, 7  ;;  %v3189_v34 = vsel %vm1671_vm1, %v3184_v9, %v3188_v11  ;;  %v3208_v2 = vor.u32 %v3207_v31, %v2291_v38  ;;  %v3145_v11 = vld [vmem:[#allocation2 + $0xb8] sm:$0x1]  ;;  %v2306_v38 = vshll.u32 %v7944_v25, 16 }
 0x210   : > { %3593 = vmatprep.subr.bf16.mxu0 %v6571_v36  ;;  %1355 = vmatprep.mubr.bf16.mxu1 %v7993_v12  ;;  %v6586_v36 = vld [vmem:[#allocation14 + $0x204] ss:$8 sps:$4 sm:$0xff]  }
 0x211   : > { %3091 = vmatprep.mubr.bf16.mxu0 %v7954_v39  ;;  %v831_v9 = vsel %vm819_vm0, %v823_v28, %v830_v50  ;;  %v3200_v50 = vrot.slane %v3198_v17, 1  ;;  %v6602_v17 = vld [vmem:[#allocation14 + $0x230] ss:$8 sps:$4 sm:$0xff]   ;;  %v3714_v39 = vld [vmem:[#allocation2 + $0x68] sm:$0x80] }
 0x212   : > { %1553 = vmatpush1.bf16.msra.mxu1 %v6566_v53  ;;  %v3176_v53 = vrot.slane %v3174_v16, 1  ;;  %v2281_v16 = vrot.slane %v2279_v6, 7 }
 0x213   : > { %3594 = vmatpush1.bf16.msra.mxu0 %v6569_v55  ;;  %1554 = vmatprep.subr.bf16.mxu1 %v6574_v57  ;;  %v6589_v55 = vld [vmem:[#allocation14 + $0x604] ss:$8 sps:$4 sm:$0xff]   ;;  %v791_v57 = vld [vmem:[#allocation2 + $0x30] sm:$0x80] }
 0x214   : > { %3595 = vmatprep.subr.bf16.mxu0 %v6577_v60  ;;  %v2315_v60 = vshrl.u32 %v7940_v20, 16  ;;  %v845_v8 = vshrl.u32 %v791_v57, 16  ;;  %v3177_v46 = vsel %vm1671_vm1, %v3172_v51, %v3176_v53  ;;  %v6601_v51 = vld [vmem:[#allocation14 + $0x624] ss:$8 sps:$4 sm:$0xff]   ;;  %v2303_v53 = vshrl.u32 %v7944_v25, 16 }
 0x215   : > { %1356 = vmatmul.mubr.bf16.gmra.mrb[28].mxu1 %v8003_v24  ;;  %v3144_v57 = vld [vmem:[#allocation2 + $0xb0] sm:$0x1]  ;;  %v6616_v20 = vld [vmem:[#allocation14 + $0x254] ss:$8 sps:$4 sm:$0xff]  }
 0x216   : > { %3092 = vmatmul.mubr.bf16.gmra.mrb[28].mxu0 %v7961_v43  ;;  %1555 = vmatpush1.bf16.msra.mxu1 %v6572_v1  ;;  %v859_v1 = vrot.slane %v857_v40, 7  ;;  %v8053_v13 = vrot.slane %v2315_v60, 7  ;;  %v847_v40 = vrot.slane %v845_v8, 7  ;;  %v2330_v8 = vshll.u32 %v7952_v35, 16 }
 0x217   : > { %3596 = vmatpush1.bf16.msra.mxu0 %v6575_v7  ;;  %1556 = vmatprep.subr.bf16.mxu1 %v6580_v21  ;;  %v3212_v7 = vrot.slane %v3210_v47, 1  ;;  %v6590_v21 = vld [vmem:[#allocation14 + $0x210] ss:$8 sps:$4 sm:$0xff]   ;;  %v3196_v47 = vor.u32 %v3195_v63, %v2279_v6 }
 0x218   : > { %3597 = vmatprep.subr.bf16.mxu0 %v6583_v45  ;;  %1558 = vmatprep.mubr.bf16.mxu1 %v843_v32  ;;  %v6593_v45 = vld [vmem:[#allocation14 + $0x610] ss:$8 sps:$4 sm:$0xff]   ;;  %v867_v28 = vsel %vm819_vm0, %v859_v1, %v8044_v3  ;;  %v881_v32 = vshrl.u32 %v796_v30, 16  ;;  %v3222_v1 = vshll.u32 %v3144_v57, 16  ;;  %v6611_v57 = vld [vmem:[#allocation14 + $0x640] ss:$8 sps:$4 sm:$0xff]  }
 0x219   : > { %3599 = vmatprep.mubr.bf16.mxu0 %v3189_v34  ;;  %v3213_v31 = vsel %vm1671_vm1, %v3208_v2, %v3212_v7  ;;  %v3234_v34 = vshll.u32 %v3145_v11, 16  ;;  %v3201_v58 = vsel %vm1671_vm1, %v3196_v47, %v3200_v50  ;;  %v3149_v2 = vld [vmem:[#allocation2 + $0xe8] sm:$0x1]  ;;  %v2339_v7 = vshrl.u32 %v7948_v29, 16  ;;  %v6605_v30 = vld [vmem:[#allocation14 + $0x630] ss:$8 sps:$4 sm:$0xff]  }
 0x21a   : > { %1557 = vmatpush1.bf16.msra.mxu1 %v6578_v26  ;;  %v3231_v26 = vrot.slane %v2318_v22, 1  ;;  %v883_v6 = vrot.slane %v881_v32, 7  ;;  %v2327_v47 = vshrl.u32 %v7952_v35, 16  ;;  %v2366_v50 = vshll.u32 %v7956_v41, 16 }
 0x21b   : > { %3598 = vmatpush1.bf16.msra.mxu0 %v6581_v14  ;;  %2073 = vmatprep.subr.bf16.mxu1 %v6586_v36  ;;  %v6598_v14 = vld [vmem:[#allocation14 + $0x224] ss:$8 sps:$4 sm:$0xff]   ;;  %v8064_v36 = vor.u32 %v2258_v23, %v8010_v37  ;;  %v2342_v23 = vshll.u32 %v7948_v29, 16  ;;  %v6596_v37 = vld [vmem:[#allocation14 + $0x220] ss:$8 sps:$4 sm:$0xff]   ;;  %v2341_v32 = vrot.slane %v2339_v7, 7 }
 0x21c   : > { %4146 = vmatprep.subr.bf16.mxu0 %v6589_v55  ;;  %v795_v55 = vld [vmem:[#allocation2 + $0x60] sm:$0x80]  ;;  %v3232_v63 = vor.u32 %v3231_v26, %v2315_v60  ;;  %v6604_v60 = vld [vmem:[#allocation14 + $0x234] ss:$8 sps:$4 sm:$0xff]   ;;  %v2378_v29 = vshll.u32 %v7988_v5, 16 }
 0x21d   : > { %1559 = vmatmul.mubr.bf16.vlgmr.msra.gmra.mrb[0].mxu1 %v831_v9  ;;  %v855_v10 = vsel %vm819_vm0, %v847_v40, %v8064_v36  ;;  %v869_v0 = vshrl.u32 %v795_v55, 16  ;;  %v6607_v9 = vld [vmem:[#allocation14 + $0x634] ss:$8 sps:$4 sm:$0xff]   ;;  %v3255_v11 = vrot.slane %v2342_v23, 1  ;;  %v3148_v40 = vld [vmem:[#allocation2 + $0xe0] sm:$0x1] }
 0x21e   : > { %3600 = vmatmul.mubr.bf16.vlgmr.msra.gmra.mrb[0].mxu0 %v3177_v46  ;;  %2074 = vmatpush1.bf16.msra.mxu1 %v6584_v27  ;;  %v3236_v27 = vrot.slane %v3234_v34, 1  ;;  %v8084_v46 = vor.u32 %v2282_v19, %v2281_v16  ;;  %v3224_v16 = vrot.slane %v3222_v1, 1  ;;  %v799_v34 = vld [vmem:[#allocation2 + $0x90] sm:$0x80]  ;;  %v3243_v55 = vrot.slane %v2330_v8, 1 }
 0x21f   : > { %4147 = vmatpush1.bf16.msra.mxu0 %v6587_v33  ;;  %2075 = vmatprep.subr.bf16.mxu1 %v6592_v44  ;;  %v3219_v33 = vrot.slane %v2306_v38, 1  ;;  %v800_v44 = vld [vmem:[#allocation2 + $0x98] sm:$0x80]  ;;  %v871_v15 = vrot.slane %v869_v0, 7  ;;  %v2363_v0 = vshrl.u32 %v7956_v41, 16 }
 0x220   : > { %4148 = vmatprep.subr.bf16.mxu0 %v6595_v18  ;;  %1568 = vmatprep.mubr.bf16.mxu1 %v867_v28  ;;  %v891_v18 = vsel %vm819_vm0, %v883_v6, %v8072_v4  ;;  %v905_v26 = vshrl.u32 %v800_v44, 16  ;;  %v3258_v28 = vshll.u32 %v3149_v2, 16  ;;  %v3246_v44 = vshll.u32 %v3148_v40, 16  ;;  %v6614_v1 = vld [vmem:[#allocation14 + $0x250] ss:$8 sps:$4 sm:$0xff]  }
 0x221   : > { %3609 = vmatprep.mubr.bf16.mxu0 %v3213_v31  ;;  %v2305_v31 = vrot.slane %v2303_v53, 7  ;;  %v3220_v19 = vor.u32 %v3219_v33, %v2303_v53  ;;  %v8098_v53 = vor.u32 %v2318_v22, %v8053_v13  ;;  %v893_v33 = vshrl.u32 %v799_v34, 16  ;;  %v6619_v22 = vld [vmem:[#allocation14 + $0x654] ss:$8 sps:$4 sm:$0xff]   ;;  %v6617_v2 = vld [vmem:[#allocation14 + $0x650] ss:$8 sps:$4 sm:$0xff]  }
 0x222   : > { %2076 = vmatpush1.bf16.msra.mxu1 %v6590_v21  ;;  %v3237_v21 = vsel %vm1671_vm1, %v3232_v63, %v3236_v27  ;;  %v3260_v6 = vrot.slane %v3258_v28, 1  ;;  %v879_v63 = vsel %vm819_vm0, %v871_v15, %v8084_v46  ;;  %v2354_v13 = vshll.u32 %v7976_v56, 16  ;;  %v6625_v28 = vld [vmem:[#allocation14 + $0x664] ss:$8 sps:$4 sm:$0xff]  }
 0x223   : > { %4149 = vmatpush1.bf16.msra.mxu0 %v6593_v45  ;;  %2077 = vmatprep.subr.bf16.mxu1 %v6598_v14  ;;  %v6610_v45 = vld [vmem:[#allocation14 + $0x244] ss:$8 sps:$4 sm:$0xff]   ;;  %v3225_v27 = vsel %vm1671_vm1, %v3220_v19, %v3224_v16  ;;  %v2329_v15 = vrot.slane %v2327_v47, 7  ;;  %v3152_v16 = vld [vmem:[#allocation2 + $0x110] sm:$0x1]  ;;  %v2351_v34 = vshrl.u32 %v7976_v56, 16 }
 0x224   : > { %4150 = vmatprep.subr.bf16.mxu0 %v6601_v51  ;;  %v6613_v14 = vld [vmem:[#allocation14 + $0x644] ss:$8 sps:$4 sm:$0xff]   ;;  %v6608_v51 = vld [vmem:[#allocation14 + $0x240] ss:$8 sps:$4 sm:$0xff]   ;;  %v2390_v40 = vshll.u32 %v7984_v62, 16  ;;  %v3267_v25 = vrot.slane %v2354_v13, 1 }
 0x225   : > { %1569 = vmatmul.mubr.bf16.gmra.mrb[4].mxu1 %v855_v10  ;;  %v804_v10 = vld [vmem:[#allocation2 + $0xc8] sm:$0x80]  ;;  %v803_v19 = vld [vmem:[#allocation2 + $0xc0] sm:$0x80]  ;;  %v6644_v56 = vld [vmem:[#allocation14 + $0x2a0] ss:$8 sps:$4 sm:$0xff]  }
 0x226   : > { %3610 = vmatmul.mubr.bf16.gmra.mrb[4].mxu0 %v3201_v58  ;;  %2078 = vmatpush1.bf16.msra.mxu1 %v6596_v37  ;;  %v907_v37 = vrot.slane %v905_v26, 7  ;;  %v3153_v58 = vld [vmem:[#allocation2 + $0x118] sm:$0x1]  ;;  %v3248_v26 = vrot.slane %v3246_v44, 1  ;;  %v8125_v44 = vrot.slane %v2351_v34, 7 }
 0x227   : > { %4151 = vmatpush1.bf16.msra.mxu0 %v6599_v61  ;;  %2079 = vmatprep.subr.bf16.mxu1 %v6604_v60  ;;  %v3256_v61 = vor.u32 %v3255_v11, %v2339_v7  ;;  %v3279_v7 = vrot.slane %v2366_v50, 1  ;;  %v3282_v11 = vshll.u32 %v3153_v58, 16  ;;  %v6626_v58 = vld [vmem:[#allocation14 + $0x270] ss:$8 sps:$4 sm:$0xff]  }
 0x228   : > { %4152 = vmatprep.subr.bf16.mxu0 %v6607_v9  ;;  %1578 = vmatprep.mubr.bf16.mxu1 %v891_v18  ;;  %v915_v60 = vsel %vm819_vm0, %v907_v37, %v8098_v53  ;;  %v8112_v18 = vor.u32 %v2306_v38, %v2305_v31  ;;  %v8120_v38 = vor.u32 %v2342_v23, %v2341_v32  ;;  %v6620_v31 = vld [vmem:[#allocation14 + $0x260] ss:$8 sps:$4 sm:$0xff]   ;;  %v6628_v23 = vld [vmem:[#allocation14 + $0x274] ss:$8 sps:$4 sm:$0xff]  }
 0x229   : > { %3619 = vmatprep.mubr.bf16.mxu0 %v3237_v21  ;;  %v3261_v9 = vsel %vm1671_vm1, %v3256_v61, %v3260_v6  ;;  %v895_v21 = vrot.slane %v893_v33, 7  ;;  %v917_v6 = vshrl.u32 %v803_v19, 16  ;;  %v3157_v33 = vld [vmem:[#allocation2 + $0x148] sm:$0x1]  ;;  %v6631_v32 = vld [vmem:[#allocation14 + $0x674] ss:$8 sps:$4 sm:$0xff]  }
 0x22a   : > { %2080 = vmatpush1.bf16.msra.mxu1 %v6602_v17  ;;  %v6622_v17 = vld [vmem:[#allocation14 + $0x264] ss:$8 sps:$4 sm:$0xff]   ;;  %v3291_v19 = vrot.slane %v2378_v29, 1 }
 0x22b   : > { %4153 = vmatpush1.bf16.msra.mxu0 %v6605_v30  ;;  %2081 = vmatprep.subr.bf16.mxu1 %v6610_v45  ;;  %v929_v30 = vshrl.u32 %v804_v10, 16  ;;  %v3244_v45 = vor.u32 %v3243_v55, %v2327_v47  ;;  %v6623_v47 = vld [vmem:[#allocation14 + $0x660] ss:$8 sps:$4 sm:$0xff]   ;;  %v3280_v55 = vor.u32 %v3279_v7, %v2363_v0  ;;  %v903_v37 = vsel %vm819_vm0, %v895_v21, %v8112_v18  ;;  %v6637_v21 = vld [vmem:[#allocation14 + $0x684] ss:$8 sps:$4 sm:$0xff]  }
 0x22c   : > { %4154 = vmatprep.subr.bf16.mxu0 %v6613_v14  ;;  %v2365_v14 = vrot.slane %v2363_v0, 7  ;;  %v2387_v10 = vshrl.u32 %v7984_v62, 16  ;;  %v3303_v0 = vrot.slane %v2390_v40, 1 }
 0x22d   : > { %1579 = vmatmul.mubr.bf16.gmra.mrb[8].mxu1 %v879_v63  ;;  %v3249_v61 = vsel %vm1671_vm1, %v3244_v45, %v3248_v26  ;;  %v3270_v63 = vshll.u32 %v3152_v16, 16  ;;  %v807_v45 = vld [vmem:[#allocation2 + $0xf0] sm:$0x80]  ;;  %v2375_v26 = vshrl.u32 %v7988_v5, 16  ;;  %v6635_v16 = vld [vmem:[#allocation14 + $0x680] ss:$8 sps:$4 sm:$0xff]  }
 0x22e   : > { %3620 = vmatmul.mubr.bf16.gmra.mrb[8].mxu0 %v3225_v27  ;;  %2082 = vmatpush1.bf16.msra.mxu1 %v6608_v51  ;;  %v931_v51 = vrot.slane %v929_v30, 7  ;;  %v808_v27 = vld [vmem:[#allocation2 + $0xf8] sm:$0x80]  ;;  %v3268_v30 = vor.u32 %v3267_v25, %v2351_v34  ;;  %v8143_v35 = vor.u32 %v2366_v50, %v2365_v14  ;;  %v3304_v25 = vor.u32 %v3303_v0, %v2387_v10  ;;  %v812_v50 = vld [vmem:[#allocation2 + $0x128] sm:$0x80] }
 0x22f   : > { %4155 = vmatpush1.bf16.msra.mxu0 %v6611_v57  ;;  %2083 = vmatprep.subr.bf16.mxu1 %v6616_v20  ;;  %v3284_v57 = vrot.slane %v3282_v11, 1  ;;  %v6629_v20 = vld [vmem:[#allocation14 + $0x670] ss:$8 sps:$4 sm:$0xff]   ;;  %v953_v7 = vshrl.u32 %v808_v27, 16  ;;  %v3272_v11 = vrot.slane %v3270_v63, 1  ;;  %v2411_v63 = vshrl.u32 %v7993_v12, 16 }
 0x230   : > { %4156 = vmatprep.subr.bf16.mxu0 %v6619_v22  ;;  %1588 = vmatprep.mubr.bf16.mxu1 %v915_v60  ;;  %v939_v22 = vsel %vm819_vm0, %v931_v51, %v8120_v38  ;;  %v3306_v60 = vshll.u32 %v3157_v33, 16  ;;  %v3161_v14 = vld [vmem:[#allocation2 + $0x178] sm:$0x1]  ;;  %v2399_v27 = vshrl.u32 %v8003_v24, 16  ;;  %v2402_v33 = vshll.u32 %v8003_v24, 16 }
 0x231   : > { %3629 = vmatprep.mubr.bf16.mxu0 %v3261_v9  ;;  %v8136_v9 = vor.u32 %v2330_v8, %v2329_v15  ;;  %v2414_v8 = vshll.u32 %v7993_v12, 16  ;;  %v6632_v15 = vld [vmem:[#allocation14 + $0x280] ss:$8 sps:$4 sm:$0xff]   ;;  %v955_v34 = vrot.slane %v953_v7, 7  ;;  %v6646_v7 = vld [vmem:[#allocation14 + $0x2a4] ss:$8 sps:$4 sm:$0xff]  }
 0x232   : > { %2084 = vmatpush1.bf16.msra.mxu1 %v6614_v1  ;;  %v3285_v1 = vsel %vm1671_vm1, %v3280_v55, %v3284_v57  ;;  %v3273_v55 = vsel %vm1671_vm1, %v3268_v30, %v3272_v11  ;;  %v2389_v57 = vrot.slane %v2387_v10, 7  ;;  %v6649_v30 = vld [vmem:[#allocation14 + $0x6a4] ss:$8 sps:$4 sm:$0xff]  }
 0x233   : > { %4157 = vmatpush1.bf16.msra.mxu0 %v6617_v2  ;;  %2085 = vmatprep.subr.bf16.mxu1 %v6622_v17  ;;  %v6634_v2 = vld [vmem:[#allocation14 + $0x284] ss:$8 sps:$4 sm:$0xff]   ;;  %v919_v17 = vrot.slane %v917_v6, 7  ;;  %v6643_v6 = vld [vmem:[#allocation14 + $0x694] ss:$8 sps:$4 sm:$0xff]   ;;  %v963_v10 = vsel %vm819_vm0, %v955_v34, %v8143_v35 }
 0x234   : > { %4158 = vmatprep.subr.bf16.mxu0 %v6625_v28  ;;  %v3156_v28 = vld [vmem:[#allocation2 + $0x140] sm:$0x1]  ;;  %v811_v11 = vld [vmem:[#allocation2 + $0x120] sm:$0x80] }
 0x235   : > { %1589 = vmatmul.mubr.bf16.gmra.mrb[12].mxu1 %v903_v37  ;;  %v927_v51 = vsel %vm819_vm0, %v919_v17, %v8136_v9  ;;  %v3294_v41 = vshll.u32 %v3156_v28, 16  ;;  %v2377_v37 = vrot.slane %v2375_v26, 7 }
 0x236   : > { %3630 = vmatmul.mubr.bf16.gmra.mrb[12].mxu0 %v3249_v61  ;;  %2086 = vmatpush1.bf16.msra.mxu1 %v6620_v31  ;;  %v3308_v31 = vrot.slane %v3306_v60, 1  ;;  %v6640_v61 = vld [vmem:[#allocation14 + $0x294] ss:$8 sps:$4 sm:$0xff]   ;;  %v3292_v60 = vor.u32 %v3291_v19, %v2375_v26  ;;  %v3315_v26 = vrot.slane %v2402_v33, 1 }
 0x237   : > { %4159 = vmatpush1.bf16.msra.mxu0 %v6623_v47  ;;  %2087 = vmatprep.subr.bf16.mxu1 %v6628_v23  ;;  %v941_v47 = vshrl.u32 %v807_v45, 16  ;;  %v3327_v23 = vrot.slane %v2414_v8, 1  ;;  %v3296_v17 = vrot.slane %v3294_v41, 1  ;;  %v8164_v45 = vor.u32 %v2390_v40, %v2389_v57 }
 0x238   : > { %4160 = vmatprep.subr.bf16.mxu0 %v6631_v32  ;;  %1598 = vmatprep.mubr.bf16.mxu1 %v939_v22  ;;  %v6638_v32 = vld [vmem:[#allocation14 + $0x290] ss:$8 sps:$4 sm:$0xff]   ;;  %v3309_v0 = vsel %vm1671_vm1, %v3304_v25, %v3308_v31  ;;  %v3330_v22 = vshll.u32 %v3161_v14, 16  ;;  %v965_v40 = vshrl.u32 %v811_v11, 16  ;;  %v3165_v25 = vld [vmem:[#allocation2 + $0x1a8] sm:$0x1] }
 0x239   : > { %3639 = vmatprep.mubr.bf16.mxu0 %v3285_v1  ;;  %v8160_v1 = vor.u32 %v2354_v13, %v8125_v44  ;;  %v6647_v13 = vld [vmem:[#allocation14 + $0x6a0] ss:$8 sps:$4 sm:$0xff]   ;;  %v816_v44 = vld [vmem:[#allocation2 + $0x158] sm:$0x80]  ;;  %v3297_v62 = vsel %vm1671_vm1, %v3292_v60, %v3296_v17  ;;  %v6653_v14 = vld [vmem:[#allocation14 + $0x6b0] ss:$8 sps:$4 sm:$0xff]  }
 0x23a   : > { %2088 = vmatpush1.bf16.msra.mxu1 %v6626_v58  ;;  %v6641_v58 = vld [vmem:[#allocation14 + $0x690] ss:$8 sps:$4 sm:$0xff]   ;;  %v6652_v31 = vld [vmem:[#allocation14 + $0x2b4] ss:$8 sps:$4 sm:$0xff]   ;;  %v1001_v41 = vshrl.u32 %v816_v44, 16 }
 0x23b   : > { %4161 = vmatpush1.bf16.msra.mxu0 %v6629_v20  ;;  %2089 = vmatprep.subr.bf16.mxu1 %v6634_v2  ;;  %v977_v20 = vshrl.u32 %v812_v50, 16  ;;  %v943_v2 = vrot.slane %v941_v47, 7  ;;  %v6655_v47 = vld [vmem:[#allocation14 + $0x6b4] ss:$8 sps:$4 sm:$0xff]   ;;  %v6659_v60 = vld [vmem:[#allocation14 + $0x6c0] ss:$8 sps:$4 sm:$0xff]  }
 0x23c   : > { %4162 = vmatprep.subr.bf16.mxu0 %v6637_v21  ;;  %v3160_v21 = vld [vmem:[#allocation2 + $0x170] sm:$0x1]  ;;  %v8171_v50 = vld [vmem:[#allocation2 + $0x18] sm:$0xff]  ;;  %v1003_v17 = vrot.slane %v1001_v41, 7  ;;  %v3758_v41 = vshrl.u32 %v3714_v39, 16 }
 0x23d   : > { %1599 = vmatmul.mubr.bf16.gmra.mrb[16].mxu1 %v927_v51  ;;  %v979_v28 = vrot.slane %v977_v20, 7  ;;  %v951_v19 = vsel %vm819_vm0, %v943_v2, %v8160_v1  ;;  %v3318_v34 = vshll.u32 %v3160_v21, 16  ;;  %v2413_v51 = vrot.slane %v2411_v63, 7  ;;  %v6661_v20 = vld [vmem:[#allocation14 + $0x6c4] ss:$8 sps:$4 sm:$0xff]  }
 0x23e   : > { %3640 = vmatmul.mubr.bf16.gmra.mrb[16].mxu0 %v3273_v55  ;;  %2090 = vmatpush1.bf16.msra.mxu1 %v6632_v15  ;;  %v3328_v15 = vor.u32 %v3327_v23, %v2411_v63  ;;  %v6650_v55 = vld [vmem:[#allocation14 + $0x2b0] ss:$8 sps:$4 sm:$0xff]   ;;  %v3351_v23 = vrot.slane %v2438_v48, 1  ;;  %v8180_v63 = vor.u32 %v2378_v29, %v2377_v37  ;;  %v815_v2 = vld [vmem:[#allocation2 + $0x150] sm:$0x80]  ;;  %v1687_v48 = vshll.u32 %v8171_v50, 16 }
 0x23f   : > { %4163 = vmatpush1.bf16.msra.mxu0 %v6635_v16  ;;  %2091 = vmatprep.subr.bf16.mxu1 %v6640_v61  ;;  %v3332_v16 = vrot.slane %v3330_v22, 1  ;;  %v987_v57 = vsel %vm819_vm0, %v979_v28, %v8164_v45  ;;  %v8184_v22 = vld [vmem:[#allocation2 + $0x78] sm:$0xff]  ;;  %v8189_v5 = vor.u32 %v2414_v8, %v2413_v51  ;;  %v2401_v29 = vrot.slane %v2399_v27, 7  ;;  %v6656_v37 = vld [vmem:[#allocation14 + $0x2c0] ss:$8 sps:$4 sm:$0xff]   ;;  %v8198_v8 = vld [vmem:[#allocation2 + $0x10] sm:$0xff] }
 0x240   : > { %4164 = vmatprep.subr.bf16.mxu0 %v6643_v6  ;;  %1608 = vmatprep.mubr.bf16.mxu1 %v963_v10  ;;  %v6658_v6 = vld [vmem:[#allocation14 + $0x2c4] ss:$8 sps:$4 sm:$0xff]   ;;  %v3316_v10 = vor.u32 %v3315_v26, %v2399_v27  ;;  %v6664_v11 = vld [vmem:[#allocation14 + $0x2d4] ss:$8 sps:$4 sm:$0xff]   ;;  %v3352_v21 = vor.u32 %v3351_v23, %v2435_v42  ;;  %v3762_v12 = vshrl.u32 %v8184_v22, 16  ;;  %v1685_v42 = vshrl.u32 %v8171_v50, 16 }
 0x241   : > { %3649 = vmatprep.mubr.bf16.mxu0 %v3309_v0  ;;  %v3333_v61 = vsel %vm1671_vm1, %v3328_v15, %v3332_v16  ;;  %v3320_v0 = vrot.slane %v3318_v34, 1  ;;  %v6667_v28 = vld [vmem:[#allocation14 + $0x6d4] ss:$8 sps:$4 sm:$0xff]   ;;  %v989_v15 = vshrl.u32 %v815_v2, 16  ;;  %v6665_v34 = vld [vmem:[#allocation14 + $0x6d0] ss:$8 sps:$4 sm:$0xff]  }
 0x242   : > { %2092 = vmatpush1.bf16.msra.mxu1 %v6638_v32  ;;  %v3354_v32 = vshll.u32 %v3165_v25, 16  ;;  %v1011_v25 = vsel %vm819_vm0, %v1003_v17, %v8189_v5  ;;  %v3764_v50 = vrot.slane %v3762_v12, 7  ;;  %v3765_v24 = vshll.u32 %v8184_v22, 16  ;;  %v6668_v2 = vld [vmem:[#allocation14 + $0x2e0] ss:$8 sps:$4 sm:$0xff]  }
 0x243   : > { %4165 = vmatpush1.bf16.msra.mxu0 %v6641_v58  ;;  %2093 = vmatprep.subr.bf16.mxu1 %v6646_v7  ;;  %v967_v58 = vrot.slane %v965_v40, 7  ;;  %v3164_v7 = vld [vmem:[#allocation2 + $0x1a0] sm:$0x1]  ;;  %v3321_v44 = vsel %vm1671_vm1, %v3316_v10, %v3320_v0  ;;  %v6662_v40 = vld [vmem:[#allocation14 + $0x2d0] ss:$8 sps:$4 sm:$0xff]  }
 0x244   : > { %4166 = vmatprep.subr.bf16.mxu0 %v6649_v30  ;;  %v1642_v30 = vld [vmem:[#allocation2 + $0x28] sm:$0x1]  ;;  %v3342_v16 = vshll.u32 %v3164_v7, 16  ;;  %v3767_v17 = vor.u32 %v3765_v24, %v3764_v50 }
 0x245   : > { %1609 = vmatmul.mubr.bf16.gmra.mrb[20].mxu1 %v951_v19  ;;  %v975_v27 = vsel %vm819_vm0, %v967_v58, %v8180_v63  ;;  %v1692_v26 = vshll.u32 %v1642_v30, 16  ;;  %v8204_v19 = vld [vmem:[#allocation2 + $0x70] sm:$0xff]  ;;  %v6673_v58 = vld [vmem:[#allocation14 + $0x6e4] ss:$8 sps:$4 sm:$0xff]   ;;  %v6671_v7 = vld [vmem:[#allocation14 + $0x6e0] ss:$8 sps:$4 sm:$0xff]  }
 0x246   : > { %3650 = vmatmul.mubr.bf16.gmra.mrb[20].mxu0 %v3297_v62  ;;  %2094 = vmatpush1.bf16.msra.mxu1 %v6644_v56  ;;  %v3356_v56 = vrot.slane %v3354_v32, 1  ;;  %v8208_v62 = vor.u32 %v2402_v33, %v2401_v29  ;;  %v8217_v33 = vld [vmem:[#allocation2 + $0x48] sm:$0xff]  ;;  %v3750_v23 = vshrl.u32 %v8204_v19, 16  ;;  %v6676_v29 = vld [vmem:[#allocation14 + $0x2f4] ss:$8 sps:$4 sm:$0xff]  }
 0x247   : > { %4167 = vmatpush1.bf16.msra.mxu0 %v6647_v13  ;;  %2095 = vmatprep.subr.bf16.mxu1 %v6652_v31  ;;  %v3339_v13 = vrot.slane %v2426_v54, 1  ;;  %v1689_v54 = vrot.slane %v1687_v48, 1  ;;  %v1641_v31 = vld [vmem:[#allocation2 + $0x20] sm:$0x1]  ;;  %v8222_v32 = vld [vmem:[#allocation2 + $0xa8] sm:$0xff]  ;;  %v1694_v0 = vrot.slane %v1692_v26, 1 }
 0x248   : > { %4168 = vmatprep.subr.bf16.mxu0 %v6655_v47  ;;  %1618 = vmatprep.mubr.bf16.mxu1 %v987_v57  ;;  %v1675_v47 = vshll.u32 %v8198_v8, 16  ;;  %v3357_v51 = vsel %vm1671_vm1, %v3352_v21, %v3356_v56  ;;  %v1673_v48 = vshrl.u32 %v8198_v8, 16  ;;  %v3786_v21 = vshrl.u32 %v8222_v32, 16  ;;  %v8229_v56 = vld [vmem:[#allocation2 + $0x40] sm:$0xff]  ;;  %v6677_v26 = vld [vmem:[#allocation14 + $0x6f0] ss:$8 sps:$4 sm:$0xff]  }
 0x249   : > { %3659 = vmatprep.mubr.bf16.mxu0 %v3333_v61  ;;  %v3340_v57 = vor.u32 %v3339_v13, %v2423_v49  ;;  %v3344_v61 = vrot.slane %v3342_v16, 1  ;;  %v1690_v10 = vor.u32 %v1689_v54, %v1685_v42  ;;  %v1711_v49 = vshll.u32 %v8217_v33, 16  ;;  %v8239_v42 = vld [vmem:[#allocation2 + $0xa0] sm:$0xff]  ;;  %v6674_v54 = vld [vmem:[#allocation14 + $0x2f0] ss:$8 sps:$4 sm:$0xff]  }
 0x24a   : > { %2096 = vmatpush1.bf16.msra.mxu1 %v6650_v55  ;;  %v6670_v55 = vld [vmem:[#allocation14 + $0x2e4] ss:$8 sps:$4 sm:$0xff]   ;;  %v1677_v43 = vrot.slane %v1675_v47, 1  ;;  %v1709_v39 = vshrl.u32 %v8217_v33, 16  ;;  %v1699_v47 = vshll.u32 %v8229_v56, 16  ;;  %v3788_v50 = vrot.slane %v3786_v21, 7 }
 0x24b   : > { %4169 = vmatpush1.bf16.msra.mxu0 %v6653_v14  ;;  %2097 = vmatprep.subr.bf16.mxu1 %v6658_v6  ;;  %v991_v14 = vrot.slane %v989_v15, 7  ;;  %v3713_v6 = vld [vmem:[#allocation2 + $0x60] sm:$0x80]  ;;  %v3345_v8 = vsel %vm1671_vm1, %v3340_v57, %v3344_v61  ;;  %v1695_v15 = vsel %vm1671_vm1, %v1690_v10, %v1694_v0  ;;  %v3789_v33 = vshll.u32 %v8222_v32, 16  ;;  %v3717_v0 = vld [vmem:[#allocation2 + $0x90] sm:$0x80] }
 0x24c   : > { %4170 = vmatprep.subr.bf16.mxu0 %v6661_v20  ;;  %v1680_v20 = vshll.u32 %v1641_v31, 16  ;;  %v3746_v30 = vshrl.u32 %v3713_v6, 16  ;;  %v1645_v31 = vld [vmem:[#allocation2 + $0x50] sm:$0x1]  ;;  %v6685_v61 = vld [vmem:[#allocation14 + $0x704] ss:$8 sps:$4 sm:$0xff]  }
 0x24d   : > { %1619 = vmatmul.mubr.bf16.gmra.mrb[24].mxu1 %v975_v27  ;;  %v999_v13 = vsel %vm819_vm0, %v991_v14, %v8208_v62  ;;  %v3752_v27 = vrot.slane %v3750_v23, 7  ;;  %v3774_v6 = vshrl.u32 %v8239_v42, 16  ;;  %v1704_v10 = vshll.u32 %v1645_v31, 16 }
 0x24e   : > { %3660 = vmatmul.mubr.bf16.gmra.mrb[24].mxu0 %v3321_v44  ;;  %2098 = vmatpush1.bf16.msra.mxu1 %v6656_v37  ;;  %v6679_v37 = vld [vmem:[#allocation14 + $0x6f4] ss:$8 sps:$4 sm:$0xff]   ;;  %v3753_v44 = vshll.u32 %v8204_v19, 16  ;;  %v1682_v16 = vrot.slane %v1680_v20, 1  ;;  %v3748_v14 = vrot.slane %v3746_v30, 7  ;;  %v1737_v20 = vrot.slane %v3765_v24, 1 }
 0x24f   : > { %4171 = vmatpush1.bf16.msra.mxu0 %v6659_v60  ;;  %2099 = vmatprep.subr.bf16.mxu1 %v6664_v11  ;;  %v3760_v60 = vrot.slane %v3758_v41, 7  ;;  %v1646_v11 = vld [vmem:[#allocation2 + $0x58] sm:$0x1] }
 0x250   : > { %4172 = vmatprep.subr.bf16.mxu0 %v6667_v28  ;;  %1628 = vmatprep.mubr.bf16.mxu1 %v1011_v25  ;;  %v3718_v28 = vld [vmem:[#allocation2 + $0x98] sm:$0x80]  ;;  %v1716_v25 = vshll.u32 %v1646_v11, 16  ;;  %v3755_v57 = vor.u32 %v3753_v44, %v3752_v27  ;;  %v3770_v27 = vshrl.u32 %v3717_v0, 16  ;;  %v6694_v0 = vld [vmem:[#allocation14 + $0x324] ss:$8 sps:$4 sm:$0xff]  }
 0x251   : > { %3669 = vmatprep.mubr.bf16.mxu0 %v3357_v51  ;;  %v3768_v51 = vsel %vm819_vm0, %v3760_v60, %v3767_v17  ;;  %v3782_v41 = vshrl.u32 %v3718_v28, 16  ;;  %v1701_v60 = vrot.slane %v1699_v47, 1  ;;  %v1650_v17 = vld [vmem:[#allocation2 + $0x88] sm:$0x1]  ;;  %v6688_v11 = vld [vmem:[#allocation14 + $0x314] ss:$8 sps:$4 sm:$0xff]  }
 0x252   : > { %2100 = vmatpush1.bf16.msra.mxu1 %v6662_v40  ;;  %v1678_v40 = vor.u32 %v1677_v43, %v1673_v48  ;;  %v1718_v43 = vrot.slane %v1716_v25, 1  ;;  %v3777_v28 = vshll.u32 %v8239_v42, 16 }
 0x253   : > { %4173 = vmatpush1.bf16.msra.mxu0 %v6665_v34  ;;  %2101 = vmatprep.subr.bf16.mxu1 %v6670_v55  ;;  %v1713_v34 = vrot.slane %v1711_v49, 1  ;;  %v6682_v55 = vld [vmem:[#allocation14 + $0x304] ss:$8 sps:$4 sm:$0xff]   ;;  %v1697_v49 = vshrl.u32 %v8229_v56, 16  ;;  %v3776_v56 = vrot.slane %v3774_v6, 7 }
 0x254   : > { %4174 = vmatprep.subr.bf16.mxu0 %v6673_v58  ;;  %v8249_v58 = vld [vmem:[#allocation2 + $0xd8] sm:$0xff]  ;;  %v1683_v30 = vsel %vm1671_vm1, %v1678_v40, %v1682_v16  ;;  %v1740_v40 = vshll.u32 %v1650_v17, 16  ;;  %v1725_v17 = vrot.slane %v3753_v44, 1 }
 0x255   : > { %1629 = vmatmul.mubr.bf16.gmra.mrb[28].mxu1 %v999_v13  ;;  %v1714_v48 = vor.u32 %v1713_v34, %v1709_v39  ;;  %v3722_v13 = vld [vmem:[#allocation2 + $0xc8] sm:$0x80]  ;;  %v3810_v24 = vshrl.u32 %v8249_v58, 16  ;;  %v6691_v16 = vld [vmem:[#allocation14 + $0x714] ss:$8 sps:$4 sm:$0xff]   ;;  %v1706_v39 = vrot.slane %v1704_v10, 1  ;;  %v1702_v31 = vor.u32 %v1701_v60, %v1697_v49 }
 0x256   : > { %3670 = vmatmul.mubr.bf16.gmra.mrb[28].mxu0 %v3345_v8  ;;  %2102 = vmatpush1.bf16.msra.mxu1 %v6668_v2  ;;  %v6680_v2 = vld [vmem:[#allocation14 + $0x300] ss:$8 sps:$4 sm:$0xff]   ;;  %v3756_v8 = vsel %vm819_vm0, %v3748_v14, %v3755_v57  ;;  %v8264_v34 = vld [vmem:[#allocation2 + $0xd0] sm:$0xff]  ;;  %v3806_v47 = vshrl.u32 %v3722_v13, 16  ;;  %v6697_v60 = vld [vmem:[#allocation14 + $0x724] ss:$8 sps:$4 sm:$0xff]  }
 0x257   : > { %4175 = vmatpush1.bf16.msra.mxu0 %v6671_v7  ;;  %2103 = vmatprep.subr.bf16.mxu1 %v6676_v29  ;;  %v6683_v7 = vld [vmem:[#allocation14 + $0x700] ss:$8 sps:$4 sm:$0xff]   ;;  %v3784_v29 = vrot.slane %v3782_v41, 7  ;;  %v1719_v25 = vsel %vm1671_vm1, %v1714_v48, %v1718_v43  ;;  %v6689_v10 = vld [vmem:[#allocation14 + $0x710] ss:$8 sps:$4 sm:$0xff]   ;;  %v3772_v48 = vrot.slane %v3770_v27, 7  ;;  %v3779_v43 = vor.u32 %v3777_v28, %v3776_v56 }
 0x258   : > { %4176 = vmatprep.subr.bf16.mxu0 %v6679_v37  ;;  %2105 = vmatprep.mubr.bf16.mxu1 %v1695_v15  ;;  %v3791_v37 = vor.u32 %v3789_v33, %v3788_v50  ;;  %v8262_v15 = vld [vmem:[#allocation2 + $0x138] sm:$0xff]  ;;  %v1649_v41 = vld [vmem:[#allocation2 + $0x80] sm:$0x1]  ;;  %v3812_v50 = vrot.slane %v3810_v24, 7  ;;  %v8272_v14 = vld [vmem:[#allocation2 + $0x108] sm:$0xff]  ;;  %v8823_v49 = vshrl.u32 %v8264_v34, 16 }
 0x259   : > { %4178 = vmatprep.mubr.bf16.mxu0 %v3768_v51  ;;  %v3813_v51 = vshll.u32 %v8249_v58, 16  ;;  %v3858_v57 = vshrl.u32 %v8262_v15, 16  ;;  %v6695_v13 = vld [vmem:[#allocation14 + $0x720] ss:$8 sps:$4 sm:$0xff]   ;;  %v1654_v27 = vld [vmem:[#allocation2 + $0xb8] sm:$0x1]  ;;  %v3780_v22 = vsel %vm819_vm0, %v3772_v48, %v3779_v43 }
 0x25a   : > { %2104 = vmatpush1.bf16.msra.mxu1 %v6674_v54  ;;  %v8824_v54 = vshll.u32 %v8262_v15, 16  ;;  %v8826_v56 = vshrl.u32 %v8272_v14, 16  ;;  %v6700_v44 = vld [vmem:[#allocation14 + $0x334] ss:$8 sps:$4 sm:$0xff]  }
 0x25b   : > { %4177 = vmatpush1.bf16.msra.mxu0 %v6677_v26  ;;  %2651 = vmatprep.subr.bf16.mxu1 %v6682_v55  ;;  %v6686_v26 = vld [vmem:[#allocation14 + $0x310] ss:$8 sps:$4 sm:$0xff]   ;;  %v3792_v55 = vsel %vm819_vm0, %v3784_v29, %v3791_v37  ;;  %v3721_v29 = vld [vmem:[#allocation2 + $0xc0] sm:$0x80] }
 0x25c   : > { %4484 = vmatprep.subr.bf16.mxu0 %v6685_v61  ;;  %v4774_v61 = vrot.slane %v8824_v54, 1  ;;  %v8304_v54 = vld [vmem:[#allocation2 + $0x130] sm:$0xff] }
 0x25d   : > { %2106 = vmatmul.mubr.bf16.vlgmr.msra.gmra.mrb[0].mxu1 %v1683_v30  ;;  %v1728_v30 = vshll.u32 %v1649_v41, 16  ;;  %v3808_v41 = vrot.slane %v3806_v47, 7  ;;  %v8296_v47 = vld [vmem:[#allocation2 + $0x100] sm:$0xff] }
 0x25e   : > { %4179 = vmatmul.mubr.bf16.vlgmr.msra.gmra.mrb[0].mxu0 %v3756_v8  ;;  %2652 = vmatpush1.bf16.msra.mxu1 %v6680_v2  ;;  %v8282_v37 = vor.u32 %v4774_v61, %v3858_v57  ;;  %v1707_v2 = vsel %vm1671_vm1, %v1702_v31, %v1706_v39  ;;  %v1742_v8 = vrot.slane %v1740_v40, 1  ;;  %v3815_v61 = vor.u32 %v3813_v51, %v3812_v50  ;;  %v1653_v31 = vld [vmem:[#allocation2 + $0xb0] sm:$0x1] }
 0x25f   : > { %4485 = vmatpush1.bf16.msra.mxu0 %v6683_v7  ;;  %2653 = vmatprep.subr.bf16.mxu1 %v6688_v11  ;;  %v6692_v7 = vld [vmem:[#allocation14 + $0x320] ss:$8 sps:$4 sm:$0xff]   ;;  %v1738_v11 = vor.u32 %v3762_v12, %v1737_v20  ;;  %v1749_v39 = vrot.slane %v3777_v28, 1  ;;  %v3794_v12 = vshrl.u32 %v3721_v29, 16  ;;  %v3800_v20 = vrot.slane %v8823_v49, 7 }
 0x260   : > { %4486 = vmatprep.subr.bf16.mxu0 %v6691_v16  ;;  %2115 = vmatprep.mubr.bf16.mxu1 %v1719_v25  ;;  %v6703_v16 = vld [vmem:[#allocation14 + $0x734] ss:$8 sps:$4 sm:$0xff]   ;;  %v1761_v25 = vrot.slane %v3789_v33, 1  ;;  %v3801_v40 = vshll.u32 %v8264_v34, 16  ;;  %v1726_v33 = vor.u32 %v3750_v23, %v1725_v17  ;;  %v1730_v50 = vrot.slane %v1728_v30, 1 }
 0x261   : > { %4188 = vmatprep.mubr.bf16.mxu0 %v3792_v55  ;;  %v3726_v55 = vld [vmem:[#allocation2 + $0xf8] sm:$0x80]  ;;  %v1764_v28 = vshll.u32 %v1654_v27, 16  ;;  %v1743_v48 = vsel %vm1671_vm1, %v1738_v11, %v1742_v8  ;;  %v3836_v29 = vrot.slane %v8826_v56, 7  ;;  %v3837_v49 = vshll.u32 %v8272_v14, 16 }
 0x262   : > { %2654 = vmatpush1.bf16.msra.mxu1 %v6686_v26  ;;  %v3725_v26 = vld [vmem:[#allocation2 + $0xf0] sm:$0x80]  ;;  %v3830_v43 = vshrl.u32 %v3726_v55, 16  ;;  %v3816_v19 = vsel %vm819_vm0, %v3808_v41, %v3815_v61  ;;  %v1752_v23 = vshll.u32 %v1653_v31, 16  ;;  %v8828_v17 = vshll.u32 %v8304_v54, 16 }
 0x263   : > { %4487 = vmatpush1.bf16.msra.mxu0 %v6689_v10  ;;  %2655 = vmatprep.subr.bf16.mxu1 %v6694_v0  ;;  %v6698_v10 = vld [vmem:[#allocation14 + $0x330] ss:$8 sps:$4 sm:$0xff]   ;;  %v6706_v30 = vld [vmem:[#allocation14 + $0x344] ss:$8 sps:$4 sm:$0xff]   ;;  %v3796_v11 = vrot.slane %v3794_v12, 7  ;;  %v3803_v8 = vor.u32 %v3801_v40, %v3800_v20  ;;  %v3818_v27 = vshrl.u32 %v3725_v26, 16  ;;  %v1762_v41 = vor.u32 %v3786_v21, %v1761_v25 }
 0x264   : > { %4488 = vmatprep.subr.bf16.mxu0 %v6697_v60  ;;  %v6701_v0 = vld [vmem:[#allocation14 + $0x730] ss:$8 sps:$4 sm:$0xff]   ;;  %v1785_v60 = vrot.slane %v3813_v51, 1  ;;  %v8825_v55 = vshrl.u32 %v8296_v47, 16  ;;  %v1766_v61 = vrot.slane %v1764_v28, 1  ;;  %v4762_v51 = vrot.slane %v8828_v17, 1 }
 0x265   : > { %2116 = vmatmul.mubr.bf16.gmra.mrb[4].mxu1 %v1707_v2  ;;  %v6709_v2 = vld [vmem:[#allocation14 + $0x744] ss:$8 sps:$4 sm:$0xff]   ;;  %v6707_v12 = vld [vmem:[#allocation14 + $0x740] ss:$8 sps:$4 sm:$0xff]   ;;  %v3832_v20 = vrot.slane %v3830_v43, 7  ;;  %v8321_v32 = vor.u32 %v3774_v6, %v1749_v39  ;;  %v1754_v31 = vrot.slane %v1752_v23, 1 }
 0x266   : > { %4189 = vmatmul.mubr.bf16.gmra.mrb[4].mxu0 %v3780_v22  ;;  %2656 = vmatpush1.bf16.msra.mxu1 %v6692_v7  ;;  %v3846_v22 = vshrl.u32 %v8304_v54, 16  ;;  %v1731_v7 = vsel %vm1671_vm1, %v1726_v33, %v1730_v50  ;;  %v1658_v21 = vld [vmem:[#allocation2 + $0xe8] sm:$0x1]  ;;  %v6715_v25 = vld [vmem:[#allocation14 + $0x754] ss:$8 sps:$4 sm:$0xff]   ;;  %v3825_v28 = vshll.u32 %v8296_v47, 16  ;;  %v3804_v50 = vsel %vm819_vm0, %v3796_v11, %v3803_v8 }
 0x267   : > { %4489 = vmatpush1.bf16.msra.mxu0 %v6695_v13  ;;  %2657 = vmatprep.subr.bf16.mxu1 %v6700_v44  ;;  %v6704_v13 = vld [vmem:[#allocation14 + $0x340] ss:$8 sps:$4 sm:$0xff]   ;;  %v3839_v44 = vor.u32 %v3837_v49, %v3836_v29  ;;  %v3730_v26 = vld [vmem:[#allocation2 + $0x128] sm:$0x80]  ;;  %v3820_v43 = vrot.slane %v3818_v27, 7  ;;  %v3824_v42 = vrot.slane %v8825_v55, 7  ;;  %v1786_v6 = vor.u32 %v3810_v24, %v1785_v60 }
 0x268   : > { %4490 = vmatprep.subr.bf16.mxu0 %v6703_v16  ;;  %2125 = vmatprep.mubr.bf16.mxu1 %v1743_v48  ;;  %v6712_v16 = vld [vmem:[#allocation14 + $0x354] ss:$8 sps:$4 sm:$0xff]   ;;  %v1773_v48 = vrot.slane %v3801_v40, 1  ;;  %v8326_v33 = vor.u32 %v4762_v51, %v3846_v22  ;;  %v1657_v39 = vld [vmem:[#allocation2 + $0xe0] sm:$0x1]  ;;  %v8333_v29 = vld [vmem:[#allocation2 + $0x168] sm:$0xff]  ;;  %v1767_v40 = vsel %vm1671_vm1, %v1762_v41, %v1766_v61 }
 0x269   : > { %4198 = vmatprep.mubr.bf16.mxu0 %v3816_v19  ;;  %v8335_v19 = vld [vmem:[#allocation2 + $0x160] sm:$0xff]  ;;  %v8340_v11 = vld [vmem:[#allocation2 + $0x198] sm:$0xff]  ;;  %v3840_v24 = vsel %vm819_vm0, %v3832_v20, %v3839_v44  ;;  %v3854_v60 = vshrl.u32 %v3730_v26, 16  ;;  %v3860_v51 = vrot.slane %v3858_v57, 7  ;;  %v3827_v57 = vor.u32 %v3825_v28, %v3824_v42 }
 0x26a   : > { %2658 = vmatpush1.bf16.msra.mxu1 %v6698_v10  ;;  %v1788_v10 = vshll.u32 %v1658_v21, 16  ;;  %v8830_v23 = vshll.u32 %v8335_v19, 16  ;;  %v6710_v8 = vld [vmem:[#allocation14 + $0x350] ss:$8 sps:$4 sm:$0xff]   ;;  %v3729_v55 = vld [vmem:[#allocation2 + $0x120] sm:$0x80] }
 0x26b   : > { %4491 = vmatpush1.bf16.msra.mxu0 %v6701_v0  ;;  %2659 = vmatprep.subr.bf16.mxu1 %v6706_v30  ;;  %v8827_v0 = vshll.u32 %v8333_v29, 16  ;;  %v6713_v27 = vld [vmem:[#allocation14 + $0x750] ss:$8 sps:$4 sm:$0xff]   ;;  %v8829_v30 = vshll.u32 %v8340_v11, 16  ;;  %v8833_v41 = vshrl.u32 %v8335_v19, 16  ;;  %v1776_v20 = vshll.u32 %v1657_v39, 16 }
 0x26c   : > { %4492 = vmatprep.subr.bf16.mxu0 %v6709_v2  ;;  %v3882_v2 = vshrl.u32 %v8333_v29, 16  ;;  %v4786_v21 = vrot.slane %v8830_v23, 1  ;;  %v8831_v44 = vshrl.u32 %v8340_v11, 16  ;;  %v6718_v26 = vld [vmem:[#allocation14 + $0x364] ss:$8 sps:$4 sm:$0xff]   ;;  %v1790_v56 = vrot.slane %v1788_v10, 1 }
 0x26d   : > { %2126 = vmatmul.mubr.bf16.gmra.mrb[8].mxu1 %v1731_v7  ;;  %v4798_v61 = vrot.slane %v8827_v0, 1  ;;  %v4822_v7 = vrot.slane %v8829_v30, 1  ;;  %v3842_v0 = vshrl.u32 %v3729_v55, 16  ;;  %v3848_v42 = vrot.slane %v3846_v22, 7  ;;  %v1662_v39 = vld [vmem:[#allocation2 + $0x118] sm:$0x1] }
 0x26e   : > { %4199 = vmatmul.mubr.bf16.gmra.mrb[8].mxu0 %v3804_v50  ;;  %2660 = vmatpush1.bf16.msra.mxu1 %v6704_v13  ;;  %v6721_v50 = vld [vmem:[#allocation14 + $0x764] ss:$8 sps:$4 sm:$0xff]   ;;  %v8361_v13 = vor.u32 %v4786_v21, %v8833_v41  ;;  %v8928_v55 = vshll.u32 %v8262_v15, 16  ;;  %v6719_v21 = vld [vmem:[#allocation14 + $0x760] ss:$8 sps:$4 sm:$0xff]   ;;  %v8929_v22 = vshrl.u32 %v8264_v34, 16 }
 0x26f   : > { %4493 = vmatpush1.bf16.msra.mxu0 %v6707_v12  ;;  %2661 = vmatprep.subr.bf16.mxu1 %v6712_v16  ;;  %v8357_v17 = vor.u32 %v4798_v61, %v3882_v2  ;;  %v6716_v12 = vld [vmem:[#allocation14 + $0x360] ss:$8 sps:$4 sm:$0xff]   ;;  %v8367_v16 = vor.u32 %v4822_v7, %v8831_v44  ;;  %v3734_v61 = vld [vmem:[#allocation2 + $0x158] sm:$0x80]  ;;  %v1809_v7 = vrot.slane %v3837_v49, 1  ;;  %v3884_v44 = vrot.slane %v3882_v2, 7 }
 0x270   : > { %4494 = vmatprep.subr.bf16.mxu0 %v6715_v25  ;;  %2135 = vmatprep.mubr.bf16.mxu1 %v1767_v40  ;;  %v3856_v25 = vrot.slane %v3854_v60, 7  ;;  %v3863_v10 = vor.u32 %v8928_v55, %v3860_v51  ;;  %v1755_v40 = vsel %vm1671_vm1, %v8321_v32, %v1754_v31  ;;  %v6724_v30 = vld [vmem:[#allocation14 + $0x374] ss:$8 sps:$4 sm:$0xff]   ;;  %v1774_v23 = vor.u32 %v8929_v22, %v1773_v48  ;;  %v6722_v31 = vld [vmem:[#allocation14 + $0x370] ss:$8 sps:$4 sm:$0xff]   ;;  %v8384_v49 = vld [vmem:[#allocation2 + $0x1c8] sm:$0xff] }
 0x271   : > { %4208 = vmatprep.mubr.bf16.mxu0 %v3840_v24  ;;  %v3828_v24 = vsel %vm819_vm0, %v3820_v43, %v3827_v57  ;;  %v8378_v60 = vld [vmem:[#allocation2 + $0x190] sm:$0xff]  ;;  %v3844_v51 = vrot.slane %v3842_v0, 7  ;;  %v8930_v57 = vshll.u32 %v8304_v54, 16  ;;  %v1812_v48 = vshll.u32 %v1662_v39, 16  ;;  %v8389_v0 = vld [vmem:[#allocation2 + $0x1c0] sm:$0xff] }
 0x272   : > { %2662 = vmatpush1.bf16.msra.mxu1 %v6710_v8  ;;  %v6727_v15 = vld [vmem:[#allocation14 + $0x774] ss:$8 sps:$4 sm:$0xff]   ;;  %v1791_v8 = vsel %vm1671_vm1, %v1786_v6, %v1790_v56  ;;  %v8832_v32 = vshll.u32 %v8378_v60, 16  ;;  %v6725_v43 = vld [vmem:[#allocation14 + $0x770] ss:$8 sps:$4 sm:$0xff]   ;;  %v3878_v22 = vshrl.u32 %v3734_v61, 16 }
 0x273   : > { %4495 = vmatpush1.bf16.msra.mxu0 %v6713_v27  ;;  %2663 = vmatprep.subr.bf16.mxu1 %v6718_v26  ;;  %v1778_v27 = vrot.slane %v1776_v20, 1  ;;  %v3851_v55 = vor.u32 %v8930_v57, %v3848_v42  ;;  %v3864_v26 = vsel %vm819_vm0, %v3856_v25, %v3863_v10  ;;  %v8834_v56 = vshrl.u32 %v8378_v60, 16  ;;  %v6733_v42 = vld [vmem:[#allocation14 + $0x784] ss:$8 sps:$4 sm:$0xff]   ;;  %v1661_v61 = vld [vmem:[#allocation2 + $0x110] sm:$0x1] }
 0x274   : > { %4496 = vmatprep.subr.bf16.mxu0 %v6721_v50  ;;  %v6730_v50 = vld [vmem:[#allocation14 + $0x384] ss:$8 sps:$4 sm:$0xff]   ;;  %v8835_v6 = vshll.u32 %v8384_v49, 16  ;;  %v4810_v20 = vrot.slane %v8832_v32, 1  ;;  %v8931_v2 = vshrl.u32 %v8272_v14, 16  ;;  %v1797_v25 = vrot.slane %v3825_v28, 1 }
 0x275   : > { %2136 = vmatmul.mubr.bf16.gmra.mrb[12].mxu1 %v1755_v40  ;;  %v8836_v40 = vshll.u32 %v8389_v0, 16  ;;  %v3733_v10 = vld [vmem:[#allocation2 + $0x150] sm:$0x80]  ;;  %v8837_v28 = vshrl.u32 %v8389_v0, 16  ;;  %v1814_v32 = vrot.slane %v1812_v48, 1  ;;  %v3880_v41 = vrot.slane %v3878_v22, 7 }
 0x276   : > { %4209 = vmatmul.mubr.bf16.gmra.mrb[12].mxu0 %v3828_v24  ;;  %2664 = vmatpush1.bf16.msra.mxu1 %v6716_v12  ;;  %v1810_v39 = vor.u32 %v8931_v2, %v1809_v7  ;;  %v8401_v57 = vor.u32 %v4810_v20, %v8834_v56  ;;  %v4846_v12 = vrot.slane %v8835_v6, 1  ;;  %v6728_v7 = vld [vmem:[#allocation14 + $0x380] ss:$8 sps:$4 sm:$0xff]   ;;  %v8932_v20 = vshll.u32 %v8333_v29, 16  ;;  %v3738_v6 = vld [vmem:[#allocation2 + $0x188] sm:$0x80] }
 0x277   : > { %4497 = vmatpush1.bf16.msra.mxu0 %v6719_v21  ;;  %2665 = vmatprep.subr.bf16.mxu1 %v6724_v30  ;;  %v1779_v21 = vsel %vm1671_vm1, %v1774_v23, %v1778_v27  ;;  %v3852_v30 = vsel %vm819_vm0, %v3844_v51, %v3851_v55  ;;  %v4834_v2 = vrot.slane %v8836_v40, 1  ;;  %v1666_v24 = vld [vmem:[#allocation2 + $0x148] sm:$0x1]  ;;  %v1800_v23 = vshll.u32 %v1661_v61, 16  ;;  %v6739_v22 = vld [vmem:[#allocation14 + $0x794] ss:$8 sps:$4 sm:$0xff]  }
 0x278   : > { %4498 = vmatprep.subr.bf16.mxu0 %v6727_v15  ;;  %2145 = vmatprep.mubr.bf16.mxu1 %v1791_v8  ;;  %v6731_v15 = vld [vmem:[#allocation14 + $0x780] ss:$8 sps:$4 sm:$0xff]   ;;  %v3887_v56 = vor.u32 %v8932_v20, %v3884_v44  ;;  %v8933_v8 = vshrl.u32 %v8384_v49, 16  ;;  %v3866_v27 = vshrl.u32 %v3733_v10, 16  ;;  %v8934_v51 = vshrl.u32 %v8335_v19, 16 }
 0x279   : > { %4218 = vmatprep.mubr.bf16.mxu0 %v3864_v26  ;;  %v8420_v48 = vor.u32 %v4834_v2, %v8837_v28  ;;  %v6736_v44 = vld [vmem:[#allocation14 + $0x394] ss:$8 sps:$4 sm:$0xff]   ;;  %v6734_v20 = vld [vmem:[#allocation14 + $0x390] ss:$8 sps:$4 sm:$0xff]   ;;  %v3902_v61 = vshrl.u32 %v3738_v6, 16  ;;  %v8936_v10 = vshrl.u32 %v8340_v11, 16 }
 0x27a   : > { %v8414_v26 = vor.u32 %v4846_v12, %v8933_v8  ;;  %2666 = vmatpush1.bf16.msra.mxu1 %v6722_v31  ;;  %v3872_v55 = vrot.slane %v8934_v51, 7  ;;  %v6737_v40 = vld [vmem:[#allocation14 + $0x790] ss:$8 sps:$4 sm:$0xff]   ;;  %v1836_v12 = vshll.u32 %v1666_v24, 16  ;;  %v1815_v31 = vsel %vm1671_vm1, %v1810_v39, %v1814_v32  ;;  %v1665_v51 = vld [vmem:[#allocation2 + $0x140] sm:$0x1] }
 0x27b   : > { %4499 = vmatpush1.bf16.msra.mxu0 %v6725_v43  ;;  %8935 = vst [vmem:[#allocation47_spill] sm:$0xff] %v8420_v48  ;;  %2667 = vmatprep.subr.bf16.mxu1 %v6730_v50  ;;  %v3888_v43 = vsel %vm819_vm0, %v3880_v41, %v3887_v56  ;;  %v3908_v8 = vrot.slane %v8936_v10, 7  ;;  %v8937_v50 = vshrl.u32 %v8296_v47, 16  ;;  %v1802_v2 = vrot.slane %v1800_v23, 1  ;;  %v6742_v28 = vld [vmem:[#allocation14 + $0x3a4] ss:$8 sps:$4 sm:$0xff]  }
 0x27c   : > { %4500 = vmatprep.subr.bf16.mxu0 %v6733_v42  ;;  %v3868_v48 = vrot.slane %v3866_v27, 7  ;;  %v8938_v24 = vshll.u32 %v8335_v19, 16  ;;  %v6745_v32 = vld [vmem:[#allocation14 + $0x7a4] ss:$8 sps:$4 sm:$0xff]   ;;  %v6740_v56 = vld [vmem:[#allocation14 + $0x3a0] ss:$8 sps:$4 sm:$0xff]  }
 0x27d   : > { %2146 = vmatmul.mubr.bf16.gmra.mrb[16].mxu1 %v1779_v21  ;;  %v1798_v42 = vor.u32 %v8937_v50, %v1797_v25  ;;  %v3737_v41 = vld [vmem:[#allocation2 + $0x180] sm:$0x80]  ;;  %v1838_v6 = vrot.slane %v1836_v12, 1  ;;  %v1824_v39 = vshll.u32 %v1665_v51, 16  ;;  %v8939_v25 = vshll.u32 %v8340_v11, 16 }
 0x27e   : > { %4219 = vmatmul.mubr.bf16.gmra.mrb[16].mxu0 %v3852_v30  ;;  %2668 = vmatpush1.bf16.msra.mxu1 %v6728_v7  ;;  %v3875_v21 = vor.u32 %v8938_v24, %v3872_v55  ;;  %v6743_v7 = vld [vmem:[#allocation14 + $0x7a0] ss:$8 sps:$4 sm:$0xff]   ;;  %v6748_v30 = vld [vmem:[#allocation14 + $0x3b4] ss:$8 sps:$4 sm:$0xff]   ;;  %v6746_v51 = vld [vmem:[#allocation14 + $0x3b0] ss:$8 sps:$4 sm:$0xff]  }
 0x27f   : > { %4501 = vmatpush1.bf16.msra.mxu0 %v6731_v15  ;;  %2669 = vmatprep.subr.bf16.mxu1 %v6736_v44  ;;  %v3904_v15 = vrot.slane %v3902_v61, 7  ;;  %v3911_v23 = vor.u32 %v8939_v25, %v3908_v8  ;;  %v1803_v27 = vsel %vm1671_vm1, %v1798_v42, %v1802_v2  ;;  %v3890_v44 = vshrl.u32 %v3737_v41, 16  ;;  %v3742_v10 = vld [vmem:[#allocation2 + $0x1b8] sm:$0x80]  ;;  %v6749_v61 = vld [vmem:[#allocation14 + $0x7b0] ss:$8 sps:$4 sm:$0xff]  }
 0x280   : > { %4502 = vmatprep.subr.bf16.mxu0 %v6739_v22  ;;  %2155 = vmatprep.mubr.bf16.mxu1 %v1815_v31  ;;  %v3876_v55 = vsel %vm819_vm0, %v3868_v48, %v3875_v21  ;;  %v8940_v22 = vshrl.u32 %v8378_v60, 16  ;;  %v6751_v12 = vld [vmem:[#allocation14 + $0x7b4] ss:$8 sps:$4 sm:$0xff]   ;;  %v1839_v8 = vsel %vm1671_vm1, %v8282_v37, %v1838_v6  ;;  %v6754_v48 = vld [vmem:[#allocation14 + $0x3c4] ss:$8 sps:$4 sm:$0xff]   ;;  %v3926_v42 = vshrl.u32 %v3742_v10, 16 }
 0x281   : > { %4228 = vmatprep.mubr.bf16.mxu0 %v3888_v43  ;;  %v1670_v43 = vld [vmem:[#allocation2 + $0x178] sm:$0x1]  ;;  %v8941_v2 = vshrl.u32 %v8384_v49, 16  ;;  %v8942_v21 = vshll.u32 %v8378_v60, 16  ;;  %v6757_v41 = vld [vmem:[#allocation14 + $0x7c4] ss:$8 sps:$4 sm:$0xff]  }
 0x282   : > { %2670 = vmatpush1.bf16.msra.mxu1 %v6734_v20  ;;  %v3896_v31 = vrot.slane %v8940_v22, 7  ;;  %v1826_v20 = vrot.slane %v1824_v39, 1  ;;  %v1860_v50 = vshll.u32 %v1670_v43, 16  ;;  %v1669_v25 = vld [vmem:[#allocation2 + $0x170] sm:$0x1] }
 0x283   : > { %4503 = vmatpush1.bf16.msra.mxu0 %v6737_v40  ;;  %2671 = vmatprep.subr.bf16.mxu1 %v6742_v28  ;;  %v3912_v40 = vsel %vm819_vm0, %v3904_v15, %v3911_v23  ;;  %v3932_v24 = vrot.slane %v8941_v2, 7  ;;  %v3892_v28 = vrot.slane %v3890_v44, 7  ;;  %v3741_v6 = vld [vmem:[#allocation2 + $0x1b0] sm:$0x80]  ;;  %v6752_v39 = vld [vmem:[#allocation14 + $0x3c0] ss:$8 sps:$4 sm:$0xff]  }
 0x284   : > { %4504 = vmatprep.subr.bf16.mxu0 %v6745_v32  ;;  %v3899_v32 = vor.u32 %v8942_v21, %v3896_v31  ;;  %v6755_v15 = vld [vmem:[#allocation14 + $0x7c0] ss:$8 sps:$4 sm:$0xff]   ;;  %v1862_v23 = vrot.slane %v1860_v50, 1  ;;  %v8944_v31 = vshrl.u32 %v8389_v0, 16  ;;  %v2219_v10 = vld [vmem:[#allocation2 + $0x38] sm:$0x80] }
 0x285   : > { %2156 = vmatmul.mubr.bf16.gmra.mrb[20].mxu1 %v1803_v27  ;;  %v3928_v27 = vrot.slane %v3926_v42, 7  ;;  %v6761_v50 = vld [vmem:[#allocation14 + $0x7d0] ss:$8 sps:$4 sm:$0xff]   ;;  %v6766_v2 = vld [vmem:[#allocation14 + $0x3e4] ss:$8 sps:$4 sm:$0xff]  }
 0x286   : > { %4229 = vmatmul.mubr.bf16.gmra.mrb[20].mxu0 %v3876_v55  ;;  %2672 = vmatpush1.bf16.msra.mxu1 %v6740_v56  ;;  %v8943_v55 = vshll.u32 %v8384_v49, 16  ;;  %v1848_v56 = vshll.u32 %v1669_v25, 16  ;;  %v3900_v44 = vsel %vm819_vm0, %v3892_v28, %v3899_v32  ;;  %v3920_v43 = vrot.slane %v8944_v31, 7  ;;  %v6769_v21 = vld [vmem:[#allocation14 + $0x7e4] ss:$8 sps:$4 sm:$0xff]  }
 0x287   : > { %4505 = vmatpush1.bf16.msra.mxu0 %v6743_v7  ;;  %2673 = vmatprep.subr.bf16.mxu1 %v6748_v30  ;;  %v1827_v7 = vsel %vm1671_vm1, %v8326_v33, %v1826_v20  ;;  %v3914_v30 = vshrl.u32 %v3741_v6, 16  ;;  %v2263_v20 = vshrl.u32 %v2219_v10, 16  ;;  %v2218_v32 = vld [vmem:[#allocation2 + $0x30] sm:$0x80]  ;;  %v2222_v10 = vld [vmem:[#allocation2 + $0x60] sm:$0x80] }
 0x288   : > { %4506 = vmatprep.subr.bf16.mxu0 %v6751_v12  ;;  %2165 = vmatprep.mubr.bf16.mxu1 %v1839_v8  ;;  %v3935_v22 = vor.u32 %v8943_v55, %v3932_v24  ;;  %v6760_v12 = vld [vmem:[#allocation14 + $0x3d4] ss:$8 sps:$4 sm:$0xff]   ;;  %v1850_v42 = vrot.slane %v1848_v56, 1 }
 0x289   : > { %4238 = vmatprep.mubr.bf16.mxu0 %v3912_v40  ;;  %v6763_v8 = vld [vmem:[#allocation14 + $0x7d4] ss:$8 sps:$4 sm:$0xff]   ;;  %v6758_v40 = vld [vmem:[#allocation14 + $0x3d0] ss:$8 sps:$4 sm:$0xff]   ;;  %v3916_v24 = vrot.slane %v3914_v30, 7  ;;  %v2265_v25 = vrot.slane %v2263_v20, 7 }
 0x28a   : > { %2674 = vmatpush1.bf16.msra.mxu1 %v6746_v51  ;;  %v1863_v51 = vsel %vm1671_vm1, %v8357_v17, %v1862_v23  ;;  %v1851_v6 = vsel %vm1671_vm1, %v8361_v13, %v1850_v42  ;;  %v2251_v23 = vshrl.u32 %v2218_v32, 16  ;;  %v6772_v55 = vld [vmem:[#allocation14 + $0x3f4] ss:$8 sps:$4 sm:$0xff]   ;;  %v6773_v30 = vld [vmem:[#allocation14 + $0x7f0] ss:$8 sps:$4 sm:$0xff]  }
 0x28b   : > { %4507 = vmatpush1.bf16.msra.mxu0 %v6749_v61  ;;  %2675 = vmatprep.subr.bf16.mxu1 %v6754_v48  ;;  %v3936_v61 = vsel %vm819_vm0, %v3928_v27, %v3935_v22  ;;  %v8945_v48 = vshll.u32 %v8389_v0, 16  ;;  %v2223_v27 = vld [vmem:[#allocation2 + $0x68] sm:$0x80]  ;;  %v6775_v22 = vld [vmem:[#allocation14 + $0x7f4] ss:$8 sps:$4 sm:$0xff]   ;;  %v2273_v56 = vsel %vm819_vm0, %v2265_v25, %v8044_v3 }
 0x28c   : > { %4508 = vmatprep.subr.bf16.mxu0 %v6757_v41  ;;  %v6764_v41 = vld [vmem:[#allocation14 + $0x3e0] ss:$8 sps:$4 sm:$0xff]   ;;  %v2253_v31 = vrot.slane %v2251_v23, 7  ;;  %v6825_v20 = vld [vmem:[#allocation2 + $0x70] sm:$0xff] }
 0x28d   : > { %2166 = vmatmul.mubr.bf16.gmra.mrb[24].mxu1 %v1827_v7  ;;  %v3923_v28 = vor.u32 %v8945_v48, %v3920_v43  ;;  %v2287_v7 = vshrl.u32 %v2223_v27, 16  ;;  %v6778_v43 = vld [vmem:[#allocation14 + $0x804] ss:$8 sps:$4 sm:$0xff]   ;;  %v6776_v3 = vld [vmem:[#allocation14 + $0x800] ss:$8 sps:$4 sm:$0xff]  }
 0x28e   : > { %4239 = vmatmul.mubr.bf16.gmra.mrb[24].mxu0 %v3900_v44  ;;  %2676 = vmatpush1.bf16.msra.mxu1 %v6752_v39  ;;  %v6770_v44 = vld [vmem:[#allocation14 + $0x3f0] ss:$8 sps:$4 sm:$0xff]   ;;  %v6782_v25 = vld [vmem:[#allocation14 + $0x820] ss:$8 sps:$4 sm:$0xff]  }
 0x28f   : > { %4509 = vmatpush1.bf16.msra.mxu0 %v6755_v15  ;;  %2677 = vmatprep.subr.bf16.mxu1 %v6760_v12  ;;  %v3924_v39 = vsel %vm819_vm0, %v3916_v24, %v3923_v28  ;;  %v6767_v15 = vld [vmem:[#allocation14 + $0x7e0] ss:$8 sps:$4 sm:$0xff]   ;;  %v6824_v12 = vld [vmem:[#allocation2 + $0x78] sm:$0xff]  ;;  %v2226_v28 = vld [vmem:[#allocation2 + $0x90] sm:$0x80] }
 0x290   : > { %4510 = vmatprep.subr.bf16.mxu0 %v6763_v8  ;;  %2175 = vmatprep.mubr.bf16.mxu1 %v1863_v51  ;;  %v2289_v8 = vrot.slane %v2287_v7, 7  ;;  %v2227_v51 = vld [vmem:[#allocation2 + $0x98] sm:$0x80]  ;;  %v6779_v24 = vld [vmem:[#allocation14 + $0x810] ss:$8 sps:$4 sm:$0xff]  }
 0x291   : > { %4248 = vmatprep.mubr.bf16.mxu0 %v3936_v61  ;;  %v6781_v61 = vld [vmem:[#allocation14 + $0x814] ss:$8 sps:$4 sm:$0xff]  }
 0x292   : > { %2678 = vmatpush1.bf16.msra.mxu1 %v6758_v40  ;;  %v2261_v40 = vsel %vm819_vm0, %v2253_v31, %v8064_v36  ;;  %v2297_v42 = vsel %vm819_vm0, %v2289_v8, %v8072_v4  ;;  %v6784_v36 = vld [vmem:[#allocation14 + $0x824] ss:$8 sps:$4 sm:$0xff]   ;;  %v2299_v4 = vshrl.u32 %v2226_v28, 16  ;;  %v2235_v31 = vld [vmem:[#allocation2 + $0xf8] sm:$0x80] }
 0x293   : > { %4511 = vmatpush1.bf16.msra.mxu0 %v6761_v50  ;;  %2679 = vmatprep.subr.bf16.mxu1 %v6766_v2  ;;  %v2275_v50 = vshrl.u32 %v2222_v10, 16  ;;  %v2311_v2 = vshrl.u32 %v2227_v51, 16  ;;  %v2239_v51 = vld [vmem:[#allocation2 + $0x128] sm:$0x80]  ;;  %v6800_v28 = vld [vmem:[#allocation14 + $0x880] ss:$8 sps:$4 sm:$0xff]  }
 0x294   : > { %4512 = vmatprep.subr.bf16.mxu0 %v6769_v21  ;;  %v6826_v21 = vld [vmem:[#allocation2 + $0xa8] sm:$0xff] }
 0x295   : > { %2176 = vmatmul.mubr.bf16.gmra.mrb[28].mxu1 %v1851_v6  ;;  %v2277_v48 = vrot.slane %v2275_v50, 7  ;;  %v2313_v32 = vrot.slane %v2311_v2, 7  ;;  %v2231_v6 = vld [vmem:[#allocation2 + $0xc8] sm:$0x80]  ;;  %v6794_v50 = vld [vmem:[#allocation14 + $0x860] ss:$8 sps:$4 sm:$0xff]  }
 0x296   : > { %4249 = vmatmul.mubr.bf16.gmra.mrb[28].mxu0 %v3924_v39  ;;  %2680 = vmatpush1.bf16.msra.mxu1 %v6764_v41  ;;  %v6787_v39 = vld [vmem:[#allocation14 + $0x834] ss:$8 sps:$4 sm:$0xff]   ;;  %v2335_v27 = vshrl.u32 %v2231_v6, 16 }
 0x297   : > { %4513 = vmatpush1.bf16.msra.mxu0 %v6767_v15  ;;  %2681 = vmatprep.subr.bf16.mxu1 %v6772_v55  ;;  %v2285_v41 = vsel %vm819_vm0, %v2277_v48, %v8084_v46  ;;  %v6827_v15 = vld [vmem:[#allocation2 + $0xa0] sm:$0xff]  ;;  %v2321_v23 = vsel %vm819_vm0, %v2313_v32, %v8098_v53  ;;  %v6785_v55 = vld [vmem:[#allocation14 + $0x830] ss:$8 sps:$4 sm:$0xff]   ;;  %v6805_v32 = vld [vmem:[#allocation14 + $0x894] ss:$8 sps:$4 sm:$0xff]  }
 0x298   : > { %4514 = vmatprep.subr.bf16.mxu0 %v6775_v22  ;;  %2683 = vmatprep.mubr.bf16.mxu1 %v2273_v56  ;;  %v2301_v22 = vrot.slane %v2299_v4, 7  ;;  %v6790_v46 = vld [vmem:[#allocation14 + $0x844] ss:$8 sps:$4 sm:$0xff]   ;;  %v2337_v7 = vrot.slane %v2335_v27, 7  ;;  %v6828_v48 = vld [vmem:[#allocation2 + $0x138] sm:$0xff] }
 0x299   : > { %4516 = vmatprep.mubr.bf16.mxu0 %v6824_v12  ;;  %v2230_v56 = vld [vmem:[#allocation2 + $0xc0] sm:$0x80]  ;;  %v2359_v12 = vshrl.u32 %v2235_v31, 16  ;;  %v6803_v4 = vld [vmem:[#allocation14 + $0x890] ss:$8 sps:$4 sm:$0xff]  }
 0x29a   : > { %2682 = vmatpush1.bf16.msra.mxu1 %v6770_v44  ;;  %v2309_v44 = vsel %vm819_vm0, %v2301_v22, %v8112_v18  ;;  %v2323_v53 = vshrl.u32 %v2230_v56, 16  ;;  %v2345_v10 = vsel %vm819_vm0, %v2337_v7, %v8120_v38  ;;  %v6796_v18 = vld [vmem:[#allocation14 + $0x864] ss:$8 sps:$4 sm:$0xff]   ;;  %v4630_v7 = vld [vmem:[#allocation2 + $0x78] sm:$0xff] }
 0x29b   : > { %4515 = vmatpush1.bf16.msra.mxu0 %v6773_v30  ;;  %5925 = vmatprep.subr.bf16.mxu1 %v6778_v43  ;;  %v6788_v30 = vld [vmem:[#allocation14 + $0x840] ss:$8 sps:$4 sm:$0xff]   ;;  %v4676_v31 = vshll.u32 %v4630_v7, 16 }
 0x29c   : > { %5062 = vmatprep.subr.bf16.mxu0 %v6778_v43  ;;  %v6793_v43 = vld [vmem:[#allocation14 + $0x854] ss:$8 sps:$4 sm:$0xff]   ;;  %v2325_v8 = vrot.slane %v2323_v53, 7  ;;  %v6812_v53 = vld [vmem:[#allocation14 + $0x8c0] ss:$8 sps:$4 sm:$0xff]  }
 0x29d   : > { %2684 = vmatmul.mubr.bf16.vlgmr.msra.gmra.mrb[0].mxu1 %v2261_v40  ;;  %v2234_v40 = vld [vmem:[#allocation2 + $0xf0] sm:$0x80] }
 0x29e   : > { %4517 = vmatmul.mubr.bf16.vlgmr.msra.gmra.mrb[0].mxu0 %v6825_v20  ;;  %5941 = vmatpush1.bf16.msra.mxu1 %v6776_v3  ;;  %v2347_v38 = vshrl.u32 %v2234_v40, 16  ;;  %v4678_v40 = vrot.slane %v4676_v31, 1 }
 0x29f   : > { %5063 = vmatpush1.bf16.msra.mxu0 %v6776_v3  ;;  %5926 = vmatprep.subr.bf16.mxu1 %v6781_v61  ;;  %v2361_v3 = vrot.slane %v2359_v12, 7  ;;  %v6817_v12 = vld [vmem:[#allocation14 + $0x8d4] ss:$8 sps:$4 sm:$0xff]  }
 0x2a0   : > { %5064 = vmatprep.subr.bf16.mxu0 %v6781_v61  ;;  %2693 = vmatprep.mubr.bf16.mxu1 %v2297_v42  ;;  %v6799_v61 = vld [vmem:[#allocation14 + $0x874] ss:$8 sps:$4 sm:$0xff]   ;;  %v2383_v42 = vshrl.u32 %v2239_v51, 16  ;;  %v2349_v2 = vrot.slane %v2347_v38, 7 }
 0x2a1   : > { %4526 = vmatprep.mubr.bf16.mxu0 %v6826_v21  ;;  %v2369_v20 = vsel %vm819_vm0, %v2361_v3, %v8143_v35  ;;  %v2243_v21 = vld [vmem:[#allocation2 + $0x158] sm:$0x80] }
 0x2a2   : > { %5942 = vmatpush1.bf16.msra.mxu1 %v6779_v24 }
 0x2a3   : > { %5065 = vmatpush1.bf16.msra.mxu0 %v6779_v24  ;;  %5927 = vmatprep.subr.bf16.mxu1 %v6784_v36  ;;  %v2238_v24 = vld [vmem:[#allocation2 + $0x120] sm:$0x80] }
 0x2a4   : > { %5066 = vmatprep.subr.bf16.mxu0 %v6784_v36  ;;  %v2385_v36 = vrot.slane %v2383_v42, 7  ;;  %v2371_v35 = vshrl.u32 %v2238_v24, 16 }
 0x2a5   : > { %2694 = vmatmul.mubr.bf16.gmra.mrb[4].mxu1 %v2285_v41 }
 0x2a6   : > { %4527 = vmatmul.mubr.bf16.gmra.mrb[4].mxu0 %v6827_v15  ;;  %5943 = vmatpush1.bf16.msra.mxu1 %v6782_v25  ;;  %v2393_v41 = vsel %vm819_vm0, %v2385_v36, %v8164_v45  ;;  %v2373_v6 = vrot.slane %v2371_v35, 7  ;;  %v6806_v45 = vld [vmem:[#allocation14 + $0x8a0] ss:$8 sps:$4 sm:$0xff]  }
 0x2a7   : > { %5067 = vmatpush1.bf16.msra.mxu0 %v6782_v25  ;;  %5928 = vmatprep.subr.bf16.mxu1 %v6787_v39  ;;  %v2407_v25 = vshrl.u32 %v2243_v21, 16 }
 0x2a8   : > { %5068 = vmatprep.subr.bf16.mxu0 %v6787_v39  ;;  %2703 = vmatprep.mubr.bf16.mxu1 %v2321_v23  ;;  %v2242_v39 = vld [vmem:[#allocation2 + $0x150] sm:$0x80]  ;;  %v2247_v23 = vld [vmem:[#allocation2 + $0x188] sm:$0x80] }
 0x2a9   : > { %4536 = vmatprep.mubr.bf16.mxu0 %v8249_v58  ;;  %v6791_v58 = vld [vmem:[#allocation14 + $0x850] ss:$8 sps:$4 sm:$0xff]   ;;  %v2409_v15 = vrot.slane %v2407_v25, 7  ;;  %v2395_v27 = vshrl.u32 %v2242_v39, 16  ;;  %v2431_v22 = vshrl.u32 %v2247_v23, 16 }
 0x2aa   : > { %5944 = vmatpush1.bf16.msra.mxu1 %v6785_v55  ;;  %v6821_v39 = vld [vmem:[#allocation14 + $0x8f0] ss:$8 sps:$4 sm:$0xff]  }
 0x2ab   : > { %5069 = vmatpush1.bf16.msra.mxu0 %v6785_v55  ;;  %5929 = vmatprep.subr.bf16.mxu1 %v6790_v46  ;;  %v6811_v55 = vld [vmem:[#allocation14 + $0x8b4] ss:$8 sps:$4 sm:$0xff]   ;;  %v2397_v56 = vrot.slane %v2395_v27, 7  ;;  %v4635_v27 = vld [vmem:[#allocation2 + $0xb0] sm:$0x1] }
 0x2ac   : > { %5070 = vmatprep.subr.bf16.mxu0 %v6790_v46  ;;  %v2417_v46 = vsel %vm819_vm0, %v2409_v15, %v8189_v5 }
 0x2ad   : > { %2704 = vmatmul.mubr.bf16.gmra.mrb[8].mxu1 %v2309_v44  ;;  %v2246_v44 = vld [vmem:[#allocation2 + $0x180] sm:$0x80]  ;;  %v2405_v5 = vsel %vm819_vm0, %v2397_v56, %v8208_v62  ;;  %v6815_v62 = vld [vmem:[#allocation14 + $0x8d0] ss:$8 sps:$4 sm:$0xff]  }
 0x2ae   : > { %4537 = vmatmul.mubr.bf16.gmra.mrb[8].mxu0 %v8264_v34  ;;  %5945 = vmatpush1.bf16.msra.mxu1 %v6788_v30  ;;  %v2333_v34 = vsel %vm819_vm0, %v2325_v8, %v8136_v9  ;;  %v6802_v9 = vld [vmem:[#allocation14 + $0x884] ss:$8 sps:$4 sm:$0xff]  }
 0x2af   : > { %5071 = vmatpush1.bf16.msra.mxu0 %v6788_v30  ;;  %5930 = vmatprep.subr.bf16.mxu1 %v6793_v43  ;;  %v2433_v30 = vrot.slane %v2431_v22, 7 }
 0x2b0   : > { %5072 = vmatprep.subr.bf16.mxu0 %v6793_v43  ;;  %2713 = vmatprep.mubr.bf16.mxu1 %v2345_v10  ;;  %v4632_v43 = vld [vmem:[#allocation2 + $0x88] sm:$0x1] }
 0x2b1   : > { %4546 = vmatprep.mubr.bf16.mxu0 %v8272_v14  ;;  %v6797_v14 = vld [vmem:[#allocation14 + $0x870] ss:$8 sps:$4 sm:$0xff]   ;;  %v4648_v10 = vld [vmem:[#allocation2 + $0x148] sm:$0x1]  ;;  %v2441_v8 = vsel %vm819_vm0, %v2433_v30, %v7971_v52  ;;  %v4681_v3 = vshll.u32 %v4632_v43, 16  ;;  %v4693_v30 = vshll.u32 %v4635_v27, 16 }
 0x2b2   : > { %5946 = vmatpush1.bf16.msra.mxu1 %v6791_v58 }
 0x2b3   : > { %5073 = vmatpush1.bf16.msra.mxu0 %v6791_v58  ;;  %5931 = vmatprep.subr.bf16.mxu1 %v6796_v18  ;;  %v4629_v58 = vld [vmem:[#allocation2 + $0x70] sm:$0xff]  ;;  %v4683_v24 = vrot.slane %v4681_v3, 1 }
 0x2b4   : > { %5074 = vmatprep.subr.bf16.mxu0 %v6796_v18  ;;  %v4634_v18 = vld [vmem:[#allocation2 + $0xa8] sm:$0xff]  ;;  %v4664_v51 = vshll.u32 %v4629_v58, 16 }
 0x2b5   : > { %2714 = vmatmul.mubr.bf16.gmra.mrb[12].mxu1 %v2333_v34  ;;  %v4777_v34 = vshll.u32 %v4648_v10, 16  ;;  %v4700_v42 = vshll.u32 %v4634_v18, 16 }
 0x2b6   : > { %4547 = vmatmul.mubr.bf16.gmra.mrb[12].mxu0 %v8296_v47  ;;  %5947 = vmatpush1.bf16.msra.mxu1 %v6794_v50  ;;  %v2357_v47 = vsel %vm819_vm0, %v2349_v2, %v8160_v1  ;;  %v6808_v1 = vld [vmem:[#allocation14 + $0x8a4] ss:$8 sps:$4 sm:$0xff]   ;;  %v6818_v2 = vld [vmem:[#allocation14 + $0x8e0] ss:$8 sps:$4 sm:$0xff]   ;;  %v4666_v35 = vrot.slane %v4664_v51, 1 }
 0x2b7   : > { %5075 = vmatpush1.bf16.msra.mxu0 %v6794_v50  ;;  %5932 = vmatprep.subr.bf16.mxu1 %v6799_v61  ;;  %v4647_v50 = vld [vmem:[#allocation2 + $0x140] sm:$0x1] }
 0x2b8   : > { %5076 = vmatprep.subr.bf16.mxu0 %v6799_v61  ;;  %2723 = vmatprep.mubr.bf16.mxu1 %v2369_v20  ;;  %v6820_v61 = vld [vmem:[#allocation14 + $0x8e4] ss:$8 sps:$4 sm:$0xff]   ;;  %v4631_v20 = vld [vmem:[#allocation2 + $0x80] sm:$0x1]  ;;  %v4765_v52 = vshll.u32 %v4647_v50, 16 }
 0x2b9   : > { %4556 = vmatprep.mubr.bf16.mxu0 %v6828_v48  ;;  %v4779_v48 = vrot.slane %v4777_v34, 1  ;;  %v4669_v21 = vshll.u32 %v4631_v20, 16  ;;  %v4639_v50 = vld [vmem:[#allocation2 + $0xe0] sm:$0x1]  ;;  %v4644_v20 = vld [vmem:[#allocation2 + $0x118] sm:$0x1] }
 0x2ba   : > { %5948 = vmatpush1.bf16.msra.mxu1 %v6797_v14  ;;  %v4655_v51 = vld [vmem:[#allocation2 + $0x1a0] sm:$0x1] }
 0x2bb   : > { %5077 = vmatpush1.bf16.msra.mxu0 %v6797_v14  ;;  %5933 = vmatprep.subr.bf16.mxu1 %v6802_v9  ;;  %v4652_v14 = vld [vmem:[#allocation2 + $0x178] sm:$0x1] }
 0x2bc   : > { %5078 = vmatprep.subr.bf16.mxu0 %v6802_v9 }
 0x2bd   : > { %2724 = vmatmul.mubr.bf16.gmra.mrb[16].mxu1 %v2357_v47  ;;  %v6823_v47 = vld [vmem:[#allocation14 + $0x8f4] ss:$8 sps:$4 sm:$0xff]  }
 0x2be   : > { %4557 = vmatmul.mubr.bf16.gmra.mrb[16].mxu0 %v8304_v54  ;;  %5949 = vmatpush1.bf16.msra.mxu1 %v6800_v28  ;;  %v2381_v54 = vsel %vm819_vm0, %v2373_v6, %v8180_v63  ;;  %v6814_v63 = vld [vmem:[#allocation14 + $0x8c4] ss:$8 sps:$4 sm:$0xff]   ;;  %v4638_v6 = vld [vmem:[#allocation2 + $0xd8] sm:$0xff] }
 0x2bf   : > { %5079 = vmatpush1.bf16.msra.mxu0 %v6800_v28  ;;  %5934 = vmatprep.subr.bf16.mxu1 %v6805_v32  ;;  %v4662_v28 = vshrl.u32 %v4629_v58, 16  ;;  %v4724_v22 = vshll.u32 %v4638_v6, 16 }
 0x2c0   : > { %5080 = vmatprep.subr.bf16.mxu0 %v6805_v32  ;;  %2733 = vmatprep.mubr.bf16.mxu1 %v2393_v41  ;;  %v4633_v32 = vld [vmem:[#allocation2 + $0xa0] sm:$0xff]  ;;  %v4702_v41 = vrot.slane %v4700_v42, 1  ;;  %v4660_v42 = vld [vmem:[#allocation2 + $0x1d8] sm:$0x1] }
 0x2c1   : > { %4566 = vmatprep.mubr.bf16.mxu0 %v8333_v29  ;;  %v6809_v29 = vld [vmem:[#allocation14 + $0x8b0] ss:$8 sps:$4 sm:$0xff]   ;;  %v4688_v23 = vshll.u32 %v4633_v32, 16 }
 0x2c2   : > { %5950 = vmatpush1.bf16.msra.mxu1 %v6803_v4 }
 0x2c3   : > { %5081 = vmatpush1.bf16.msra.mxu0 %v6803_v4  ;;  %5935 = vmatprep.subr.bf16.mxu1 %v6808_v1  ;;  %v4801_v4 = vshll.u32 %v4652_v14, 16  ;;  %v4717_v14 = vshll.u32 %v4639_v50, 16 }
 0x2c4   : > { %5082 = vmatprep.subr.bf16.mxu0 %v6808_v1  ;;  %v4767_v1 = vrot.slane %v4765_v52, 1 }
 0x2c5   : > { %2734 = vmatmul.mubr.bf16.gmra.mrb[20].mxu1 %v2381_v54  ;;  %v4667_v54 = vor.u32 %v4666_v35, %v4662_v28  ;;  %v4803_v56 = vrot.slane %v4801_v4, 1  ;;  %v4753_v28 = vshll.u32 %v4644_v20, 16  ;;  %v4849_v35 = vshll.u32 %v4660_v42, 16 }
 0x2c6   : > { %4567 = vmatmul.mubr.bf16.gmra.mrb[20].mxu0 %v8335_v19  ;;  %5951 = vmatpush1.bf16.msra.mxu1 %v6806_v45  ;;  %v2419_v19 = vshrl.u32 %v2246_v44, 16  ;;  %v4690_v44 = vrot.slane %v4688_v23, 1 }
 0x2c7   : > { %5083 = vmatpush1.bf16.msra.mxu0 %v6806_v45  ;;  %5936 = vmatprep.subr.bf16.mxu1 %v6811_v55  ;;  %v4671_v45 = vrot.slane %v4669_v21, 1  ;;  %v4641_v21 = vld [vmem:[#allocation2 + $0x100] sm:$0xff] }
 0x2c8   : > { %5084 = vmatprep.subr.bf16.mxu0 %v6811_v55  ;;  %2743 = vmatprep.mubr.bf16.mxu1 %v2417_v46  ;;  %v2421_v38 = vrot.slane %v2419_v19, 7  ;;  %v4651_v55 = vld [vmem:[#allocation2 + $0x170] sm:$0x1]  ;;  %v4726_v19 = vrot.slane %v4724_v22, 1 }
 0x2c9   : > { %4576 = vmatprep.mubr.bf16.mxu0 %v8340_v11  ;;  %v4674_v11 = vshrl.u32 %v4630_v7, 16  ;;  %v4768_v7 = vsel %vm1671_vm1, %v8326_v33, %v4767_v1  ;;  %v4672_v31 = vsel %vm1671_vm1, %v4667_v54, %v4671_v45  ;;  %v4642_v33 = vld [vmem:[#allocation2 + $0x108] sm:$0xff]  ;;  %v4851_v1 = vrot.slane %v4849_v35, 1 }
 0x2ca   : > { %5952 = vmatpush1.bf16.msra.mxu1 %v6809_v29  ;;  %v2429_v36 = vsel %vm819_vm0, %v2421_v38, %v7980_v59  ;;  %v4780_v59 = vsel %vm1671_vm1, %v8282_v37, %v4779_v48  ;;  %v4656_v37 = vld [vmem:[#allocation2 + $0x1a8] sm:$0x1]  ;;  %v4746_v48 = vshrl.u32 %v4642_v33, 16 }
 0x2cb   : > { %5085 = vmatpush1.bf16.msra.mxu0 %v6809_v29  ;;  %5937 = vmatprep.subr.bf16.mxu1 %v6814_v63  ;;  %v4679_v9 = vor.u32 %v4678_v40, %v4674_v11  ;;  %v4825_v58 = vshll.u32 %v4656_v37, 16  ;;  %v4695_v11 = vrot.slane %v4693_v30, 1 }
 0x2cc   : > { %5086 = vmatprep.subr.bf16.mxu0 %v6814_v63  ;;  %v4686_v63 = vshrl.u32 %v4633_v32, 16 }
 0x2cd   : > { %2744 = vmatmul.mubr.bf16.gmra.mrb[24].mxu1 %v2405_v5  ;;  %v4684_v15 = vsel %vm1671_vm1, %v4679_v9, %v4683_v24  ;;  %v4722_v5 = vshrl.u32 %v4638_v6, 16  ;;  %v4827_v38 = vrot.slane %v4825_v58, 1  ;;  %v4813_v24 = vshll.u32 %v4655_v51, 16 }
 0x2ce   : > { %4577 = vmatmul.mubr.bf16.gmra.mrb[24].mxu0 %v8378_v60  ;;  %5953 = vmatpush1.bf16.msra.mxu1 %v6812_v53  ;;  %v4636_v60 = vld [vmem:[#allocation2 + $0xb8] sm:$0x1]  ;;  %v4755_v6 = vrot.slane %v4753_v28, 1 }
 0x2cf   : > { %5087 = vmatpush1.bf16.msra.mxu0 %v6812_v53  ;;  %5938 = vmatprep.subr.bf16.mxu1 %v6817_v12  ;;  %v4705_v25 = vshll.u32 %v4636_v60, 16  ;;  %v4789_v53 = vshll.u32 %v4651_v55, 16  ;;  %v4727_v3 = vor.u32 %v4726_v19, %v4722_v5  ;;  %v4852_v55 = vsel %vm1671_vm1, %v8414_v26, %v4851_v1 }
 0x2d0   : > { %5088 = vmatprep.subr.bf16.mxu0 %v6817_v12  ;;  %2753 = vmatprep.mubr.bf16.mxu1 %v2441_v8  ;;  %v4804_v12 = vsel %vm1671_vm1, %v8357_v17, %v4803_v56  ;;  %v4637_v8 = vld [vmem:[#allocation2 + $0xd0] sm:$0xff] }
 0x2d1   : > { %4586 = vmatprep.mubr.bf16.mxu0 %v8384_v49  ;;  %v4698_v49 = vshrl.u32 %v4634_v18, 16  ;;  %v4707_v29 = vrot.slane %v4705_v25, 1  ;;  %v4691_v18 = vor.u32 %v4690_v44, %v4686_v63  ;;  %v4791_v40 = vrot.slane %v4789_v53, 1 }
 0x2d2   : > { %5954 = vmatpush1.bf16.msra.mxu1 %v6815_v62  ;;  %v4710_v60 = vshrl.u32 %v4637_v8, 16  ;;  %v4736_v25 = vshll.u32 %v4641_v21, 16 }
 0x2d3   : > { %5089 = vmatpush1.bf16.msra.mxu0 %v6815_v62  ;;  %5939 = vmatprep.subr.bf16.mxu1 %v6820_v61  ;;  %v4703_v46 = vor.u32 %v4702_v41, %v4698_v49  ;;  %v4712_v62 = vshll.u32 %v4637_v8, 16  ;;  %v4696_v17 = vsel %vm1671_vm1, %v4691_v18, %v4695_v11  ;;  %v4792_v52 = vsel %vm1671_vm1, %v8361_v13, %v4791_v40  ;;  %v4643_v41 = vld [vmem:[#allocation2 + $0x110] sm:$0x1] }
 0x2d4   : > { %5090 = vmatprep.subr.bf16.mxu0 %v6820_v61  ;;  %v4748_v61 = vshll.u32 %v4642_v33, 16  ;;  %v4719_v13 = vrot.slane %v4717_v14, 1  ;;  %v4815_v49 = vrot.slane %v4813_v24, 1  ;;  %v4738_v54 = vrot.slane %v4736_v25, 1 }
 0x2d5   : > { %2754 = vmatmul.mubr.bf16.gmra.mrb[28].mxu1 %v2429_v36  ;;  %v4708_v10 = vsel %vm1671_vm1, %v4703_v46, %v4707_v29  ;;  %v4714_v9 = vrot.slane %v4712_v62, 1  ;;  %v4828_v36 = vsel %vm1671_vm1, %v8367_v16, %v4827_v38 }
 0x2d6   : > { %4587 = vmatmul.mubr.bf16.gmra.mrb[28].mxu0 %v8389_v0  ;;  %5955 = vmatpush1.bf16.msra.mxu1 %v6818_v2  ;;  %v4640_v0 = vld [vmem:[#allocation2 + $0xe8] sm:$0x1]  ;;  %v4816_v23 = vsel %vm1671_vm1, %v8401_v57, %v4815_v49 }
 0x2d7   : > { %5091 = vmatpush1.bf16.msra.mxu0 %v6818_v2  ;;  %5940 = vmatprep.subr.bf16.mxu1 %v6823_v47  ;;  %v4729_v43 = vshll.u32 %v4640_v0, 16  ;;  %v4715_v32 = vor.u32 %v4714_v9, %v4710_v60  ;;  %v8946_v0 = vld [vmem:[#allocation47_spill] sm:$0xff] }
 0x2d8   : > { %5092 = vmatprep.subr.bf16.mxu0 %v6823_v47  ;;  %5094 = vmatprep.mubr.bf16.mxu0 %v4684_v15  ;;  %v4750_v47 = vrot.slane %v4748_v61, 1  ;;  %v4734_v15 = vshrl.u32 %v4641_v21, 16 }
 0x2d9   : > { %5134 = vmatprep.mubr.bf16.mxu1 %v4780_v59  ;;  %v4731_v34 = vrot.slane %v4729_v43, 1  ;;  %v4741_v59 = vshll.u32 %v4643_v41, 16  ;;  %v4720_v16 = vsel %vm1671_vm1, %v4715_v32, %v4719_v13 }
 0x2da   : > { %5956 = vmatpush1.bf16.msra.mxu1 %v6821_v39  ;;  %v4751_v4 = vor.u32 %v4750_v47, %v4746_v48  ;;  %v4739_v22 = vor.u32 %v4738_v54, %v4734_v15 }
 0x2db   : > { %5093 = vmatpush1.bf16.msra.mxu0 %v6821_v39  ;;  %v4732_v2 = vsel %vm1671_vm1, %v4727_v3, %v4731_v34  ;;  %v4659_v39 = vld [vmem:[#allocation2 + $0x1d0] sm:$0x1]  ;;  %v4743_v46 = vrot.slane %v4741_v59, 1  ;;  %v5209_v59 = vlaneseq }
 0x2dc   : > { %v4837_v45 = vshll.u32 %v4659_v39, 16  ;;  %v4756_v27 = vsel %vm1671_vm1, %v4751_v4, %v4755_v6 }
 0x2dd   : > { %5135 = vmatmul.mubr.bf16.vlgmr.msra.gmra.mrb[32].mxu1 %v4768_v7  ;;  %v4744_v56 = vsel %vm1671_vm1, %v4739_v22, %v4743_v46 }
 0x2de   : > { %5095 = vmatmul.mubr.bf16.vlgmr.msra.gmra.mrb[0].mxu0 %v4672_v31  ;;  %5144 = vmatprep.mubr.bf16.mxu1 %v4804_v12  ;;  %v4839_v29 = vrot.slane %v4837_v45, 1 }
 0x2df   : > { %5104 = vmatprep.mubr.bf16.mxu0 %v4708_v10 }
 0x2e0   : > { %v4840_v7 = vsel %vm1671_vm1, %v8946_v0, %v4839_v29 }
 0x2e5   : > { %5145 = vmatmul.mubr.bf16.gmra.mrb[36].mxu1 %v4792_v52 }
 0x2e6   : > { %5105 = vmatmul.mubr.bf16.gmra.mrb[4].mxu0 %v4696_v17  ;;  %5154 = vmatprep.mubr.bf16.mxu1 %v4828_v36 }
 0x2e7   : > { %5114 = vmatprep.mubr.bf16.mxu0 %v4732_v2 }
 0x2ed   : > { %5155 = vmatmul.mubr.bf16.gmra.mrb[40].mxu1 %v4816_v23  ;;  %v5210_v23 = vshrl.u32 %v5209_v59, 7 }
 0x2ee   : > { %5115 = vmatmul.mubr.bf16.gmra.mrb[8].mxu0 %v4720_v16  ;;  %5164 = vmatprep.mubr.bf16.mxu1 %v4852_v55 }
 0x2ef   : > { %5124 = vmatprep.mubr.bf16.mxu0 %v4756_v27 }
 0x2f5   : > { %5165 = vmatmul.mubr.bf16.gmra.mrb[44].mxu1 %v4840_v7 }
 0x2f6   : > { %5125 = vmatmul.mubr.bf16.gmra.mrb[12].mxu0 %v4744_v56 }
 0x370   : > { %v8525_v57 = vpop.f32.mrb[0].mxu1 }
 0x371   : > { %v8527_v37 = vpop.f32.mrb[1].mxu1 }
 0x372   : > { %v8529_v63 = vpop.f32.mrb[2].mxu1 }
 0x373   : > { %v8531_v26 = vpop.f32.mrb[3].mxu1 }
 0x378   : > { %v8533_v44 = vpop.f32.mrb[4].mxu1 }
 0x379   : > { %v8535_v30 = vpop.f32.mrb[5].mxu1 }
 0x37a   : > { %v8537_v53 = vpop.f32.mrb[6].mxu1 }
 0x37b   : > { %v8539_v31 = vpop.f32.mrb[7].mxu1 }
 0x380   : > { %v8541_v5 = vpop.f32.mrb[8].mxu1 }
 0x381   : > { %v8543_v19 = vpop.f32.mrb[9].mxu1 }
 0x382   : > { %v8545_v43 = vpop.f32.mrb[10].mxu1 }
 0x383   : > { %v8547_v10 = vpop.f32.mrb[11].mxu1 }
 0x388   : > { %v8549_v12 = vpop.f32.mrb[12].mxu1 }
 0x389   : > { %v8551_v58 = vpop.f32.mrb[13].mxu1 }
 0x38a   : > { %v8553_v8 = vpop.f32.mrb[14].mxu1 }
 0x38b   : > { %v8555_v33 = vpop.f32.mrb[15].mxu1 }
 0x390   : > { %v2725_v18 = vpop.f32.mrb[16].mxu1 }
 0x391   : > { %v4558_v11 = vpop.f32.mrb[16].mxu0  ;;  %v2727_v3 = vpop.f32.mrb[17].mxu1 }
 0x392   : > { %v5973_v40 = vadd.f32 %v4558_v11, %v2725_v18  ;;  %v4560_v34 = vpop.f32.mrb[17].mxu0  ;;  %v2729_v62 = vpop.f32.mrb[18].mxu1  ;;  %v5211_v11 = vsub.s32 0, %v5210_v23 }
 0x393   : > { %v5975_v50 = vadd.f32 %v4560_v34, %v2727_v3  ;;  %v4562_v38 = vpop.f32.mrb[18].mxu0  ;;  %v2731_v61 = vpop.f32.mrb[19].mxu1  ;;  %v5207_v34 = vld [vmem:[#allocation15] sm:$0x3] }
 0x394   : > { %v5977_v51 = vadd.f32 %v4562_v38, %v2729_v62  ;;  %v4564_v20 = vpop.f32.mrb[19].mxu0  ;;  %v5215_v62 = vsub.s32 1, %v5210_v23  ;;  %v8583_v38 = vrot.slane %v5207_v34, %v5211_v11 }
 0x395   : > { %v8557_v42 = vadd.f32 %v4564_v20, %v2731_v61 }
 0x398   : > { %v2735_v17 = vpop.f32.mrb[20].mxu1 }
 0x399   : > { %v4568_v52 = vpop.f32.mrb[20].mxu0  ;;  %v2737_v14 = vpop.f32.mrb[21].mxu1 }
 0x39a   : > { %v8559_v60 = vadd.f32 %v4568_v52, %v2735_v17  ;;  %v4570_v2 = vpop.f32.mrb[21].mxu0  ;;  %v2739_v24 = vpop.f32.mrb[22].mxu1  ;;  %v8585_v17 = vrot.slane %v5207_v34, %v5215_v62 }
 0x39b   : > { %v8561_v9 = vadd.f32 %v4570_v2, %v2737_v14  ;;  %v4572_v48 = vpop.f32.mrb[22].mxu0  ;;  %v2741_v47 = vpop.f32.mrb[23].mxu1 }
 0x39c   : > { %v8563_v36 = vadd.f32 %v4572_v48, %v2739_v24  ;;  %v4574_v28 = vpop.f32.mrb[23].mxu0 }
 0x39d   : > { %v8565_v35 = vadd.f32 %v4574_v28, %v2741_v47 }
 0x3a0   : > { %v2745_v21 = vpop.f32.mrb[24].mxu1 }
 0x3a1   : > { %v4578_v32 = vpop.f32.mrb[24].mxu0  ;;  %v2747_v49 = vpop.f32.mrb[25].mxu1 }
 0x3a2   : > { %v8567_v13 = vadd.f32 %v4578_v32, %v2745_v21  ;;  %v4580_v41 = vpop.f32.mrb[25].mxu0  ;;  %v2749_v4 = vpop.f32.mrb[26].mxu1 }
 0x3a3   : > { %v8569_v25 = vadd.f32 %v4580_v41, %v2747_v49  ;;  %v4582_v6 = vpop.f32.mrb[26].mxu0  ;;  %v2751_v39 = vpop.f32.mrb[27].mxu1 }
 0x3a4   : > { %v8571_v1 = vadd.f32 %v4582_v6, %v2749_v4  ;;  %v4584_v15 = vpop.f32.mrb[27].mxu0 }
 0x3a5   : > { %v8573_v16 = vadd.f32 %v4584_v15, %v2751_v39 }
 0x3a8   : > { %v2755_v54 = vpop.f32.mrb[28].mxu1 }
 0x3a9   : > { %v4588_v45 = vpop.f32.mrb[28].mxu0  ;;  %v2757_v55 = vpop.f32.mrb[29].mxu1 }
 0x3aa   : > { %v8575_v27 = vadd.f32 %v4588_v45, %v2755_v54  ;;  %v4590_v22 = vpop.f32.mrb[29].mxu0  ;;  %v2759_v29 = vpop.f32.mrb[30].mxu1 }
 0x3ab   : > { %v8577_v46 = vadd.f32 %v4590_v22, %v2757_v55  ;;  %v4592_v56 = vpop.f32.mrb[30].mxu0  ;;  %v2761_v7 = vpop.f32.mrb[31].mxu1 }
 0x3ac   : > { %v8579_v0 = vadd.f32 %v4592_v56, %v2759_v29  ;;  %v4594_v18 = vpop.f32.mrb[31].mxu0 }
 0x3ad   : > { %v8581_v3 = vadd.f32 %v4594_v18, %v2761_v7 }
 0x3b0   : > { %v5136_v20 = vpop.f32.mrb[32].mxu1 }
 0x3b1   : > { %v5096_v61 = vpop.f32.mrb[0].mxu0  ;;  %v5974_v14 = vadd.f32 %v5973_v40, %v5136_v20  ;;  %v5138_v24 = vpop.f32.mrb[33].mxu1 }
 0x3b2   : > { %v5957_v52 = vadd.f32 %v5096_v61, %v8525_v57  ;;  %v5098_v2 = vpop.f32.mrb[1].mxu0  ;;  %v5976_v47 = vadd.f32 %v5975_v50, %v5138_v24  ;;  %v5140_v21 = vpop.f32.mrb[34].mxu1 }
 0x3b3   : > { %v5958_v48 = vadd.f32 %v5098_v2, %v8527_v37  ;;  %v5100_v28 = vpop.f32.mrb[2].mxu0  ;;  %v5235_v49 = vadd.f32 %v5974_v14, %v8583_v38  ;;  %v5978_v4 = vadd.f32 %v5977_v51, %v5140_v21  ;;  %v5142_v39 = vpop.f32.mrb[35].mxu1 }
 0x3b4   : > { %v5219_v32 = vadd.f32 %v5957_v52, %v8583_v38  ;;  %v5959_v41 = vadd.f32 %v5100_v28, %v8529_v63  ;;  %v5102_v6 = vpop.f32.mrb[3].mxu0  ;;  %v5236_v40 = vadd.f32 %v5976_v47, %v8585_v17  ;;  %v5980_v50 = vadd.f32 %v8557_v42, %v5142_v39 }
 0x3b5   : > { %v5220_v57 = vadd.f32 %v5958_v48, %v8585_v17  ;;  %v5960_v37 = vadd.f32 %v5102_v6, %v8531_v26  ;;  %v5267_v59 = vmax.f32 %v5235_v49, 0.0  ;;  %v5237_v63 = vadd.f32 %v5978_v4, %v8583_v38 }
 0x3b6   : > { %v5251_v15 = vmax.f32 %v5219_v32, 0.0  ;;  %v5221_v23 = vadd.f32 %v5959_v41, %v8583_v38  ;;  %v5268_v54 = vmax.f32 %v5236_v40, 0.0  ;;  %v5238_v55 = vadd.f32 %v5980_v50, %v8585_v17 }
 0x3b7   : > { %v5252_v51 = vmax.f32 %v5220_v57, 0.0  ;;  %v5222_v45 = vadd.f32 %v5960_v37, %v8585_v17  ;;  %5299 = vst [vmem:[%s7916_s4 + $0x80] sm:$0xff] %v5267_v59  ;;  %v5269_v42 = vmax.f32 %v5237_v63, 0.0 }
 0x3b8   : > { %5283 = vst [vmem:[%s7916_s4] sm:$0xff] %v5251_v15  ;;  %v5253_v26 = vmax.f32 %v5221_v23, 0.0  ;;  %5300 = vst [vmem:[%s7916_s4 + $0x88] sm:$0xff] %v5268_v54  ;;  %v5270_v29 = vmax.f32 %v5238_v55, 0.0  ;;  %v5146_v7 = vpop.f32.mrb[36].mxu1 }
 0x3b9   : > { %5284 = vst [vmem:[%s7916_s4 + $0x8] sm:$0xff] %v5252_v51  ;;  %v5254_v22 = vmax.f32 %v5222_v45, 0.0  ;;  %v5106_v56 = vpop.f32.mrb[4].mxu0  ;;  %5301 = vst [vmem:[%s7916_s4 + $0x90] sm:$0xff] %v5269_v42  ;;  %v5982_v11 = vadd.f32 %v8559_v60, %v5146_v7  ;;  %v5148_v62 = vpop.f32.mrb[37].mxu1 }
 0x3ba   : > { %5285 = vst [vmem:[%s7916_s4 + $0x10] sm:$0xff] %v5253_v26  ;;  %v5961_v18 = vadd.f32 %v5106_v56, %v8533_v44  ;;  %v5108_v34 = vpop.f32.mrb[5].mxu0  ;;  %5302 = vst [vmem:[%s7916_s4 + $0x98] sm:$0xff] %v5270_v29  ;;  %v5984_v20 = vadd.f32 %v8561_v9, %v5148_v62  ;;  %v5150_v14 = vpop.f32.mrb[38].mxu1 }
 0x3bb   : > { %5286 = vst [vmem:[%s7916_s4 + $0x18] sm:$0xff] %v5254_v22  ;;  %v5962_v61 = vadd.f32 %v5108_v34, %v8535_v30  ;;  %v5110_v52 = vpop.f32.mrb[6].mxu0  ;;  %v5239_v24 = vadd.f32 %v5982_v11, %v8583_v38  ;;  %v5986_v44 = vadd.f32 %v8563_v36, %v5150_v14  ;;  %v5152_v47 = vpop.f32.mrb[39].mxu1 }
 0x3bc   : > { %v5223_v2 = vadd.f32 %v5961_v18, %v8583_v38  ;;  %v5963_v48 = vadd.f32 %v5110_v52, %v8537_v53  ;;  %v5112_v60 = vpop.f32.mrb[7].mxu0  ;;  %v5240_v30 = vadd.f32 %v5984_v20, %v8585_v17  ;;  %v5988_v21 = vadd.f32 %v8565_v35, %v5152_v47 }
 0x3bd   : > { %v5224_v28 = vadd.f32 %v5962_v61, %v8585_v17  ;;  %v5964_v9 = vadd.f32 %v5112_v60, %v8539_v31  ;;  %v5271_v49 = vmax.f32 %v5239_v24, 0.0  ;;  %v5241_v36 = vadd.f32 %v5986_v44, %v8583_v38 }
 0x3be   : > { %v5255_v32 = vmax.f32 %v5223_v2, 0.0  ;;  %v5225_v53 = vadd.f32 %v5963_v48, %v8583_v38  ;;  %v5272_v4 = vmax.f32 %v5240_v30, 0.0  ;;  %v5242_v39 = vadd.f32 %v5988_v21, %v8585_v17 }
 0x3bf   : > { %v5256_v41 = vmax.f32 %v5224_v28, 0.0  ;;  %v5226_v6 = vadd.f32 %v5964_v9, %v8585_v17  ;;  %5303 = vst [vmem:[%s7916_s4 + $0xa0] sm:$0xff] %v5271_v49  ;;  %v5273_v35 = vmax.f32 %v5241_v36, 0.0 }
 0x3c0   : > { %5287 = vst [vmem:[%s7916_s4 + $0x20] sm:$0xff] %v5255_v32  ;;  %v5257_v31 = vmax.f32 %v5225_v53, 0.0  ;;  %5304 = vst [vmem:[%s7916_s4 + $0xa8] sm:$0xff] %v5272_v4  ;;  %v5274_v40 = vmax.f32 %v5242_v39, 0.0  ;;  %v5156_v50 = vpop.f32.mrb[40].mxu1 }
 0x3c1   : > { %5288 = vst [vmem:[%s7916_s4 + $0x28] sm:$0xff] %v5256_v41  ;;  %v5258_v57 = vmax.f32 %v5226_v6, 0.0  ;;  %v5116_v37 = vpop.f32.mrb[8].mxu0  ;;  %5305 = vst [vmem:[%s7916_s4 + $0xb0] sm:$0xff] %v5273_v35  ;;  %v5990_v59 = vadd.f32 %v8567_v13, %v5156_v50  ;;  %v5158_v63 = vpop.f32.mrb[41].mxu1 }
 0x3c2   : > { %5289 = vst [vmem:[%s7916_s4 + $0x30] sm:$0xff] %v5257_v31  ;;  %v5965_v15 = vadd.f32 %v5116_v37, %v8541_v5  ;;  %v5118_v23 = vpop.f32.mrb[9].mxu0  ;;  %5306 = vst [vmem:[%s7916_s4 + $0xb8] sm:$0xff] %v5274_v40  ;;  %v5992_v54 = vadd.f32 %v8569_v25, %v5158_v63  ;;  %v5160_v55 = vpop.f32.mrb[42].mxu1 }
 0x3c3   : > { %5290 = vst [vmem:[%s7916_s4 + $0x38] sm:$0xff] %v5258_v57  ;;  %v5966_v51 = vadd.f32 %v5118_v23, %v8543_v19  ;;  %v5120_v45 = vpop.f32.mrb[10].mxu0  ;;  %v5243_v42 = vadd.f32 %v5990_v59, %v8583_v38  ;;  %v5994_v5 = vadd.f32 %v8571_v1, %v5160_v55  ;;  %v5162_v29 = vpop.f32.mrb[43].mxu1 }
 0x3c4   : > { %v5227_v26 = vadd.f32 %v5965_v15, %v8583_v38  ;;  %v5967_v22 = vadd.f32 %v5120_v45, %v8545_v43  ;;  %v5122_v13 = vpop.f32.mrb[11].mxu0  ;;  %v5244_v25 = vadd.f32 %v5992_v54, %v8585_v17  ;;  %v5996_v7 = vadd.f32 %v8573_v16, %v5162_v29 }
 0x3c5   : > { %v5228_v19 = vadd.f32 %v5966_v51, %v8585_v17  ;;  %v5968_v56 = vadd.f32 %v5122_v13, %v8547_v10  ;;  %v5275_v43 = vmax.f32 %v5243_v42, 0.0  ;;  %v5245_v1 = vadd.f32 %v5994_v5, %v8583_v38 }
 0x3c6   : > { %v5259_v18 = vmax.f32 %v5227_v26, 0.0  ;;  %v5229_v11 = vadd.f32 %v5967_v22, %v8583_v38  ;;  %v5276_v62 = vmax.f32 %v5244_v25, 0.0  ;;  %v5246_v20 = vadd.f32 %v5996_v7, %v8585_v17 }
 0x3c7   : > { %v5260_v34 = vmax.f32 %v5228_v19, 0.0  ;;  %v5230_v61 = vadd.f32 %v5968_v56, %v8585_v17  ;;  %5307 = vst [vmem:[%s7916_s4 + $0xc0] sm:$0xff] %v5275_v43  ;;  %v5277_v16 = vmax.f32 %v5245_v1, 0.0 }
 0x3c8   : > { %5291 = vst [vmem:[%s7916_s4 + $0x40] sm:$0xff] %v5259_v18  ;;  %v5261_v10 = vmax.f32 %v5229_v11, 0.0  ;;  %5308 = vst [vmem:[%s7916_s4 + $0xc8] sm:$0xff] %v5276_v62  ;;  %v5278_v14 = vmax.f32 %v5246_v20, 0.0  ;;  %v5166_v24 = vpop.f32.mrb[44].mxu1 }
 0x3c9   : > { %5292 = vst [vmem:[%s7916_s4 + $0x48] sm:$0xff] %v5260_v34  ;;  %v5262_v52 = vmax.f32 %v5230_v61, 0.0  ;;  %v5126_v2 = vpop.f32.mrb[12].mxu0  ;;  %5309 = vst [vmem:[%s7916_s4 + $0xd0] sm:$0xff] %v5277_v16  ;;  %v5998_v44 = vadd.f32 %v8575_v27, %v5166_v24  ;;  %v5168_v47 = vpop.f32.mrb[45].mxu1 }
 0x3ca   : > { %5293 = vst [vmem:[%s7916_s4 + $0x50] sm:$0xff] %v5261_v10  ;;  %v5969_v48 = vadd.f32 %v5126_v2, %v8549_v12  ;;  %v5128_v60 = vpop.f32.mrb[13].mxu0  ;;  %5310 = vst [vmem:[%s7916_s4 + $0xd8] sm:$0xff] %v5278_v14  ;;  %v6000_v30 = vadd.f32 %v8577_v46, %v5168_v47  ;;  %v5170_v21 = vpop.f32.mrb[46].mxu1 }
 0x3cb   : > { %5294 = vst [vmem:[%s7916_s4 + $0x58] sm:$0xff] %v5262_v52  ;;  %v5970_v28 = vadd.f32 %v5128_v60, %v8551_v58  ;;  %v5130_v9 = vpop.f32.mrb[14].mxu0  ;;  %v5247_v12 = vadd.f32 %v5998_v44, %v8583_v38  ;;  %v6002_v49 = vadd.f32 %v8579_v0, %v5170_v21  ;;  %v5172_v36 = vpop.f32.mrb[47].mxu1 }
 0x3cc   : > { %v5231_v32 = vadd.f32 %v5969_v48, %v8583_v38  ;;  %v5971_v27 = vadd.f32 %v5130_v9, %v8553_v8  ;;  %v5132_v53 = vpop.f32.mrb[15].mxu0  ;;  %v5248_v58 = vadd.f32 %v6000_v30, %v8585_v17  ;;  %v6004_v4 = vadd.f32 %v8581_v3, %v5172_v36 }
 0x3cd   : > { %v5232_v41 = vadd.f32 %v5970_v28, %v8585_v17  ;;  %v5972_v46 = vadd.f32 %v5132_v53, %v8555_v33  ;;  %v5279_v8 = vmax.f32 %v5247_v12, 0.0  ;;  %v5249_v39 = vadd.f32 %v6002_v49, %v8583_v38 }
 0x3ce   : > { %v5263_v6 = vmax.f32 %v5231_v32, 0.0  ;;  %v5233_v0 = vadd.f32 %v5971_v27, %v8583_v38  ;;  %v5280_v35 = vmax.f32 %v5248_v58, 0.0  ;;  %v5250_v3 = vadd.f32 %v6004_v4, %v8585_v17 }
 0x3cf   : > { %v5264_v31 = vmax.f32 %v5232_v41, 0.0  ;;  %v5234_v33 = vadd.f32 %v5972_v46, %v8585_v17  ;;  %5311 = vst [vmem:[%s7916_s4 + $0xe0] sm:$0xff] %v5279_v8  ;;  %v5281_v40 = vmax.f32 %v5249_v39, 0.0 }
 0x3d0   : > { %5295 = vst [vmem:[%s7916_s4 + $0x60] sm:$0xff] %v5263_v6  ;;  %v5265_v57 = vmax.f32 %v5233_v0, 0.0  ;;  %5312 = vst [vmem:[%s7916_s4 + $0xe8] sm:$0xff] %v5280_v35  ;;  %v5282_v37 = vmax.f32 %v5250_v3, 0.0 }
 0x3d1   : > { %5296 = vst [vmem:[%s7916_s4 + $0x68] sm:$0xff] %v5264_v31  ;;  %v5266_v38 = vmax.f32 %v5234_v33, 0.0  ;;  %5313 = vst [vmem:[%s7916_s4 + $0xf0] sm:$0xff] %v5281_v40 }
 0x3d2   : > { %5297 = vst [vmem:[%s7916_s4 + $0x70] sm:$0xff] %v5265_v57  ;;  %5314 = vst [vmem:[%s7916_s4 + $0xf8] sm:$0xff] %v5282_v37 }
 0x3d3   : > { %5298 = vst [vmem:[%s7916_s4 + $0x78] sm:$0xff] %v5266_v38 }
 0x3d4   : > { %7078 = shalt.err (!%p7075_p5)
}
 0x3d5   : > { %s7079_s4 = scalar_lea.hbm %s8683_s9, 4096  ;;  %s7083_s27 = scalar_lea.hbm %s8951_s24, 16384 }
 0x3d6   : > { %p7080_p2 = scmp.ne.s32.totalorder %s8683_s9, %s7079_s4  ;;  %p7084_p3 = scmp.lt.u32.totalorder %s8683_s9, %s8951_s24 }
 0x3d7   : > { %p7085_p8 = scmp.lt.u32.totalorder %s7083_s27, %s7079_s4  ;;  %p7087_p12 = scmp.lt.u32.totalorder %s7079_s4, %s8683_s9 }
 0x3d8   : > { %p7081_p10 = pnand %p7080_p2, %p8952_p7 }
 0x3d9   : > { %p7086_p11 = por %p7085_p8, %p7084_p3 }
 0x3da   : > { %p7082_p1 = pneg %p7081_p10 }
 0x3db   : > { %p7088_p4 = por %p7087_p12, %p7086_p11 }
 0x3dd   : > { %p7089_p9 = pnand %p7088_p4, %p7082_p1 }
 0x3df   : > { %7092 = shalt.err (!%p7089_p9)
}
 0x3e0   : > { %s7255_s25 = smov 256   ;;  %s7256_s26 = smov 16  }
 0x3e1   : > { %6233 = dma.vmem_to_hbm [thread:$0]  (%p8952_p7), %s8685_s6, 4096, %s8683_s9, %s5316_s14, %s7255_s25, %s7255_s25, %s7256_s26  }
 0x3e2 PF: > { %s8953_s19 = sld [smem:[#allocation31_spill]]  ;;  %s8954_s16 = sld [smem:[#allocation42_spill]] }
 0x3e3   : > { %p6270_p0 = scmp.ge.s32.totalorder %s7239_s18, 2 }
 0x3e8   : > { %s5347_s12 = sand.u32 1, %s8953_s19   ;;  %p8955_p13 = scmp.ne.s32.totalorder %s8954_s16, 0 }
 0x3e9   : > { %s5348_s23 = scalar_lea.sflag [#allocation5], %s5347_s12 }
 0x3ea   : > { %p6262_p6 = pnand %p6270_p0, %p8955_p13 }
 0x3ec   : > { %7182 = dma.done.wait (!%p6262_p6), %s5348_s23, 4096  }
 0x3ed   : > { %7184 = vsyncadd (!%p6262_p6), %s5348_s23, 4294963200  ;;  %s34_s18 = sadd.s32 1, %s7239_s18   ;;  %s8957_s27 = sld [smem:[#allocation28_spill]] }
 0x3ee   : > { %p8722_p5 = scmp.ge.s32.totalorder %s34_s18, 6   ;;  %s8958_s28 = sld [smem:[#allocation29_spill]] }
 0x3ef   : > { %s8959_s30 = sld [smem:[#allocation30_spill]]  ;;  %s8960_s8 = sld [smem:[#allocation32_spill]] }
 0x3f0   : > { %s8961_s6 = sld [smem:[#allocation46_spill]]  ;;  %s8962_s14 = sld [smem:[#allocation35_spill]] }
 0x3f1   : > { %s8963_s1 = sld [smem:[#allocation36_spill]]  ;;  %s8964_s16 = sld [smem:[#allocation39_spill]] }
 0x3f2   : > { %s8965_s17 = sld [smem:[#allocation44_spill]]  ;;  %s8967_s29 = smov %s8989_s21 }
 0x3f3   : > { %s8968_s9 = smov %s7207_s10  ;;  %s8969_s10 = smov %s7557_s15 }
 0x3f4   : > { %s8971_s12 = smov %s7219_s13  ;;  %33 = sbr.rel (!%p8722_p5) target bundleno = 25 (0x19), region = 185 }
 0x3f5   : > { %s8970_s11 = smov %s8960_s8 }
 0x3f6   : > { %s8972_s13 = smov %s8961_s6 }
 0x3f7   : > { %s8973_s15 = smov %s8963_s1 }
 0x3fb   :  { %5353 = vsyncpa [#allocation4], 1 }
 0x3fc   :  { %5355 = vsyncpa [#allocation4 + $0x1], 1 }
 0x3fd   :  { %5356 = vsyncpa [#allocation7], 1 }
 0x3fe   :  { %5358 = vsyncpa [#allocation7 + $0x1], 1 }
 0x3ff   :  { %5359 = vsyncpa [#allocation10], 1 }
 0x400   :  { %5361 = vsyncpa [#allocation10 + $0x1], 1 }
 0x401   :  { %5362 = vsyncpa [#allocation13], 1 }
 0x402   :  { %5364 = vsyncpa [#allocation13 + $0x1], 1 }
 0x403   :  { %5365 = vsyncpa [#allocation16], 1 }
 0x404   :  { %5366 = vsyncpa [#allocation5], 1 }
 0x405   :  { %5368 = vsyncpa [#allocation5 + $0x1], 1 }

</bundles_post_ra>
